<compile_context>
chip_gen: v7x
topology: tpu7x:2x2x1
jax: 0.10.0
libtpu: 0.0.40
codegen_flags: <defaults>
</compile_context>

<pallas_src>
import functools
import math

import jax
import jax.numpy as jnp
from jax import lax
from jax.experimental import pallas as pl
from jax.experimental.pallas import tpu as pltpu


def _sigmoid(z):
    # sigmoid(z) = 0.5 * (tanh(z / 2) + 1): one EUP transcendental per gate
    # instead of exp + reciprocal.
    return 0.5 * (jnp.tanh(0.5 * z) + 1.0)


def _lstm_stack_kernel(x_ref, wih0_ref, wihr_ref, whh_ref, b_ref,
                       h0_ref, c0_ref,
                       y_ref, hT_ref, cT_ref,
                       gx_scr, buf_scr, h_scr, c_scr,
                       *, num_layers, seq_len, t_blk, needs_mask):
    """All LSTM layers, one time block per grid step (time is 'arbitrary').

    h_scr / c_scr (VMEM, f32, (L, B, H)) carry the recurrent state of every
    layer across grid blocks.  gx_scr holds the current layer's blocked input
    projection.  buf_scr holds the current layer's per-step outputs so the
    next layer's input projection never touches HBM.
    """
    blk = pl.program_id(0)
    tb, B, I = x_ref.shape
    H = h_scr.shape[-1]

    @pl.when(blk == 0)
    def _():
        h_scr[...] = h0_ref[...].astype(jnp.float32)
        c_scr[...] = c0_ref[...].astype(jnp.float32)

    for l in range(num_layers):
        # Input projection for this layer over the whole time block as one
        # big GEMM (M = T_BLK * B rows), off the per-step serial chain.
        if l == 0:
            x_blk = x_ref[...].reshape(tb * B, I)
            w_in = wih0_ref[...]
        else:
            # Previous layer's outputs for this block, still in VMEM.
            x_blk = buf_scr[...].reshape(tb * B, H)
            w_in = wihr_ref[l - 1]
        gx_scr[...] = (jnp.dot(x_blk, w_in,
                               preferred_element_type=jnp.float32)
                       + b_ref[l])

        w_hh = whh_ref[l]                       # (H, 4H), VMEM-resident
        is_last_layer = (l == num_layers - 1)

        def step(s, carry):
            h, c = carry
            row = pl.multiple_of(s * B, B)
            gates = gx_scr[pl.ds(row, B), :] + jnp.dot(
                h, w_hh, preferred_element_type=jnp.float32)   # (B, 4H)

            i_g = _sigmoid(gates[:, 0 * H:1 * H])
            f_g = _sigmoid(gates[:, 1 * H:2 * H])
            g_g = jnp.tanh(gates[:, 2 * H:3 * H])
            o_g = _sigmoid(gates[:, 3 * H:4 * H])

            c_new = f_g * c + i_g * g_g
            h_new = o_g * jnp.tanh(c_new)

            if needs_mask:
                # Steps past the true sequence length (padding of the last
                # time block) must not advance the recurrent state.
                valid = (blk * t_blk + s) < seq_len
                h_new = jnp.where(valid, h_new, h)
                c_new = jnp.where(valid, c_new, c)

            if is_last_layer:
                y_ref[s] = h_new.astype(y_ref.dtype)
            else:
                buf_scr[s] = h_new   # feeds the next layer's blocked GEMM
            return h_new, c_new

        h, c = lax.fori_loop(0, tb, step, (h_scr[l], c_scr[l]), unroll=True)
        h_scr[l] = h
        c_scr[l] = c

        # Constant-index output blocks stay VMEM-resident across the grid;
        # writing them every block is cheap and robust to pipelining changes.
        hT_ref[l] = h.astype(hT_ref.dtype)
        cT_ref[l] = c.astype(cT_ref.dtype)


def lstm_stack_forward(x, h0, c0, params, *, t_blk=8):
    """Equivalent of LSTMStack.forward: returns (output, (h_n, c_n)).

    x: (T, B, I); h0/c0: (L, B, H);
    params: list of (w_ih (in,4H), w_hh (H,4H), b (1,4H)) per layer.
    """
    T, B, I = x.shape
    L, _, H = h0.shape
    assert len(params) == L

    t_blk = max(1, min(t_blk, T))
    n_blk = pl.cdiv(T, t_blk)
    T_pad = n_blk * t_blk
    needs_mask = (T_pad != T)
    if needs_mask:
        x = jnp.pad(x, ((0, T_pad - T), (0, 0), (0, 0)))

    wih0 = params[0][0]                                       # (I, 4H)
    if L > 1:
        wih_rest = jnp.stack([params[l][0] for l in range(1, L)])  # (L-1,H,4H)
    else:
        wih_rest = jnp.zeros((1, H, 4 * H), x.dtype)          # unused dummy
    whh_all = jnp.stack([p[1] for p in params])               # (L, H, 4H)
    b_all = jnp.stack([p[2] for p in params])                 # (L, 1, 4H)

    kernel = functools.partial(_lstm_stack_kernel, num_layers=L, seq_len=T,
                               t_blk=t_blk, needs_mask=needs_mask)

    nR = wih_rest.shape[0]
    y, hT, cT = pl.pallas_call(
        kernel,
        out_shape=(
            jax.ShapeDtypeStruct((T_pad, B, H), x.dtype),  # per-step outputs
            jax.ShapeDtypeStruct((L, B, H), x.dtype),      # h_n
            jax.ShapeDtypeStruct((L, B, H), x.dtype),      # c_n
        ),
        grid_spec=pltpu.PrefetchScalarGridSpec(
            num_scalar_prefetch=0,
            grid=(n_blk,),
            in_specs=[
                pl.BlockSpec((t_blk, B, I), lambda t: (t, 0, 0)),    # x block
                pl.BlockSpec((I, 4 * H), lambda t: (0, 0)),          # w_ih L0
                pl.BlockSpec((nR, H, 4 * H), lambda t: (0, 0, 0)),   # w_ih 1..
                pl.BlockSpec((L, H, 4 * H), lambda t: (0, 0, 0)),    # w_hh all
                pl.BlockSpec((L, 1, 4 * H), lambda t: (0, 0, 0)),    # biases
                pl.BlockSpec((L, B, H), lambda t: (0, 0, 0)),        # h0
                pl.BlockSpec((L, B, H), lambda t: (0, 0, 0)),        # c0
            ],
            out_specs=(
                pl.BlockSpec((t_blk, B, H), lambda t: (t, 0, 0)),
                pl.BlockSpec((L, B, H), lambda t: (0, 0, 0)),
                pl.BlockSpec((L, B, H), lambda t: (0, 0, 0)),
            ),
            scratch_shapes=[
                pltpu.VMEM((t_blk * B, 4 * H), jnp.float32),  # gx per block
                pltpu.VMEM((t_blk, B, H), jnp.float32),       # inter-layer act
                pltpu.VMEM((L, B, H), jnp.float32),           # recurrent h
                pltpu.VMEM((L, B, H), jnp.float32),           # recurrent c
            ],
        ),
        compiler_params=pltpu.CompilerParams(
            dimension_semantics=("arbitrary",)),   # time is a true recurrence
    )(x, wih0, wih_rest, whh_all, b_all, h0, c0)

    if needs_mask:
        y = y[:T]
    return y, (hT, cT)


def lstm_ref(x, h0, c0, params):
    """Pure-JAX reference (PyTorch nn.LSTM semantics)."""
    T = x.shape[0]
    layer_in = x
    hs, cs = [], []
    for l, (w_ih, w_hh, b) in enumerate(params):
        h, c = h0[l], c0[l]
        H = h.shape[-1]
        outs = []
        for t in range(T):
            gates = layer_in[t] @ w_ih + h @ w_hh + b
            i = jax.nn.sigmoid(gates[:, :H])
            f = jax.nn.sigmoid(gates[:, H:2 * H])
            g = jnp.tanh(gates[:, 2 * H:3 * H])
            o = jax.nn.sigmoid(gates[:, 3 * H:])
            c = f * c + i * g
            h = o * jnp.tanh(c)
            outs.append(h)
        layer_in = jnp.stack(outs)
        hs.append(h)
        cs.append(c)
    return layer_in, (jnp.stack(hs), jnp.stack(cs))


def init_lstm_params(key, input_size, hidden_size, num_layers):
    """Deterministic init mirroring nn.LSTM: U(-1/sqrt(H), 1/sqrt(H))."""
    k = 1.0 / math.sqrt(hidden_size)
    params = []
    for l in range(num_layers):
        in_sz = input_size if l == 0 else hidden_size
        key, k1, k2, k3, k4 = jax.random.split(key, 5)
        w_ih = jax.random.uniform(k1, (4 * hidden_size, in_sz),
                                  jnp.float32, -k, k)
        w_hh = jax.random.uniform(k2, (4 * hidden_size, hidden_size),
                                  jnp.float32, -k, k)
        b_ih = jax.random.uniform(k3, (4 * hidden_size,), jnp.float32, -k, k)
        b_hh = jax.random.uniform(k4, (4 * hidden_size,), jnp.float32, -k, k)
        # Pre-transpose for the kernel's (x @ W) convention; fold the biases.
        params.append((w_ih.T, w_hh.T, (b_ih + b_hh)[None, :]))
    return params


if __name__ == "__main__":
    # H=128 keeps gate slices lane-aligned and y stores unmasked; B=8 keeps the
    # matmul M dim sublane-aligned. seq_len=12 with T_BLK=8 exercises the
    # padded-tail masking path.
    seq_len, batch, input_size, hidden_size, num_layers = 12, 8, 32, 128, 2

    key = jax.random.PRNGKey(0)
    kx, kh, kc, kp = jax.random.split(key, 4)
    x = jax.random.normal(kx, (seq_len, batch, input_size), jnp.float32)
    h0 = jax.random.normal(kh, (num_layers, batch, hidden_size), jnp.float32)
    c0 = jax.random.normal(kc, (num_layers, batch, hidden_size), jnp.float32)
    params = init_lstm_params(kp, input_size, hidden_size, num_layers)

    y, (h_n, c_n) = lstm_stack_forward(x, h0, c0, params, t_blk=8)
    jax.block_until_ready((y, h_n, c_n))

    y_ref, (h_ref, c_ref) = lstm_ref(x, h0, c0, params)
    assert y.shape == (seq_len, batch, hidden_size)
    assert h_n.shape == (num_layers, batch, hidden_size)
    assert c_n.shape == (num_layers, batch, hidden_size)
    # Tolerance 1e-4: the kernel uses the tanh-identity sigmoid, which differs
    # from jax.nn.sigmoid by ~1 ulp per gate application.
    assert jnp.allclose(y, y_ref, atol=1e-4, rtol=1e-4)
    assert jnp.allclose(h_n, h_ref, atol=1e-4, rtol=1e-4)
    assert jnp.allclose(c_n, c_ref, atol=1e-4, rtol=1e-4)

    print("KERNEL_OK")
</pallas_src>

<mosaic_0001>
module attributes {stable_mosaic.version = 11 : i64} {
  func.func @_lstm_stack_kernel(%arg0: i32, %arg1: memref<8x8x32xf32, #tpu.memory_space<vmem>>, %arg2: memref<32x512xf32, #tpu.memory_space<vmem>>, %arg3: memref<1x128x512xf32, #tpu.memory_space<vmem>>, %arg4: memref<2x128x512xf32, #tpu.memory_space<vmem>>, %arg5: memref<2x1x512xf32, #tpu.memory_space<vmem>>, %arg6: memref<2x8x128xf32, #tpu.memory_space<vmem>>, %arg7: memref<2x8x128xf32, #tpu.memory_space<vmem>>, %arg8: memref<8x8x128xf32, #tpu.memory_space<vmem>>, %arg9: memref<2x8x128xf32, #tpu.memory_space<vmem>>, %arg10: memref<2x8x128xf32, #tpu.memory_space<vmem>>, %arg11: memref<64x512xf32, #tpu.memory_space<vmem>>, %arg12: memref<8x8x128xf32, #tpu.memory_space<vmem>>, %arg13: memref<2x8x128xf32, #tpu.memory_space<vmem>>, %arg14: memref<2x8x128xf32, #tpu.memory_space<vmem>>) attributes {dimension_semantics = [#tpu.dimension_semantics<arbitrary>], iteration_bounds = array<i64: 2>, scalar_prefetch = 0 : i64, scratch_operands = 4 : i64, tpu.core_type = #tpu.core_type<tc>, window_params = [{transform_indices = @transform_0, window_bounds = array<i64: 8, 8, 32>}, {pipeline_mode = #tpu.pipeline_mode<synchronous>, transform_indices = @transform_1, window_bounds = array<i64: 32, 512>}, {pipeline_mode = #tpu.pipeline_mode<synchronous>, transform_indices = @transform_2, window_bounds = array<i64: 1, 128, 512>}, {pipeline_mode = #tpu.pipeline_mode<synchronous>, transform_indices = @transform_3, window_bounds = array<i64: 2, 128, 512>}, {pipeline_mode = #tpu.pipeline_mode<synchronous>, transform_indices = @transform_4, window_bounds = array<i64: 2, 1, 512>}, {pipeline_mode = #tpu.pipeline_mode<synchronous>, transform_indices = @transform_5, window_bounds = array<i64: 2, 8, 128>}, {pipeline_mode = #tpu.pipeline_mode<synchronous>, transform_indices = @transform_6, window_bounds = array<i64: 2, 8, 128>}, {transform_indices = @transform_7, window_bounds = array<i64: 8, 8, 128>}, {pipeline_mode = #tpu.pipeline_mode<synchronous>, transform_indices = @transform_8, window_bounds = array<i64: 2, 8, 128>}, {pipeline_mode = #tpu.pipeline_mode<synchronous>, transform_indices = @transform_9, window_bounds = array<i64: 2, 8, 128>}]} {
    %c0_i32 = arith.constant 0 : i32
    %0 = arith.cmpi eq, %arg0, %c0_i32 : i32
    %1 = arith.extui %0 : i1 to i32
    %c0_i32_0 = arith.constant 0 : i32
    %2 = arith.cmpi ne, %1, %c0_i32_0 : i32
    scf.if %2 {
      %c0_328 = arith.constant 0 : index
      %c0_329 = arith.constant 0 : index
      %c0_330 = arith.constant 0 : index
      %794 = vector.load %arg6[%c0_328, %c0_329, %c0_330] : memref<2x8x128xf32, #tpu.memory_space<vmem>>, vector<2x8x128xf32>
      %c0_331 = arith.constant 0 : index
      %c0_332 = arith.constant 0 : index
      %c0_333 = arith.constant 0 : index
      %795 = vector.load %arg13[%c0_331, %c0_332, %c0_333] : memref<2x8x128xf32, #tpu.memory_space<vmem>>, vector<2x8x128xf32>
      tpu.vector_store %arg13[%c0_331, %c0_332, %c0_333], %794 {strides = array<i32>} : memref<2x8x128xf32, #tpu.memory_space<vmem>>, vector<2x8x128xf32>,
      %c0_334 = arith.constant 0 : index
      %c0_335 = arith.constant 0 : index
      %c0_336 = arith.constant 0 : index
      %796 = vector.load %arg7[%c0_334, %c0_335, %c0_336] : memref<2x8x128xf32, #tpu.memory_space<vmem>>, vector<2x8x128xf32>
      %c0_337 = arith.constant 0 : index
      %c0_338 = arith.constant 0 : index
      %c0_339 = arith.constant 0 : index
      %797 = vector.load %arg14[%c0_337, %c0_338, %c0_339] : memref<2x8x128xf32, #tpu.memory_space<vmem>>, vector<2x8x128xf32>
      tpu.vector_store %arg14[%c0_337, %c0_338, %c0_339], %796 {strides = array<i32>} : memref<2x8x128xf32, #tpu.memory_space<vmem>>, vector<2x8x128xf32>,
    } else {
    }
    %c0 = arith.constant 0 : index
    %c0_1 = arith.constant 0 : index
    %c0_2 = arith.constant 0 : index
    %3 = vector.load %arg1[%c0, %c0_1, %c0_2] : memref<8x8x32xf32, #tpu.memory_space<vmem>>, vector<8x8x32xf32>
    %4 = vector.shape_cast %3 : vector<8x8x32xf32> to vector<64x32xf32>
    %c0_3 = arith.constant 0 : index
    %c0_4 = arith.constant 0 : index
    %5 = vector.load %arg2[%c0_3, %c0_4] : memref<32x512xf32, #tpu.memory_space<vmem>>, vector<32x512xf32>
    %cst = arith.constant dense<0.000000e+00> : vector<64x512xf32>
    %6 = tpu.matmul %4, %5, %cst {dimension_numbers = #tpu.dot_dimension_numbers<[1], [0], [0], [1], [0, 0, 1, 1], [], []>} : vector<64x32xf32>, vector<32x512xf32>, vector<64x512xf32> -> vector<64x512xf32>
    %c0_5 = arith.constant 0 : index
    %c0_6 = arith.constant 0 : index
    %c0_7 = arith.constant 0 : index
    %7 = vector.load %arg5[%c0_5, %c0_6, %c0_7] : memref<2x1x512xf32, #tpu.memory_space<vmem>>, vector<1x1x512xf32>
    %8 = vector.shape_cast %7 : vector<1x1x512xf32> to vector<1x512xf32>
    %9 = vector.broadcast %8 : vector<1x512xf32> to vector<64x512xf32>
    %10 = arith.addf %6, %9 : vector<64x512xf32>
    %c0_8 = arith.constant 0 : index
    %c0_9 = arith.constant 0 : index
    %11 = vector.load %arg11[%c0_8, %c0_9] : memref<64x512xf32, #tpu.memory_space<vmem>>, vector<64x512xf32>
    tpu.vector_store %arg11[%c0_8, %c0_9], %10 {strides = array<i32>} : memref<64x512xf32, #tpu.memory_space<vmem>>, vector<64x512xf32>,
    %c0_10 = arith.constant 0 : index
    %c0_11 = arith.constant 0 : index
    %c0_12 = arith.constant 0 : index
    %12 = vector.load %arg4[%c0_10, %c0_11, %c0_12] : memref<2x128x512xf32, #tpu.memory_space<vmem>>, vector<1x128x512xf32>
    %13 = vector.shape_cast %12 : vector<1x128x512xf32> to vector<128x512xf32>
    %c0_13 = arith.constant 0 : index
    %c0_14 = arith.constant 0 : index
    %c0_15 = arith.constant 0 : index
    %14 = vector.load %arg13[%c0_13, %c0_14, %c0_15] : memref<2x8x128xf32, #tpu.memory_space<vmem>>, vector<1x8x128xf32>
    %15 = vector.shape_cast %14 : vector<1x8x128xf32> to vector<8x128xf32>
    %c0_16 = arith.constant 0 : index
    %c0_17 = arith.constant 0 : index
    %c0_18 = arith.constant 0 : index
    %16 = vector.load %arg14[%c0_16, %c0_17, %c0_18] : memref<2x8x128xf32, #tpu.memory_space<vmem>>, vector<1x8x128xf32>
    %17 = vector.shape_cast %16 : vector<1x8x128xf32> to vector<8x128xf32>
    %c0_i32_19 = arith.constant 0 : i32
    %c8_i32 = arith.constant 8 : i32
    %18 = arith.muli %c0_i32_19, %c8_i32 : i32
    %19 = tpu.assume_multiple %18, 8 : i32
    %20 = arith.index_cast %19 : i32 to index
    %c0_20 = arith.constant 0 : index
    %21 = vector.load %arg11[%20, %c0_20] : memref<64x512xf32, #tpu.memory_space<vmem>>, vector<8x512xf32>
    %cst_21 = arith.constant dense<0.000000e+00> : vector<8x512xf32>
    %22 = tpu.matmul %15, %13, %cst_21 {dimension_numbers = #tpu.dot_dimension_numbers<[1], [0], [0], [1], [0, 0, 1, 1], [], []>} : vector<8x128xf32>, vector<128x512xf32>, vector<8x512xf32> -> vector<8x512xf32>
    %23 = arith.addf %21, %22 : vector<8x512xf32>
    %24 = vector.extract_strided_slice %23 {offsets = [0, 0], sizes = [8, 128], strides = [1, 1]} : vector<8x512xf32> to vector<8x128xf32>
    %cst_22 = arith.constant 5.000000e-01 : f32
    %25 = vector.broadcast %cst_22 : f32 to vector<8x128xf32>
    %26 = arith.mulf %25, %24 : vector<8x128xf32>
    %27 = math.tanh %26 : vector<8x128xf32>
    %cst_23 = arith.constant 1.000000e+00 : f32
    %28 = vector.broadcast %cst_23 : f32 to vector<8x128xf32>
    %29 = arith.addf %27, %28 : vector<8x128xf32>
    %cst_24 = arith.constant 5.000000e-01 : f32
    %30 = vector.broadcast %cst_24 : f32 to vector<8x128xf32>
    %31 = arith.mulf %30, %29 : vector<8x128xf32>
    %32 = vector.extract_strided_slice %23 {offsets = [0, 128], sizes = [8, 128], strides = [1, 1]} : vector<8x512xf32> to vector<8x128xf32>
    %cst_25 = arith.constant 5.000000e-01 : f32
    %33 = vector.broadcast %cst_25 : f32 to vector<8x128xf32>
    %34 = arith.mulf %33, %32 : vector<8x128xf32>
    %35 = math.tanh %34 : vector<8x128xf32>
    %cst_26 = arith.constant 1.000000e+00 : f32
    %36 = vector.broadcast %cst_26 : f32 to vector<8x128xf32>
    %37 = arith.addf %35, %36 : vector<8x128xf32>
    %cst_27 = arith.constant 5.000000e-01 : f32
    %38 = vector.broadcast %cst_27 : f32 to vector<8x128xf32>
    %39 = arith.mulf %38, %37 : vector<8x128xf32>
    %40 = vector.extract_strided_slice %23 {offsets = [0, 256], sizes = [8, 128], strides = [1, 1]} : vector<8x512xf32> to vector<8x128xf32>
    %41 = math.tanh %40 : vector<8x128xf32>
    %42 = vector.extract_strided_slice %23 {offsets = [0, 384], sizes = [8, 128], strides = [1, 1]} : vector<8x512xf32> to vector<8x128xf32>
    %cst_28 = arith.constant 5.000000e-01 : f32
    %43 = vector.broadcast %cst_28 : f32 to vector<8x128xf32>
    %44 = arith.mulf %43, %42 : vector<8x128xf32>
    %45 = math.tanh %44 : vector<8x128xf32>
    %cst_29 = arith.constant 1.000000e+00 : f32
    %46 = vector.broadcast %cst_29 : f32 to vector<8x128xf32>
    %47 = arith.addf %45, %46 : vector<8x128xf32>
    %cst_30 = arith.constant 5.000000e-01 : f32
    %48 = vector.broadcast %cst_30 : f32 to vector<8x128xf32>
    %49 = arith.mulf %48, %47 : vector<8x128xf32>
    %50 = arith.mulf %39, %17 : vector<8x128xf32>
    %51 = arith.mulf %31, %41 : vector<8x128xf32>
    %52 = arith.addf %50, %51 : vector<8x128xf32>
    %53 = math.tanh %52 : vector<8x128xf32>
    %54 = arith.mulf %49, %53 : vector<8x128xf32>
    %c8_i32_31 = arith.constant 8 : i32
    %55 = arith.muli %arg0, %c8_i32_31 : i32
    %56 = arith.addi %55, %c0_i32_19 : i32
    %c12_i32 = arith.constant 12 : i32
    %57 = arith.cmpi slt, %56, %c12_i32 : i32
    %58 = arith.select %57, %54, %15 : vector<8x128xf32>
    %59 = arith.select %57, %52, %17 : vector<8x128xf32>
    %60 = arith.index_cast %c0_i32_19 : i32 to index
    %c0_32 = arith.constant 0 : index
    %c0_33 = arith.constant 0 : index
    %61 = vector.load %arg12[%60, %c0_32, %c0_33] : memref<8x8x128xf32, #tpu.memory_space<vmem>>, vector<1x8x128xf32>
    %62 = vector.shape_cast %61 : vector<1x8x128xf32> to vector<8x128xf32>
    %63 = vector.shape_cast %58 : vector<8x128xf32> to vector<1x8x128xf32>
    tpu.vector_store %arg12[%60, %c0_32, %c0_33], %63 {strides = array<i32>} : memref<8x8x128xf32, #tpu.memory_space<vmem>>, vector<1x8x128xf32>,
    %c1_i32 = arith.constant 1 : i32
    %c8_i32_34 = arith.constant 8 : i32
    %64 = arith.muli %c1_i32, %c8_i32_34 : i32
    %65 = tpu.assume_multiple %64, 8 : i32
    %66 = arith.index_cast %65 : i32 to index
    %c0_35 = arith.constant 0 : index
    %67 = vector.load %arg11[%66, %c0_35] : memref<64x512xf32, #tpu.memory_space<vmem>>, vector<8x512xf32>
    %cst_36 = arith.constant dense<0.000000e+00> : vector<8x512xf32>
    %68 = tpu.matmul %58, %13, %cst_36 {dimension_numbers = #tpu.dot_dimension_numbers<[1], [0], [0], [1], [0, 0, 1, 1], [], []>} : vector<8x128xf32>, vector<128x512xf32>, vector<8x512xf32> -> vector<8x512xf32>
    %69 = arith.addf %67, %68 : vector<8x512xf32>
    %70 = vector.extract_strided_slice %69 {offsets = [0, 0], sizes = [8, 128], strides = [1, 1]} : vector<8x512xf32> to vector<8x128xf32>
    %cst_37 = arith.constant 5.000000e-01 : f32
    %71 = vector.broadcast %cst_37 : f32 to vector<8x128xf32>
    %72 = arith.mulf %71, %70 : vector<8x128xf32>
    %73 = math.tanh %72 : vector<8x128xf32>
    %cst_38 = arith.constant 1.000000e+00 : f32
    %74 = vector.broadcast %cst_38 : f32 to vector<8x128xf32>
    %75 = arith.addf %73, %74 : vector<8x128xf32>
    %cst_39 = arith.constant 5.000000e-01 : f32
    %76 = vector.broadcast %cst_39 : f32 to vector<8x128xf32>
    %77 = arith.mulf %76, %75 : vector<8x128xf32>
    %78 = vector.extract_strided_slice %69 {offsets = [0, 128], sizes = [8, 128], strides = [1, 1]} : vector<8x512xf32> to vector<8x128xf32>
    %cst_40 = arith.constant 5.000000e-01 : f32
    %79 = vector.broadcast %cst_40 : f32 to vector<8x128xf32>
    %80 = arith.mulf %79, %78 : vector<8x128xf32>
    %81 = math.tanh %80 : vector<8x128xf32>
    %cst_41 = arith.constant 1.000000e+00 : f32
    %82 = vector.broadcast %cst_41 : f32 to vector<8x128xf32>
    %83 = arith.addf %81, %82 : vector<8x128xf32>
    %cst_42 = arith.constant 5.000000e-01 : f32
    %84 = vector.broadcast %cst_42 : f32 to vector<8x128xf32>
    %85 = arith.mulf %84, %83 : vector<8x128xf32>
    %86 = vector.extract_strided_slice %69 {offsets = [0, 256], sizes = [8, 128], strides = [1, 1]} : vector<8x512xf32> to vector<8x128xf32>
    %87 = math.tanh %86 : vector<8x128xf32>
    %88 = vector.extract_strided_slice %69 {offsets = [0, 384], sizes = [8, 128], strides = [1, 1]} : vector<8x512xf32> to vector<8x128xf32>
    %cst_43 = arith.constant 5.000000e-01 : f32
    %89 = vector.broadcast %cst_43 : f32 to vector<8x128xf32>
    %90 = arith.mulf %89, %88 : vector<8x128xf32>
    %91 = math.tanh %90 : vector<8x128xf32>
    %cst_44 = arith.constant 1.000000e+00 : f32
    %92 = vector.broadcast %cst_44 : f32 to vector<8x128xf32>
    %93 = arith.addf %91, %92 : vector<8x128xf32>
    %cst_45 = arith.constant 5.000000e-01 : f32
    %94 = vector.broadcast %cst_45 : f32 to vector<8x128xf32>
    %95 = arith.mulf %94, %93 : vector<8x128xf32>
    %96 = arith.mulf %85, %59 : vector<8x128xf32>
    %97 = arith.mulf %77, %87 : vector<8x128xf32>
    %98 = arith.addf %96, %97 : vector<8x128xf32>
    %99 = math.tanh %98 : vector<8x128xf32>
    %100 = arith.mulf %95, %99 : vector<8x128xf32>
    %c8_i32_46 = arith.constant 8 : i32
    %101 = arith.muli %arg0, %c8_i32_46 : i32
    %102 = arith.addi %101, %c1_i32 : i32
    %c12_i32_47 = arith.constant 12 : i32
    %103 = arith.cmpi slt, %102, %c12_i32_47 : i32
    %104 = arith.select %103, %100, %58 : vector<8x128xf32>
    %105 = arith.select %103, %98, %59 : vector<8x128xf32>
    %106 = arith.index_cast %c1_i32 : i32 to index
    %c0_48 = arith.constant 0 : index
    %c0_49 = arith.constant 0 : index
    %107 = vector.load %arg12[%106, %c0_48, %c0_49] : memref<8x8x128xf32, #tpu.memory_space<vmem>>, vector<1x8x128xf32>
    %108 = vector.shape_cast %107 : vector<1x8x128xf32> to vector<8x128xf32>
    %109 = vector.shape_cast %104 : vector<8x128xf32> to vector<1x8x128xf32>
    tpu.vector_store %arg12[%106, %c0_48, %c0_49], %109 {strides = array<i32>} : memref<8x8x128xf32, #tpu.memory_space<vmem>>, vector<1x8x128xf32>,
    %c2_i32 = arith.constant 2 : i32
    %c8_i32_50 = arith.constant 8 : i32
    %110 = arith.muli %c2_i32, %c8_i32_50 : i32
    %111 = tpu.assume_multiple %110, 8 : i32
    %112 = arith.index_cast %111 : i32 to index
    %c0_51 = arith.constant 0 : index
    %113 = vector.load %arg11[%112, %c0_51] : memref<64x512xf32, #tpu.memory_space<vmem>>, vector<8x512xf32>
    %cst_52 = arith.constant dense<0.000000e+00> : vector<8x512xf32>
    %114 = tpu.matmul %104, %13, %cst_52 {dimension_numbers = #tpu.dot_dimension_numbers<[1], [0], [0], [1], [0, 0, 1, 1], [], []>} : vector<8x128xf32>, vector<128x512xf32>, vector<8x512xf32> -> vector<8x512xf32>
    %115 = arith.addf %113, %114 : vector<8x512xf32>
    %116 = vector.extract_strided_slice %115 {offsets = [0, 0], sizes = [8, 128], strides = [1, 1]} : vector<8x512xf32> to vector<8x128xf32>
    %cst_53 = arith.constant 5.000000e-01 : f32
    %117 = vector.broadcast %cst_53 : f32 to vector<8x128xf32>
    %118 = arith.mulf %117, %116 : vector<8x128xf32>
    %119 = math.tanh %118 : vector<8x128xf32>
    %cst_54 = arith.constant 1.000000e+00 : f32
    %120 = vector.broadcast %cst_54 : f32 to vector<8x128xf32>
    %121 = arith.addf %119, %120 : vector<8x128xf32>
    %cst_55 = arith.constant 5.000000e-01 : f32
    %122 = vector.broadcast %cst_55 : f32 to vector<8x128xf32>
    %123 = arith.mulf %122, %121 : vector<8x128xf32>
    %124 = vector.extract_strided_slice %115 {offsets = [0, 128], sizes = [8, 128], strides = [1, 1]} : vector<8x512xf32> to vector<8x128xf32>
    %cst_56 = arith.constant 5.000000e-01 : f32
    %125 = vector.broadcast %cst_56 : f32 to vector<8x128xf32>
    %126 = arith.mulf %125, %124 : vector<8x128xf32>
    %127 = math.tanh %126 : vector<8x128xf32>
    %cst_57 = arith.constant 1.000000e+00 : f32
    %128 = vector.broadcast %cst_57 : f32 to vector<8x128xf32>
    %129 = arith.addf %127, %128 : vector<8x128xf32>
    %cst_58 = arith.constant 5.000000e-01 : f32
    %130 = vector.broadcast %cst_58 : f32 to vector<8x128xf32>
    %131 = arith.mulf %130, %129 : vector<8x128xf32>
    %132 = vector.extract_strided_slice %115 {offsets = [0, 256], sizes = [8, 128], strides = [1, 1]} : vector<8x512xf32> to vector<8x128xf32>
    %133 = math.tanh %132 : vector<8x128xf32>
    %134 = vector.extract_strided_slice %115 {offsets = [0, 384], sizes = [8, 128], strides = [1, 1]} : vector<8x512xf32> to vector<8x128xf32>
    %cst_59 = arith.constant 5.000000e-01 : f32
    %135 = vector.broadcast %cst_59 : f32 to vector<8x128xf32>
    %136 = arith.mulf %135, %134 : vector<8x128xf32>
    %137 = math.tanh %136 : vector<8x128xf32>
    %cst_60 = arith.constant 1.000000e+00 : f32
    %138 = vector.broadcast %cst_60 : f32 to vector<8x128xf32>
    %139 = arith.addf %137, %138 : vector<8x128xf32>
    %cst_61 = arith.constant 5.000000e-01 : f32
    %140 = vector.broadcast %cst_61 : f32 to vector<8x128xf32>
    %141 = arith.mulf %140, %139 : vector<8x128xf32>
    %142 = arith.mulf %131, %105 : vector<8x128xf32>
    %143 = arith.mulf %123, %133 : vector<8x128xf32>
    %144 = arith.addf %142, %143 : vector<8x128xf32>
    %145 = math.tanh %144 : vector<8x128xf32>
    %146 = arith.mulf %141, %145 : vector<8x128xf32>
    %c8_i32_62 = arith.constant 8 : i32
    %147 = arith.muli %arg0, %c8_i32_62 : i32
    %148 = arith.addi %147, %c2_i32 : i32
    %c12_i32_63 = arith.constant 12 : i32
    %149 = arith.cmpi slt, %148, %c12_i32_63 : i32
    %150 = arith.select %149, %146, %104 : vector<8x128xf32>
    %151 = arith.select %149, %144, %105 : vector<8x128xf32>
    %152 = arith.index_cast %c2_i32 : i32 to index
    %c0_64 = arith.constant 0 : index
    %c0_65 = arith.constant 0 : index
    %153 = vector.load %arg12[%152, %c0_64, %c0_65] : memref<8x8x128xf32, #tpu.memory_space<vmem>>, vector<1x8x128xf32>
    %154 = vector.shape_cast %153 : vector<1x8x128xf32> to vector<8x128xf32>
    %155 = vector.shape_cast %150 : vector<8x128xf32> to vector<1x8x128xf32>
    tpu.vector_store %arg12[%152, %c0_64, %c0_65], %155 {strides = array<i32>} : memref<8x8x128xf32, #tpu.memory_space<vmem>>, vector<1x8x128xf32>,
    %c3_i32 = arith.constant 3 : i32
    %c8_i32_66 = arith.constant 8 : i32
    %156 = arith.muli %c3_i32, %c8_i32_66 : i32
    %157 = tpu.assume_multiple %156, 8 : i32
    %158 = arith.index_cast %157 : i32 to index
    %c0_67 = arith.constant 0 : index
    %159 = vector.load %arg11[%158, %c0_67] : memref<64x512xf32, #tpu.memory_space<vmem>>, vector<8x512xf32>
    %cst_68 = arith.constant dense<0.000000e+00> : vector<8x512xf32>
    %160 = tpu.matmul %150, %13, %cst_68 {dimension_numbers = #tpu.dot_dimension_numbers<[1], [0], [0], [1], [0, 0, 1, 1], [], []>} : vector<8x128xf32>, vector<128x512xf32>, vector<8x512xf32> -> vector<8x512xf32>
    %161 = arith.addf %159, %160 : vector<8x512xf32>
    %162 = vector.extract_strided_slice %161 {offsets = [0, 0], sizes = [8, 128], strides = [1, 1]} : vector<8x512xf32> to vector<8x128xf32>
    %cst_69 = arith.constant 5.000000e-01 : f32
    %163 = vector.broadcast %cst_69 : f32 to vector<8x128xf32>
    %164 = arith.mulf %163, %162 : vector<8x128xf32>
    %165 = math.tanh %164 : vector<8x128xf32>
    %cst_70 = arith.constant 1.000000e+00 : f32
    %166 = vector.broadcast %cst_70 : f32 to vector<8x128xf32>
    %167 = arith.addf %165, %166 : vector<8x128xf32>
    %cst_71 = arith.constant 5.000000e-01 : f32
    %168 = vector.broadcast %cst_71 : f32 to vector<8x128xf32>
    %169 = arith.mulf %168, %167 : vector<8x128xf32>
    %170 = vector.extract_strided_slice %161 {offsets = [0, 128], sizes = [8, 128], strides = [1, 1]} : vector<8x512xf32> to vector<8x128xf32>
    %cst_72 = arith.constant 5.000000e-01 : f32
    %171 = vector.broadcast %cst_72 : f32 to vector<8x128xf32>
    %172 = arith.mulf %171, %170 : vector<8x128xf32>
    %173 = math.tanh %172 : vector<8x128xf32>
    %cst_73 = arith.constant 1.000000e+00 : f32
    %174 = vector.broadcast %cst_73 : f32 to vector<8x128xf32>
    %175 = arith.addf %173, %174 : vector<8x128xf32>
    %cst_74 = arith.constant 5.000000e-01 : f32
    %176 = vector.broadcast %cst_74 : f32 to vector<8x128xf32>
    %177 = arith.mulf %176, %175 : vector<8x128xf32>
    %178 = vector.extract_strided_slice %161 {offsets = [0, 256], sizes = [8, 128], strides = [1, 1]} : vector<8x512xf32> to vector<8x128xf32>
    %179 = math.tanh %178 : vector<8x128xf32>
    %180 = vector.extract_strided_slice %161 {offsets = [0, 384], sizes = [8, 128], strides = [1, 1]} : vector<8x512xf32> to vector<8x128xf32>
    %cst_75 = arith.constant 5.000000e-01 : f32
    %181 = vector.broadcast %cst_75 : f32 to vector<8x128xf32>
    %182 = arith.mulf %181, %180 : vector<8x128xf32>
    %183 = math.tanh %182 : vector<8x128xf32>
    %cst_76 = arith.constant 1.000000e+00 : f32
    %184 = vector.broadcast %cst_76 : f32 to vector<8x128xf32>
    %185 = arith.addf %183, %184 : vector<8x128xf32>
    %cst_77 = arith.constant 5.000000e-01 : f32
    %186 = vector.broadcast %cst_77 : f32 to vector<8x128xf32>
    %187 = arith.mulf %186, %185 : vector<8x128xf32>
    %188 = arith.mulf %177, %151 : vector<8x128xf32>
    %189 = arith.mulf %169, %179 : vector<8x128xf32>
    %190 = arith.addf %188, %189 : vector<8x128xf32>
    %191 = math.tanh %190 : vector<8x128xf32>
    %192 = arith.mulf %187, %191 : vector<8x128xf32>
    %c8_i32_78 = arith.constant 8 : i32
    %193 = arith.muli %arg0, %c8_i32_78 : i32
    %194 = arith.addi %193, %c3_i32 : i32
    %c12_i32_79 = arith.constant 12 : i32
    %195 = arith.cmpi slt, %194, %c12_i32_79 : i32
    %196 = arith.select %195, %192, %150 : vector<8x128xf32>
    %197 = arith.select %195, %190, %151 : vector<8x128xf32>
    %198 = arith.index_cast %c3_i32 : i32 to index
    %c0_80 = arith.constant 0 : index
    %c0_81 = arith.constant 0 : index
    %199 = vector.load %arg12[%198, %c0_80, %c0_81] : memref<8x8x128xf32, #tpu.memory_space<vmem>>, vector<1x8x128xf32>
    %200 = vector.shape_cast %199 : vector<1x8x128xf32> to vector<8x128xf32>
    %201 = vector.shape_cast %196 : vector<8x128xf32> to vector<1x8x128xf32>
    tpu.vector_store %arg12[%198, %c0_80, %c0_81], %201 {strides = array<i32>} : memref<8x8x128xf32, #tpu.memory_space<vmem>>, vector<1x8x128xf32>,
    %c4_i32 = arith.constant 4 : i32
    %c8_i32_82 = arith.constant 8 : i32
    %202 = arith.muli %c4_i32, %c8_i32_82 : i32
    %203 = tpu.assume_multiple %202, 8 : i32
    %204 = arith.index_cast %203 : i32 to index
    %c0_83 = arith.constant 0 : index
    %205 = vector.load %arg11[%204, %c0_83] : memref<64x512xf32, #tpu.memory_space<vmem>>, vector<8x512xf32>
    %cst_84 = arith.constant dense<0.000000e+00> : vector<8x512xf32>
    %206 = tpu.matmul %196, %13, %cst_84 {dimension_numbers = #tpu.dot_dimension_numbers<[1], [0], [0], [1], [0, 0, 1, 1], [], []>} : vector<8x128xf32>, vector<128x512xf32>, vector<8x512xf32> -> vector<8x512xf32>
    %207 = arith.addf %205, %206 : vector<8x512xf32>
    %208 = vector.extract_strided_slice %207 {offsets = [0, 0], sizes = [8, 128], strides = [1, 1]} : vector<8x512xf32> to vector<8x128xf32>
    %cst_85 = arith.constant 5.000000e-01 : f32
    %209 = vector.broadcast %cst_85 : f32 to vector<8x128xf32>
    %210 = arith.mulf %209, %208 : vector<8x128xf32>
    %211 = math.tanh %210 : vector<8x128xf32>
    %cst_86 = arith.constant 1.000000e+00 : f32
    %212 = vector.broadcast %cst_86 : f32 to vector<8x128xf32>
    %213 = arith.addf %211, %212 : vector<8x128xf32>
    %cst_87 = arith.constant 5.000000e-01 : f32
    %214 = vector.broadcast %cst_87 : f32 to vector<8x128xf32>
    %215 = arith.mulf %214, %213 : vector<8x128xf32>
    %216 = vector.extract_strided_slice %207 {offsets = [0, 128], sizes = [8, 128], strides = [1, 1]} : vector<8x512xf32> to vector<8x128xf32>
    %cst_88 = arith.constant 5.000000e-01 : f32
    %217 = vector.broadcast %cst_88 : f32 to vector<8x128xf32>
    %218 = arith.mulf %217, %216 : vector<8x128xf32>
    %219 = math.tanh %218 : vector<8x128xf32>
    %cst_89 = arith.constant 1.000000e+00 : f32
    %220 = vector.broadcast %cst_89 : f32 to vector<8x128xf32>
    %221 = arith.addf %219, %220 : vector<8x128xf32>
    %cst_90 = arith.constant 5.000000e-01 : f32
    %222 = vector.broadcast %cst_90 : f32 to vector<8x128xf32>
    %223 = arith.mulf %222, %221 : vector<8x128xf32>
    %224 = vector.extract_strided_slice %207 {offsets = [0, 256], sizes = [8, 128], strides = [1, 1]} : vector<8x512xf32> to vector<8x128xf32>
    %225 = math.tanh %224 : vector<8x128xf32>
    %226 = vector.extract_strided_slice %207 {offsets = [0, 384], sizes = [8, 128], strides = [1, 1]} : vector<8x512xf32> to vector<8x128xf32>
    %cst_91 = arith.constant 5.000000e-01 : f32
    %227 = vector.broadcast %cst_91 : f32 to vector<8x128xf32>
    %228 = arith.mulf %227, %226 : vector<8x128xf32>
    %229 = math.tanh %228 : vector<8x128xf32>
    %cst_92 = arith.constant 1.000000e+00 : f32
    %230 = vector.broadcast %cst_92 : f32 to vector<8x128xf32>
    %231 = arith.addf %229, %230 : vector<8x128xf32>
    %cst_93 = arith.constant 5.000000e-01 : f32
    %232 = vector.broadcast %cst_93 : f32 to vector<8x128xf32>
    %233 = arith.mulf %232, %231 : vector<8x128xf32>
    %234 = arith.mulf %223, %197 : vector<8x128xf32>
    %235 = arith.mulf %215, %225 : vector<8x128xf32>
    %236 = arith.addf %234, %235 : vector<8x128xf32>
    %237 = math.tanh %236 : vector<8x128xf32>
    %238 = arith.mulf %233, %237 : vector<8x128xf32>
    %c8_i32_94 = arith.constant 8 : i32
    %239 = arith.muli %arg0, %c8_i32_94 : i32
    %240 = arith.addi %239, %c4_i32 : i32
    %c12_i32_95 = arith.constant 12 : i32
    %241 = arith.cmpi slt, %240, %c12_i32_95 : i32
    %242 = arith.select %241, %238, %196 : vector<8x128xf32>
    %243 = arith.select %241, %236, %197 : vector<8x128xf32>
    %244 = arith.index_cast %c4_i32 : i32 to index
    %c0_96 = arith.constant 0 : index
    %c0_97 = arith.constant 0 : index
    %245 = vector.load %arg12[%244, %c0_96, %c0_97] : memref<8x8x128xf32, #tpu.memory_space<vmem>>, vector<1x8x128xf32>
    %246 = vector.shape_cast %245 : vector<1x8x128xf32> to vector<8x128xf32>
    %247 = vector.shape_cast %242 : vector<8x128xf32> to vector<1x8x128xf32>
    tpu.vector_store %arg12[%244, %c0_96, %c0_97], %247 {strides = array<i32>} : memref<8x8x128xf32, #tpu.memory_space<vmem>>, vector<1x8x128xf32>,
    %c5_i32 = arith.constant 5 : i32
    %c8_i32_98 = arith.constant 8 : i32
    %248 = arith.muli %c5_i32, %c8_i32_98 : i32
    %249 = tpu.assume_multiple %248, 8 : i32
    %250 = arith.index_cast %249 : i32 to index
    %c0_99 = arith.constant 0 : index
    %251 = vector.load %arg11[%250, %c0_99] : memref<64x512xf32, #tpu.memory_space<vmem>>, vector<8x512xf32>
    %cst_100 = arith.constant dense<0.000000e+00> : vector<8x512xf32>
    %252 = tpu.matmul %242, %13, %cst_100 {dimension_numbers = #tpu.dot_dimension_numbers<[1], [0], [0], [1], [0, 0, 1, 1], [], []>} : vector<8x128xf32>, vector<128x512xf32>, vector<8x512xf32> -> vector<8x512xf32>
    %253 = arith.addf %251, %252 : vector<8x512xf32>
    %254 = vector.extract_strided_slice %253 {offsets = [0, 0], sizes = [8, 128], strides = [1, 1]} : vector<8x512xf32> to vector<8x128xf32>
    %cst_101 = arith.constant 5.000000e-01 : f32
    %255 = vector.broadcast %cst_101 : f32 to vector<8x128xf32>
    %256 = arith.mulf %255, %254 : vector<8x128xf32>
    %257 = math.tanh %256 : vector<8x128xf32>
    %cst_102 = arith.constant 1.000000e+00 : f32
    %258 = vector.broadcast %cst_102 : f32 to vector<8x128xf32>
    %259 = arith.addf %257, %258 : vector<8x128xf32>
    %cst_103 = arith.constant 5.000000e-01 : f32
    %260 = vector.broadcast %cst_103 : f32 to vector<8x128xf32>
    %261 = arith.mulf %260, %259 : vector<8x128xf32>
    %262 = vector.extract_strided_slice %253 {offsets = [0, 128], sizes = [8, 128], strides = [1, 1]} : vector<8x512xf32> to vector<8x128xf32>
    %cst_104 = arith.constant 5.000000e-01 : f32
    %263 = vector.broadcast %cst_104 : f32 to vector<8x128xf32>
    %264 = arith.mulf %263, %262 : vector<8x128xf32>
    %265 = math.tanh %264 : vector<8x128xf32>
    %cst_105 = arith.constant 1.000000e+00 : f32
    %266 = vector.broadcast %cst_105 : f32 to vector<8x128xf32>
    %267 = arith.addf %265, %266 : vector<8x128xf32>
    %cst_106 = arith.constant 5.000000e-01 : f32
    %268 = vector.broadcast %cst_106 : f32 to vector<8x128xf32>
    %269 = arith.mulf %268, %267 : vector<8x128xf32>
    %270 = vector.extract_strided_slice %253 {offsets = [0, 256], sizes = [8, 128], strides = [1, 1]} : vector<8x512xf32> to vector<8x128xf32>
    %271 = math.tanh %270 : vector<8x128xf32>
    %272 = vector.extract_strided_slice %253 {offsets = [0, 384], sizes = [8, 128], strides = [1, 1]} : vector<8x512xf32> to vector<8x128xf32>
    %cst_107 = arith.constant 5.000000e-01 : f32
    %273 = vector.broadcast %cst_107 : f32 to vector<8x128xf32>
    %274 = arith.mulf %273, %272 : vector<8x128xf32>
    %275 = math.tanh %274 : vector<8x128xf32>
    %cst_108 = arith.constant 1.000000e+00 : f32
    %276 = vector.broadcast %cst_108 : f32 to vector<8x128xf32>
    %277 = arith.addf %275, %276 : vector<8x128xf32>
    %cst_109 = arith.constant 5.000000e-01 : f32
    %278 = vector.broadcast %cst_109 : f32 to vector<8x128xf32>
    %279 = arith.mulf %278, %277 : vector<8x128xf32>
    %280 = arith.mulf %269, %243 : vector<8x128xf32>
    %281 = arith.mulf %261, %271 : vector<8x128xf32>
    %282 = arith.addf %280, %281 : vector<8x128xf32>
    %283 = math.tanh %282 : vector<8x128xf32>
    %284 = arith.mulf %279, %283 : vector<8x128xf32>
    %c8_i32_110 = arith.constant 8 : i32
    %285 = arith.muli %arg0, %c8_i32_110 : i32
    %286 = arith.addi %285, %c5_i32 : i32
    %c12_i32_111 = arith.constant 12 : i32
    %287 = arith.cmpi slt, %286, %c12_i32_111 : i32
    %288 = arith.select %287, %284, %242 : vector<8x128xf32>
    %289 = arith.select %287, %282, %243 : vector<8x128xf32>
    %290 = arith.index_cast %c5_i32 : i32 to index
    %c0_112 = arith.constant 0 : index
    %c0_113 = arith.constant 0 : index
    %291 = vector.load %arg12[%290, %c0_112, %c0_113] : memref<8x8x128xf32, #tpu.memory_space<vmem>>, vector<1x8x128xf32>
    %292 = vector.shape_cast %291 : vector<1x8x128xf32> to vector<8x128xf32>
    %293 = vector.shape_cast %288 : vector<8x128xf32> to vector<1x8x128xf32>
    tpu.vector_store %arg12[%290, %c0_112, %c0_113], %293 {strides = array<i32>} : memref<8x8x128xf32, #tpu.memory_space<vmem>>, vector<1x8x128xf32>,
    %c6_i32 = arith.constant 6 : i32
    %c8_i32_114 = arith.constant 8 : i32
    %294 = arith.muli %c6_i32, %c8_i32_114 : i32
    %295 = tpu.assume_multiple %294, 8 : i32
    %296 = arith.index_cast %295 : i32 to index
    %c0_115 = arith.constant 0 : index
    %297 = vector.load %arg11[%296, %c0_115] : memref<64x512xf32, #tpu.memory_space<vmem>>, vector<8x512xf32>
    %cst_116 = arith.constant dense<0.000000e+00> : vector<8x512xf32>
    %298 = tpu.matmul %288, %13, %cst_116 {dimension_numbers = #tpu.dot_dimension_numbers<[1], [0], [0], [1], [0, 0, 1, 1], [], []>} : vector<8x128xf32>, vector<128x512xf32>, vector<8x512xf32> -> vector<8x512xf32>
    %299 = arith.addf %297, %298 : vector<8x512xf32>
    %300 = vector.extract_strided_slice %299 {offsets = [0, 0], sizes = [8, 128], strides = [1, 1]} : vector<8x512xf32> to vector<8x128xf32>
    %cst_117 = arith.constant 5.000000e-01 : f32
    %301 = vector.broadcast %cst_117 : f32 to vector<8x128xf32>
    %302 = arith.mulf %301, %300 : vector<8x128xf32>
    %303 = math.tanh %302 : vector<8x128xf32>
    %cst_118 = arith.constant 1.000000e+00 : f32
    %304 = vector.broadcast %cst_118 : f32 to vector<8x128xf32>
    %305 = arith.addf %303, %304 : vector<8x128xf32>
    %cst_119 = arith.constant 5.000000e-01 : f32
    %306 = vector.broadcast %cst_119 : f32 to vector<8x128xf32>
    %307 = arith.mulf %306, %305 : vector<8x128xf32>
    %308 = vector.extract_strided_slice %299 {offsets = [0, 128], sizes = [8, 128], strides = [1, 1]} : vector<8x512xf32> to vector<8x128xf32>
    %cst_120 = arith.constant 5.000000e-01 : f32
    %309 = vector.broadcast %cst_120 : f32 to vector<8x128xf32>
    %310 = arith.mulf %309, %308 : vector<8x128xf32>
    %311 = math.tanh %310 : vector<8x128xf32>
    %cst_121 = arith.constant 1.000000e+00 : f32
    %312 = vector.broadcast %cst_121 : f32 to vector<8x128xf32>
    %313 = arith.addf %311, %312 : vector<8x128xf32>
    %cst_122 = arith.constant 5.000000e-01 : f32
    %314 = vector.broadcast %cst_122 : f32 to vector<8x128xf32>
    %315 = arith.mulf %314, %313 : vector<8x128xf32>
    %316 = vector.extract_strided_slice %299 {offsets = [0, 256], sizes = [8, 128], strides = [1, 1]} : vector<8x512xf32> to vector<8x128xf32>
    %317 = math.tanh %316 : vector<8x128xf32>
    %318 = vector.extract_strided_slice %299 {offsets = [0, 384], sizes = [8, 128], strides = [1, 1]} : vector<8x512xf32> to vector<8x128xf32>
    %cst_123 = arith.constant 5.000000e-01 : f32
    %319 = vector.broadcast %cst_123 : f32 to vector<8x128xf32>
    %320 = arith.mulf %319, %318 : vector<8x128xf32>
    %321 = math.tanh %320 : vector<8x128xf32>
    %cst_124 = arith.constant 1.000000e+00 : f32
    %322 = vector.broadcast %cst_124 : f32 to vector<8x128xf32>
    %323 = arith.addf %321, %322 : vector<8x128xf32>
    %cst_125 = arith.constant 5.000000e-01 : f32
    %324 = vector.broadcast %cst_125 : f32 to vector<8x128xf32>
    %325 = arith.mulf %324, %323 : vector<8x128xf32>
    %326 = arith.mulf %315, %289 : vector<8x128xf32>
    %327 = arith.mulf %307, %317 : vector<8x128xf32>
    %328 = arith.addf %326, %327 : vector<8x128xf32>
    %329 = math.tanh %328 : vector<8x128xf32>
    %330 = arith.mulf %325, %329 : vector<8x128xf32>
    %c8_i32_126 = arith.constant 8 : i32
    %331 = arith.muli %arg0, %c8_i32_126 : i32
    %332 = arith.addi %331, %c6_i32 : i32
    %c12_i32_127 = arith.constant 12 : i32
    %333 = arith.cmpi slt, %332, %c12_i32_127 : i32
    %334 = arith.select %333, %330, %288 : vector<8x128xf32>
    %335 = arith.select %333, %328, %289 : vector<8x128xf32>
    %336 = arith.index_cast %c6_i32 : i32 to index
    %c0_128 = arith.constant 0 : index
    %c0_129 = arith.constant 0 : index
    %337 = vector.load %arg12[%336, %c0_128, %c0_129] : memref<8x8x128xf32, #tpu.memory_space<vmem>>, vector<1x8x128xf32>
    %338 = vector.shape_cast %337 : vector<1x8x128xf32> to vector<8x128xf32>
    %339 = vector.shape_cast %334 : vector<8x128xf32> to vector<1x8x128xf32>
    tpu.vector_store %arg12[%336, %c0_128, %c0_129], %339 {strides = array<i32>} : memref<8x8x128xf32, #tpu.memory_space<vmem>>, vector<1x8x128xf32>,
    %c7_i32 = arith.constant 7 : i32
    %c8_i32_130 = arith.constant 8 : i32
    %340 = arith.muli %c7_i32, %c8_i32_130 : i32
    %341 = tpu.assume_multiple %340, 8 : i32
    %342 = arith.index_cast %341 : i32 to index
    %c0_131 = arith.constant 0 : index
    %343 = vector.load %arg11[%342, %c0_131] : memref<64x512xf32, #tpu.memory_space<vmem>>, vector<8x512xf32>
    %cst_132 = arith.constant dense<0.000000e+00> : vector<8x512xf32>
    %344 = tpu.matmul %334, %13, %cst_132 {dimension_numbers = #tpu.dot_dimension_numbers<[1], [0], [0], [1], [0, 0, 1, 1], [], []>} : vector<8x128xf32>, vector<128x512xf32>, vector<8x512xf32> -> vector<8x512xf32>
    %345 = arith.addf %343, %344 : vector<8x512xf32>
    %346 = vector.extract_strided_slice %345 {offsets = [0, 0], sizes = [8, 128], strides = [1, 1]} : vector<8x512xf32> to vector<8x128xf32>
    %cst_133 = arith.constant 5.000000e-01 : f32
    %347 = vector.broadcast %cst_133 : f32 to vector<8x128xf32>
    %348 = arith.mulf %347, %346 : vector<8x128xf32>
    %349 = math.tanh %348 : vector<8x128xf32>
    %cst_134 = arith.constant 1.000000e+00 : f32
    %350 = vector.broadcast %cst_134 : f32 to vector<8x128xf32>
    %351 = arith.addf %349, %350 : vector<8x128xf32>
    %cst_135 = arith.constant 5.000000e-01 : f32
    %352 = vector.broadcast %cst_135 : f32 to vector<8x128xf32>
    %353 = arith.mulf %352, %351 : vector<8x128xf32>
    %354 = vector.extract_strided_slice %345 {offsets = [0, 128], sizes = [8, 128], strides = [1, 1]} : vector<8x512xf32> to vector<8x128xf32>
    %cst_136 = arith.constant 5.000000e-01 : f32
    %355 = vector.broadcast %cst_136 : f32 to vector<8x128xf32>
    %356 = arith.mulf %355, %354 : vector<8x128xf32>
    %357 = math.tanh %356 : vector<8x128xf32>
    %cst_137 = arith.constant 1.000000e+00 : f32
    %358 = vector.broadcast %cst_137 : f32 to vector<8x128xf32>
    %359 = arith.addf %357, %358 : vector<8x128xf32>
    %cst_138 = arith.constant 5.000000e-01 : f32
    %360 = vector.broadcast %cst_138 : f32 to vector<8x128xf32>
    %361 = arith.mulf %360, %359 : vector<8x128xf32>
    %362 = vector.extract_strided_slice %345 {offsets = [0, 256], sizes = [8, 128], strides = [1, 1]} : vector<8x512xf32> to vector<8x128xf32>
    %363 = math.tanh %362 : vector<8x128xf32>
    %364 = vector.extract_strided_slice %345 {offsets = [0, 384], sizes = [8, 128], strides = [1, 1]} : vector<8x512xf32> to vector<8x128xf32>
    %cst_139 = arith.constant 5.000000e-01 : f32
    %365 = vector.broadcast %cst_139 : f32 to vector<8x128xf32>
    %366 = arith.mulf %365, %364 : vector<8x128xf32>
    %367 = math.tanh %366 : vector<8x128xf32>
    %cst_140 = arith.constant 1.000000e+00 : f32
    %368 = vector.broadcast %cst_140 : f32 to vector<8x128xf32>
    %369 = arith.addf %367, %368 : vector<8x128xf32>
    %cst_141 = arith.constant 5.000000e-01 : f32
    %370 = vector.broadcast %cst_141 : f32 to vector<8x128xf32>
    %371 = arith.mulf %370, %369 : vector<8x128xf32>
    %372 = arith.mulf %361, %335 : vector<8x128xf32>
    %373 = arith.mulf %353, %363 : vector<8x128xf32>
    %374 = arith.addf %372, %373 : vector<8x128xf32>
    %375 = math.tanh %374 : vector<8x128xf32>
    %376 = arith.mulf %371, %375 : vector<8x128xf32>
    %c8_i32_142 = arith.constant 8 : i32
    %377 = arith.muli %arg0, %c8_i32_142 : i32
    %378 = arith.addi %377, %c7_i32 : i32
    %c12_i32_143 = arith.constant 12 : i32
    %379 = arith.cmpi slt, %378, %c12_i32_143 : i32
    %380 = arith.select %379, %376, %334 : vector<8x128xf32>
    %381 = arith.select %379, %374, %335 : vector<8x128xf32>
    %382 = arith.index_cast %c7_i32 : i32 to index
    %c0_144 = arith.constant 0 : index
    %c0_145 = arith.constant 0 : index
    %383 = vector.load %arg12[%382, %c0_144, %c0_145] : memref<8x8x128xf32, #tpu.memory_space<vmem>>, vector<1x8x128xf32>
    %384 = vector.shape_cast %383 : vector<1x8x128xf32> to vector<8x128xf32>
    %385 = vector.shape_cast %380 : vector<8x128xf32> to vector<1x8x128xf32>
    tpu.vector_store %arg12[%382, %c0_144, %c0_145], %385 {strides = array<i32>} : memref<8x8x128xf32, #tpu.memory_space<vmem>>, vector<1x8x128xf32>,
    %c8_i32_146 = arith.constant 8 : i32
    %c0_147 = arith.constant 0 : index
    %c0_148 = arith.constant 0 : index
    %c0_149 = arith.constant 0 : index
    %386 = vector.load %arg13[%c0_147, %c0_148, %c0_149] : memref<2x8x128xf32, #tpu.memory_space<vmem>>, vector<1x8x128xf32>
    %387 = vector.shape_cast %386 : vector<1x8x128xf32> to vector<8x128xf32>
    %388 = vector.shape_cast %380 : vector<8x128xf32> to vector<1x8x128xf32>
    tpu.vector_store %arg13[%c0_147, %c0_148, %c0_149], %388 {strides = array<i32>} : memref<2x8x128xf32, #tpu.memory_space<vmem>>, vector<1x8x128xf32>,
    %c0_150 = arith.constant 0 : index
    %c0_151 = arith.constant 0 : index
    %c0_152 = arith.constant 0 : index
    %389 = vector.load %arg14[%c0_150, %c0_151, %c0_152] : memref<2x8x128xf32, #tpu.memory_space<vmem>>, vector<1x8x128xf32>
    %390 = vector.shape_cast %389 : vector<1x8x128xf32> to vector<8x128xf32>
    %391 = vector.shape_cast %381 : vector<8x128xf32> to vector<1x8x128xf32>
    tpu.vector_store %arg14[%c0_150, %c0_151, %c0_152], %391 {strides = array<i32>} : memref<2x8x128xf32, #tpu.memory_space<vmem>>, vector<1x8x128xf32>,
    %c0_153 = arith.constant 0 : index
    %c0_154 = arith.constant 0 : index
    %c0_155 = arith.constant 0 : index
    %392 = vector.load %arg9[%c0_153, %c0_154, %c0_155] : memref<2x8x128xf32, #tpu.memory_space<vmem>>, vector<1x8x128xf32>
    %393 = vector.shape_cast %392 : vector<1x8x128xf32> to vector<8x128xf32>
    %394 = vector.shape_cast %380 : vector<8x128xf32> to vector<1x8x128xf32>
    tpu.vector_store %arg9[%c0_153, %c0_154, %c0_155], %394 {strides = array<i32>} : memref<2x8x128xf32, #tpu.memory_space<vmem>>, vector<1x8x128xf32>,
    %c0_156 = arith.constant 0 : index
    %c0_157 = arith.constant 0 : index
    %c0_158 = arith.constant 0 : index
    %395 = vector.load %arg10[%c0_156, %c0_157, %c0_158] : memref<2x8x128xf32, #tpu.memory_space<vmem>>, vector<1x8x128xf32>
    %396 = vector.shape_cast %395 : vector<1x8x128xf32> to vector<8x128xf32>
    %397 = vector.shape_cast %381 : vector<8x128xf32> to vector<1x8x128xf32>
    tpu.vector_store %arg10[%c0_156, %c0_157, %c0_158], %397 {strides = array<i32>} : memref<2x8x128xf32, #tpu.memory_space<vmem>>, vector<1x8x128xf32>,
    %c0_159 = arith.constant 0 : index
    %c0_160 = arith.constant 0 : index
    %c0_161 = arith.constant 0 : index
    %398 = vector.load %arg12[%c0_159, %c0_160, %c0_161] : memref<8x8x128xf32, #tpu.memory_space<vmem>>, vector<8x8x128xf32>
    %399 = vector.shape_cast %398 : vector<8x8x128xf32> to vector<64x128xf32>
    %c0_162 = arith.constant 0 : index
    %c0_163 = arith.constant 0 : index
    %c0_164 = arith.constant 0 : index
    %400 = vector.load %arg3[%c0_162, %c0_163, %c0_164] : memref<1x128x512xf32, #tpu.memory_space<vmem>>, vector<1x128x512xf32>
    %401 = vector.shape_cast %400 : vector<1x128x512xf32> to vector<128x512xf32>
    %cst_165 = arith.constant dense<0.000000e+00> : vector<64x512xf32>
    %402 = tpu.matmul %399, %401, %cst_165 {dimension_numbers = #tpu.dot_dimension_numbers<[1], [0], [0], [1], [0, 0, 1, 1], [], []>} : vector<64x128xf32>, vector<128x512xf32>, vector<64x512xf32> -> vector<64x512xf32>
    %c1 = arith.constant 1 : index
    %c0_166 = arith.constant 0 : index
    %c0_167 = arith.constant 0 : index
    %403 = vector.load %arg5[%c1, %c0_166, %c0_167] : memref<2x1x512xf32, #tpu.memory_space<vmem>>, vector<1x1x512xf32>
    %404 = vector.shape_cast %403 : vector<1x1x512xf32> to vector<1x512xf32>
    %405 = vector.broadcast %404 : vector<1x512xf32> to vector<64x512xf32>
    %406 = arith.addf %402, %405 : vector<64x512xf32>
    %c0_168 = arith.constant 0 : index
    %c0_169 = arith.constant 0 : index
    %407 = vector.load %arg11[%c0_168, %c0_169] : memref<64x512xf32, #tpu.memory_space<vmem>>, vector<64x512xf32>
    tpu.vector_store %arg11[%c0_168, %c0_169], %406 {strides = array<i32>} : memref<64x512xf32, #tpu.memory_space<vmem>>, vector<64x512xf32>,
    %c1_170 = arith.constant 1 : index
    %c0_171 = arith.constant 0 : index
    %c0_172 = arith.constant 0 : index
    %408 = vector.load %arg4[%c1_170, %c0_171, %c0_172] : memref<2x128x512xf32, #tpu.memory_space<vmem>>, vector<1x128x512xf32>
    %409 = vector.shape_cast %408 : vector<1x128x512xf32> to vector<128x512xf32>
    %c1_173 = arith.constant 1 : index
    %c0_174 = arith.constant 0 : index
    %c0_175 = arith.constant 0 : index
    %410 = vector.load %arg13[%c1_173, %c0_174, %c0_175] : memref<2x8x128xf32, #tpu.memory_space<vmem>>, vector<1x8x128xf32>
    %411 = vector.shape_cast %410 : vector<1x8x128xf32> to vector<8x128xf32>
    %c1_176 = arith.constant 1 : index
    %c0_177 = arith.constant 0 : index
    %c0_178 = arith.constant 0 : index
    %412 = vector.load %arg14[%c1_176, %c0_177, %c0_178] : memref<2x8x128xf32, #tpu.memory_space<vmem>>, vector<1x8x128xf32>
    %413 = vector.shape_cast %412 : vector<1x8x128xf32> to vector<8x128xf32>
    %c0_i32_179 = arith.constant 0 : i32
    %c8_i32_180 = arith.constant 8 : i32
    %414 = arith.muli %c0_i32_179, %c8_i32_180 : i32
    %415 = tpu.assume_multiple %414, 8 : i32
    %416 = arith.index_cast %415 : i32 to index
    %c0_181 = arith.constant 0 : index
    %417 = vector.load %arg11[%416, %c0_181] : memref<64x512xf32, #tpu.memory_space<vmem>>, vector<8x512xf32>
    %cst_182 = arith.constant dense<0.000000e+00> : vector<8x512xf32>
    %418 = tpu.matmul %411, %409, %cst_182 {dimension_numbers = #tpu.dot_dimension_numbers<[1], [0], [0], [1], [0, 0, 1, 1], [], []>} : vector<8x128xf32>, vector<128x512xf32>, vector<8x512xf32> -> vector<8x512xf32>
    %419 = arith.addf %417, %418 : vector<8x512xf32>
    %420 = vector.extract_strided_slice %419 {offsets = [0, 0], sizes = [8, 128], strides = [1, 1]} : vector<8x512xf32> to vector<8x128xf32>
    %cst_183 = arith.constant 5.000000e-01 : f32
    %421 = vector.broadcast %cst_183 : f32 to vector<8x128xf32>
    %422 = arith.mulf %421, %420 : vector<8x128xf32>
    %423 = math.tanh %422 : vector<8x128xf32>
    %cst_184 = arith.constant 1.000000e+00 : f32
    %424 = vector.broadcast %cst_184 : f32 to vector<8x128xf32>
    %425 = arith.addf %423, %424 : vector<8x128xf32>
    %cst_185 = arith.constant 5.000000e-01 : f32
    %426 = vector.broadcast %cst_185 : f32 to vector<8x128xf32>
    %427 = arith.mulf %426, %425 : vector<8x128xf32>
    %428 = vector.extract_strided_slice %419 {offsets = [0, 128], sizes = [8, 128], strides = [1, 1]} : vector<8x512xf32> to vector<8x128xf32>
    %cst_186 = arith.constant 5.000000e-01 : f32
    %429 = vector.broadcast %cst_186 : f32 to vector<8x128xf32>
    %430 = arith.mulf %429, %428 : vector<8x128xf32>
    %431 = math.tanh %430 : vector<8x128xf32>
    %cst_187 = arith.constant 1.000000e+00 : f32
    %432 = vector.broadcast %cst_187 : f32 to vector<8x128xf32>
    %433 = arith.addf %431, %432 : vector<8x128xf32>
    %cst_188 = arith.constant 5.000000e-01 : f32
    %434 = vector.broadcast %cst_188 : f32 to vector<8x128xf32>
    %435 = arith.mulf %434, %433 : vector<8x128xf32>
    %436 = vector.extract_strided_slice %419 {offsets = [0, 256], sizes = [8, 128], strides = [1, 1]} : vector<8x512xf32> to vector<8x128xf32>
    %437 = math.tanh %436 : vector<8x128xf32>
    %438 = vector.extract_strided_slice %419 {offsets = [0, 384], sizes = [8, 128], strides = [1, 1]} : vector<8x512xf32> to vector<8x128xf32>
    %cst_189 = arith.constant 5.000000e-01 : f32
    %439 = vector.broadcast %cst_189 : f32 to vector<8x128xf32>
    %440 = arith.mulf %439, %438 : vector<8x128xf32>
    %441 = math.tanh %440 : vector<8x128xf32>
    %cst_190 = arith.constant 1.000000e+00 : f32
    %442 = vector.broadcast %cst_190 : f32 to vector<8x128xf32>
    %443 = arith.addf %441, %442 : vector<8x128xf32>
    %cst_191 = arith.constant 5.000000e-01 : f32
    %444 = vector.broadcast %cst_191 : f32 to vector<8x128xf32>
    %445 = arith.mulf %444, %443 : vector<8x128xf32>
    %446 = arith.mulf %435, %413 : vector<8x128xf32>
    %447 = arith.mulf %427, %437 : vector<8x128xf32>
    %448 = arith.addf %446, %447 : vector<8x128xf32>
    %449 = math.tanh %448 : vector<8x128xf32>
    %450 = arith.mulf %445, %449 : vector<8x128xf32>
    %c8_i32_192 = arith.constant 8 : i32
    %451 = arith.muli %arg0, %c8_i32_192 : i32
    %452 = arith.addi %451, %c0_i32_179 : i32
    %c12_i32_193 = arith.constant 12 : i32
    %453 = arith.cmpi slt, %452, %c12_i32_193 : i32
    %454 = arith.select %453, %450, %411 : vector<8x128xf32>
    %455 = arith.select %453, %448, %413 : vector<8x128xf32>
    %456 = arith.index_cast %c0_i32_179 : i32 to index
    %c0_194 = arith.constant 0 : index
    %c0_195 = arith.constant 0 : index
    %457 = vector.load %arg8[%456, %c0_194, %c0_195] : memref<8x8x128xf32, #tpu.memory_space<vmem>>, vector<1x8x128xf32>
    %458 = vector.shape_cast %457 : vector<1x8x128xf32> to vector<8x128xf32>
    %459 = vector.shape_cast %454 : vector<8x128xf32> to vector<1x8x128xf32>
    tpu.vector_store %arg8[%456, %c0_194, %c0_195], %459 {strides = array<i32>} : memref<8x8x128xf32, #tpu.memory_space<vmem>>, vector<1x8x128xf32>,
    %c1_i32_196 = arith.constant 1 : i32
    %c8_i32_197 = arith.constant 8 : i32
    %460 = arith.muli %c1_i32_196, %c8_i32_197 : i32
    %461 = tpu.assume_multiple %460, 8 : i32
    %462 = arith.index_cast %461 : i32 to index
    %c0_198 = arith.constant 0 : index
    %463 = vector.load %arg11[%462, %c0_198] : memref<64x512xf32, #tpu.memory_space<vmem>>, vector<8x512xf32>
    %cst_199 = arith.constant dense<0.000000e+00> : vector<8x512xf32>
    %464 = tpu.matmul %454, %409, %cst_199 {dimension_numbers = #tpu.dot_dimension_numbers<[1], [0], [0], [1], [0, 0, 1, 1], [], []>} : vector<8x128xf32>, vector<128x512xf32>, vector<8x512xf32> -> vector<8x512xf32>
    %465 = arith.addf %463, %464 : vector<8x512xf32>
    %466 = vector.extract_strided_slice %465 {offsets = [0, 0], sizes = [8, 128], strides = [1, 1]} : vector<8x512xf32> to vector<8x128xf32>
    %cst_200 = arith.constant 5.000000e-01 : f32
    %467 = vector.broadcast %cst_200 : f32 to vector<8x128xf32>
    %468 = arith.mulf %467, %466 : vector<8x128xf32>
    %469 = math.tanh %468 : vector<8x128xf32>
    %cst_201 = arith.constant 1.000000e+00 : f32
    %470 = vector.broadcast %cst_201 : f32 to vector<8x128xf32>
    %471 = arith.addf %469, %470 : vector<8x128xf32>
    %cst_202 = arith.constant 5.000000e-01 : f32
    %472 = vector.broadcast %cst_202 : f32 to vector<8x128xf32>
    %473 = arith.mulf %472, %471 : vector<8x128xf32>
    %474 = vector.extract_strided_slice %465 {offsets = [0, 128], sizes = [8, 128], strides = [1, 1]} : vector<8x512xf32> to vector<8x128xf32>
    %cst_203 = arith.constant 5.000000e-01 : f32
    %475 = vector.broadcast %cst_203 : f32 to vector<8x128xf32>
    %476 = arith.mulf %475, %474 : vector<8x128xf32>
    %477 = math.tanh %476 : vector<8x128xf32>
    %cst_204 = arith.constant 1.000000e+00 : f32
    %478 = vector.broadcast %cst_204 : f32 to vector<8x128xf32>
    %479 = arith.addf %477, %478 : vector<8x128xf32>
    %cst_205 = arith.constant 5.000000e-01 : f32
    %480 = vector.broadcast %cst_205 : f32 to vector<8x128xf32>
    %481 = arith.mulf %480, %479 : vector<8x128xf32>
    %482 = vector.extract_strided_slice %465 {offsets = [0, 256], sizes = [8, 128], strides = [1, 1]} : vector<8x512xf32> to vector<8x128xf32>
    %483 = math.tanh %482 : vector<8x128xf32>
    %484 = vector.extract_strided_slice %465 {offsets = [0, 384], sizes = [8, 128], strides = [1, 1]} : vector<8x512xf32> to vector<8x128xf32>
    %cst_206 = arith.constant 5.000000e-01 : f32
    %485 = vector.broadcast %cst_206 : f32 to vector<8x128xf32>
    %486 = arith.mulf %485, %484 : vector<8x128xf32>
    %487 = math.tanh %486 : vector<8x128xf32>
    %cst_207 = arith.constant 1.000000e+00 : f32
    %488 = vector.broadcast %cst_207 : f32 to vector<8x128xf32>
    %489 = arith.addf %487, %488 : vector<8x128xf32>
    %cst_208 = arith.constant 5.000000e-01 : f32
    %490 = vector.broadcast %cst_208 : f32 to vector<8x128xf32>
    %491 = arith.mulf %490, %489 : vector<8x128xf32>
    %492 = arith.mulf %481, %455 : vector<8x128xf32>
    %493 = arith.mulf %473, %483 : vector<8x128xf32>
    %494 = arith.addf %492, %493 : vector<8x128xf32>
    %495 = math.tanh %494 : vector<8x128xf32>
    %496 = arith.mulf %491, %495 : vector<8x128xf32>
    %c8_i32_209 = arith.constant 8 : i32
    %497 = arith.muli %arg0, %c8_i32_209 : i32
    %498 = arith.addi %497, %c1_i32_196 : i32
    %c12_i32_210 = arith.constant 12 : i32
    %499 = arith.cmpi slt, %498, %c12_i32_210 : i32
    %500 = arith.select %499, %496, %454 : vector<8x128xf32>
    %501 = arith.select %499, %494, %455 : vector<8x128xf32>
    %502 = arith.index_cast %c1_i32_196 : i32 to index
    %c0_211 = arith.constant 0 : index
    %c0_212 = arith.constant 0 : index
    %503 = vector.load %arg8[%502, %c0_211, %c0_212] : memref<8x8x128xf32, #tpu.memory_space<vmem>>, vector<1x8x128xf32>
    %504 = vector.shape_cast %503 : vector<1x8x128xf32> to vector<8x128xf32>
    %505 = vector.shape_cast %500 : vector<8x128xf32> to vector<1x8x128xf32>
    tpu.vector_store %arg8[%502, %c0_211, %c0_212], %505 {strides = array<i32>} : memref<8x8x128xf32, #tpu.memory_space<vmem>>, vector<1x8x128xf32>,
    %c2_i32_213 = arith.constant 2 : i32
    %c8_i32_214 = arith.constant 8 : i32
    %506 = arith.muli %c2_i32_213, %c8_i32_214 : i32
    %507 = tpu.assume_multiple %506, 8 : i32
    %508 = arith.index_cast %507 : i32 to index
    %c0_215 = arith.constant 0 : index
    %509 = vector.load %arg11[%508, %c0_215] : memref<64x512xf32, #tpu.memory_space<vmem>>, vector<8x512xf32>
    %cst_216 = arith.constant dense<0.000000e+00> : vector<8x512xf32>
    %510 = tpu.matmul %500, %409, %cst_216 {dimension_numbers = #tpu.dot_dimension_numbers<[1], [0], [0], [1], [0, 0, 1, 1], [], []>} : vector<8x128xf32>, vector<128x512xf32>, vector<8x512xf32> -> vector<8x512xf32>
    %511 = arith.addf %509, %510 : vector<8x512xf32>
    %512 = vector.extract_strided_slice %511 {offsets = [0, 0], sizes = [8, 128], strides = [1, 1]} : vector<8x512xf32> to vector<8x128xf32>
    %cst_217 = arith.constant 5.000000e-01 : f32
    %513 = vector.broadcast %cst_217 : f32 to vector<8x128xf32>
    %514 = arith.mulf %513, %512 : vector<8x128xf32>
    %515 = math.tanh %514 : vector<8x128xf32>
    %cst_218 = arith.constant 1.000000e+00 : f32
    %516 = vector.broadcast %cst_218 : f32 to vector<8x128xf32>
    %517 = arith.addf %515, %516 : vector<8x128xf32>
    %cst_219 = arith.constant 5.000000e-01 : f32
    %518 = vector.broadcast %cst_219 : f32 to vector<8x128xf32>
    %519 = arith.mulf %518, %517 : vector<8x128xf32>
    %520 = vector.extract_strided_slice %511 {offsets = [0, 128], sizes = [8, 128], strides = [1, 1]} : vector<8x512xf32> to vector<8x128xf32>
    %cst_220 = arith.constant 5.000000e-01 : f32
    %521 = vector.broadcast %cst_220 : f32 to vector<8x128xf32>
    %522 = arith.mulf %521, %520 : vector<8x128xf32>
    %523 = math.tanh %522 : vector<8x128xf32>
    %cst_221 = arith.constant 1.000000e+00 : f32
    %524 = vector.broadcast %cst_221 : f32 to vector<8x128xf32>
    %525 = arith.addf %523, %524 : vector<8x128xf32>
    %cst_222 = arith.constant 5.000000e-01 : f32
    %526 = vector.broadcast %cst_222 : f32 to vector<8x128xf32>
    %527 = arith.mulf %526, %525 : vector<8x128xf32>
    %528 = vector.extract_strided_slice %511 {offsets = [0, 256], sizes = [8, 128], strides = [1, 1]} : vector<8x512xf32> to vector<8x128xf32>
    %529 = math.tanh %528 : vector<8x128xf32>
    %530 = vector.extract_strided_slice %511 {offsets = [0, 384], sizes = [8, 128], strides = [1, 1]} : vector<8x512xf32> to vector<8x128xf32>
    %cst_223 = arith.constant 5.000000e-01 : f32
    %531 = vector.broadcast %cst_223 : f32 to vector<8x128xf32>
    %532 = arith.mulf %531, %530 : vector<8x128xf32>
    %533 = math.tanh %532 : vector<8x128xf32>
    %cst_224 = arith.constant 1.000000e+00 : f32
    %534 = vector.broadcast %cst_224 : f32 to vector<8x128xf32>
    %535 = arith.addf %533, %534 : vector<8x128xf32>
    %cst_225 = arith.constant 5.000000e-01 : f32
    %536 = vector.broadcast %cst_225 : f32 to vector<8x128xf32>
    %537 = arith.mulf %536, %535 : vector<8x128xf32>
    %538 = arith.mulf %527, %501 : vector<8x128xf32>
    %539 = arith.mulf %519, %529 : vector<8x128xf32>
    %540 = arith.addf %538, %539 : vector<8x128xf32>
    %541 = math.tanh %540 : vector<8x128xf32>
    %542 = arith.mulf %537, %541 : vector<8x128xf32>
    %c8_i32_226 = arith.constant 8 : i32
    %543 = arith.muli %arg0, %c8_i32_226 : i32
    %544 = arith.addi %543, %c2_i32_213 : i32
    %c12_i32_227 = arith.constant 12 : i32
    %545 = arith.cmpi slt, %544, %c12_i32_227 : i32
    %546 = arith.select %545, %542, %500 : vector<8x128xf32>
    %547 = arith.select %545, %540, %501 : vector<8x128xf32>
    %548 = arith.index_cast %c2_i32_213 : i32 to index
    %c0_228 = arith.constant 0 : index
    %c0_229 = arith.constant 0 : index
    %549 = vector.load %arg8[%548, %c0_228, %c0_229] : memref<8x8x128xf32, #tpu.memory_space<vmem>>, vector<1x8x128xf32>
    %550 = vector.shape_cast %549 : vector<1x8x128xf32> to vector<8x128xf32>
    %551 = vector.shape_cast %546 : vector<8x128xf32> to vector<1x8x128xf32>
    tpu.vector_store %arg8[%548, %c0_228, %c0_229], %551 {strides = array<i32>} : memref<8x8x128xf32, #tpu.memory_space<vmem>>, vector<1x8x128xf32>,
    %c3_i32_230 = arith.constant 3 : i32
    %c8_i32_231 = arith.constant 8 : i32
    %552 = arith.muli %c3_i32_230, %c8_i32_231 : i32
    %553 = tpu.assume_multiple %552, 8 : i32
    %554 = arith.index_cast %553 : i32 to index
    %c0_232 = arith.constant 0 : index
    %555 = vector.load %arg11[%554, %c0_232] : memref<64x512xf32, #tpu.memory_space<vmem>>, vector<8x512xf32>
    %cst_233 = arith.constant dense<0.000000e+00> : vector<8x512xf32>
    %556 = tpu.matmul %546, %409, %cst_233 {dimension_numbers = #tpu.dot_dimension_numbers<[1], [0], [0], [1], [0, 0, 1, 1], [], []>} : vector<8x128xf32>, vector<128x512xf32>, vector<8x512xf32> -> vector<8x512xf32>
    %557 = arith.addf %555, %556 : vector<8x512xf32>
    %558 = vector.extract_strided_slice %557 {offsets = [0, 0], sizes = [8, 128], strides = [1, 1]} : vector<8x512xf32> to vector<8x128xf32>
    %cst_234 = arith.constant 5.000000e-01 : f32
    %559 = vector.broadcast %cst_234 : f32 to vector<8x128xf32>
    %560 = arith.mulf %559, %558 : vector<8x128xf32>
    %561 = math.tanh %560 : vector<8x128xf32>
    %cst_235 = arith.constant 1.000000e+00 : f32
    %562 = vector.broadcast %cst_235 : f32 to vector<8x128xf32>
    %563 = arith.addf %561, %562 : vector<8x128xf32>
    %cst_236 = arith.constant 5.000000e-01 : f32
    %564 = vector.broadcast %cst_236 : f32 to vector<8x128xf32>
    %565 = arith.mulf %564, %563 : vector<8x128xf32>
    %566 = vector.extract_strided_slice %557 {offsets = [0, 128], sizes = [8, 128], strides = [1, 1]} : vector<8x512xf32> to vector<8x128xf32>
    %cst_237 = arith.constant 5.000000e-01 : f32
    %567 = vector.broadcast %cst_237 : f32 to vector<8x128xf32>
    %568 = arith.mulf %567, %566 : vector<8x128xf32>
    %569 = math.tanh %568 : vector<8x128xf32>
    %cst_238 = arith.constant 1.000000e+00 : f32
    %570 = vector.broadcast %cst_238 : f32 to vector<8x128xf32>
    %571 = arith.addf %569, %570 : vector<8x128xf32>
    %cst_239 = arith.constant 5.000000e-01 : f32
    %572 = vector.broadcast %cst_239 : f32 to vector<8x128xf32>
    %573 = arith.mulf %572, %571 : vector<8x128xf32>
    %574 = vector.extract_strided_slice %557 {offsets = [0, 256], sizes = [8, 128], strides = [1, 1]} : vector<8x512xf32> to vector<8x128xf32>
    %575 = math.tanh %574 : vector<8x128xf32>
    %576 = vector.extract_strided_slice %557 {offsets = [0, 384], sizes = [8, 128], strides = [1, 1]} : vector<8x512xf32> to vector<8x128xf32>
    %cst_240 = arith.constant 5.000000e-01 : f32
    %577 = vector.broadcast %cst_240 : f32 to vector<8x128xf32>
    %578 = arith.mulf %577, %576 : vector<8x128xf32>
    %579 = math.tanh %578 : vector<8x128xf32>
    %cst_241 = arith.constant 1.000000e+00 : f32
    %580 = vector.broadcast %cst_241 : f32 to vector<8x128xf32>
    %581 = arith.addf %579, %580 : vector<8x128xf32>
    %cst_242 = arith.constant 5.000000e-01 : f32
    %582 = vector.broadcast %cst_242 : f32 to vector<8x128xf32>
    %583 = arith.mulf %582, %581 : vector<8x128xf32>
    %584 = arith.mulf %573, %547 : vector<8x128xf32>
    %585 = arith.mulf %565, %575 : vector<8x128xf32>
    %586 = arith.addf %584, %585 : vector<8x128xf32>
    %587 = math.tanh %586 : vector<8x128xf32>
    %588 = arith.mulf %583, %587 : vector<8x128xf32>
    %c8_i32_243 = arith.constant 8 : i32
    %589 = arith.muli %arg0, %c8_i32_243 : i32
    %590 = arith.addi %589, %c3_i32_230 : i32
    %c12_i32_244 = arith.constant 12 : i32
    %591 = arith.cmpi slt, %590, %c12_i32_244 : i32
    %592 = arith.select %591, %588, %546 : vector<8x128xf32>
    %593 = arith.select %591, %586, %547 : vector<8x128xf32>
    %594 = arith.index_cast %c3_i32_230 : i32 to index
    %c0_245 = arith.constant 0 : index
    %c0_246 = arith.constant 0 : index
    %595 = vector.load %arg8[%594, %c0_245, %c0_246] : memref<8x8x128xf32, #tpu.memory_space<vmem>>, vector<1x8x128xf32>
    %596 = vector.shape_cast %595 : vector<1x8x128xf32> to vector<8x128xf32>
    %597 = vector.shape_cast %592 : vector<8x128xf32> to vector<1x8x128xf32>
    tpu.vector_store %arg8[%594, %c0_245, %c0_246], %597 {strides = array<i32>} : memref<8x8x128xf32, #tpu.memory_space<vmem>>, vector<1x8x128xf32>,
    %c4_i32_247 = arith.constant 4 : i32
    %c8_i32_248 = arith.constant 8 : i32
    %598 = arith.muli %c4_i32_247, %c8_i32_248 : i32
    %599 = tpu.assume_multiple %598, 8 : i32
    %600 = arith.index_cast %599 : i32 to index
    %c0_249 = arith.constant 0 : index
    %601 = vector.load %arg11[%600, %c0_249] : memref<64x512xf32, #tpu.memory_space<vmem>>, vector<8x512xf32>
    %cst_250 = arith.constant dense<0.000000e+00> : vector<8x512xf32>
    %602 = tpu.matmul %592, %409, %cst_250 {dimension_numbers = #tpu.dot_dimension_numbers<[1], [0], [0], [1], [0, 0, 1, 1], [], []>} : vector<8x128xf32>, vector<128x512xf32>, vector<8x512xf32> -> vector<8x512xf32>
    %603 = arith.addf %601, %602 : vector<8x512xf32>
    %604 = vector.extract_strided_slice %603 {offsets = [0, 0], sizes = [8, 128], strides = [1, 1]} : vector<8x512xf32> to vector<8x128xf32>
    %cst_251 = arith.constant 5.000000e-01 : f32
    %605 = vector.broadcast %cst_251 : f32 to vector<8x128xf32>
    %606 = arith.mulf %605, %604 : vector<8x128xf32>
    %607 = math.tanh %606 : vector<8x128xf32>
    %cst_252 = arith.constant 1.000000e+00 : f32
    %608 = vector.broadcast %cst_252 : f32 to vector<8x128xf32>
    %609 = arith.addf %607, %608 : vector<8x128xf32>
    %cst_253 = arith.constant 5.000000e-01 : f32
    %610 = vector.broadcast %cst_253 : f32 to vector<8x128xf32>
    %611 = arith.mulf %610, %609 : vector<8x128xf32>
    %612 = vector.extract_strided_slice %603 {offsets = [0, 128], sizes = [8, 128], strides = [1, 1]} : vector<8x512xf32> to vector<8x128xf32>
    %cst_254 = arith.constant 5.000000e-01 : f32
    %613 = vector.broadcast %cst_254 : f32 to vector<8x128xf32>
    %614 = arith.mulf %613, %612 : vector<8x128xf32>
    %615 = math.tanh %614 : vector<8x128xf32>
    %cst_255 = arith.constant 1.000000e+00 : f32
    %616 = vector.broadcast %cst_255 : f32 to vector<8x128xf32>
    %617 = arith.addf %615, %616 : vector<8x128xf32>
    %cst_256 = arith.constant 5.000000e-01 : f32
    %618 = vector.broadcast %cst_256 : f32 to vector<8x128xf32>
    %619 = arith.mulf %618, %617 : vector<8x128xf32>
    %620 = vector.extract_strided_slice %603 {offsets = [0, 256], sizes = [8, 128], strides = [1, 1]} : vector<8x512xf32> to vector<8x128xf32>
    %621 = math.tanh %620 : vector<8x128xf32>
    %622 = vector.extract_strided_slice %603 {offsets = [0, 384], sizes = [8, 128], strides = [1, 1]} : vector<8x512xf32> to vector<8x128xf32>
    %cst_257 = arith.constant 5.000000e-01 : f32
    %623 = vector.broadcast %cst_257 : f32 to vector<8x128xf32>
    %624 = arith.mulf %623, %622 : vector<8x128xf32>
    %625 = math.tanh %624 : vector<8x128xf32>
    %cst_258 = arith.constant 1.000000e+00 : f32
    %626 = vector.broadcast %cst_258 : f32 to vector<8x128xf32>
    %627 = arith.addf %625, %626 : vector<8x128xf32>
    %cst_259 = arith.constant 5.000000e-01 : f32
    %628 = vector.broadcast %cst_259 : f32 to vector<8x128xf32>
    %629 = arith.mulf %628, %627 : vector<8x128xf32>
    %630 = arith.mulf %619, %593 : vector<8x128xf32>
    %631 = arith.mulf %611, %621 : vector<8x128xf32>
    %632 = arith.addf %630, %631 : vector<8x128xf32>
    %633 = math.tanh %632 : vector<8x128xf32>
    %634 = arith.mulf %629, %633 : vector<8x128xf32>
    %c8_i32_260 = arith.constant 8 : i32
    %635 = arith.muli %arg0, %c8_i32_260 : i32
    %636 = arith.addi %635, %c4_i32_247 : i32
    %c12_i32_261 = arith.constant 12 : i32
    %637 = arith.cmpi slt, %636, %c12_i32_261 : i32
    %638 = arith.select %637, %634, %592 : vector<8x128xf32>
    %639 = arith.select %637, %632, %593 : vector<8x128xf32>
    %640 = arith.index_cast %c4_i32_247 : i32 to index
    %c0_262 = arith.constant 0 : index
    %c0_263 = arith.constant 0 : index
    %641 = vector.load %arg8[%640, %c0_262, %c0_263] : memref<8x8x128xf32, #tpu.memory_space<vmem>>, vector<1x8x128xf32>
    %642 = vector.shape_cast %641 : vector<1x8x128xf32> to vector<8x128xf32>
    %643 = vector.shape_cast %638 : vector<8x128xf32> to vector<1x8x128xf32>
    tpu.vector_store %arg8[%640, %c0_262, %c0_263], %643 {strides = array<i32>} : memref<8x8x128xf32, #tpu.memory_space<vmem>>, vector<1x8x128xf32>,
    %c5_i32_264 = arith.constant 5 : i32
    %c8_i32_265 = arith.constant 8 : i32
    %644 = arith.muli %c5_i32_264, %c8_i32_265 : i32
    %645 = tpu.assume_multiple %644, 8 : i32
    %646 = arith.index_cast %645 : i32 to index
    %c0_266 = arith.constant 0 : index
    %647 = vector.load %arg11[%646, %c0_266] : memref<64x512xf32, #tpu.memory_space<vmem>>, vector<8x512xf32>
    %cst_267 = arith.constant dense<0.000000e+00> : vector<8x512xf32>
    %648 = tpu.matmul %638, %409, %cst_267 {dimension_numbers = #tpu.dot_dimension_numbers<[1], [0], [0], [1], [0, 0, 1, 1], [], []>} : vector<8x128xf32>, vector<128x512xf32>, vector<8x512xf32> -> vector<8x512xf32>
    %649 = arith.addf %647, %648 : vector<8x512xf32>
    %650 = vector.extract_strided_slice %649 {offsets = [0, 0], sizes = [8, 128], strides = [1, 1]} : vector<8x512xf32> to vector<8x128xf32>
    %cst_268 = arith.constant 5.000000e-01 : f32
    %651 = vector.broadcast %cst_268 : f32 to vector<8x128xf32>
    %652 = arith.mulf %651, %650 : vector<8x128xf32>
    %653 = math.tanh %652 : vector<8x128xf32>
    %cst_269 = arith.constant 1.000000e+00 : f32
    %654 = vector.broadcast %cst_269 : f32 to vector<8x128xf32>
    %655 = arith.addf %653, %654 : vector<8x128xf32>
    %cst_270 = arith.constant 5.000000e-01 : f32
    %656 = vector.broadcast %cst_270 : f32 to vector<8x128xf32>
    %657 = arith.mulf %656, %655 : vector<8x128xf32>
    %658 = vector.extract_strided_slice %649 {offsets = [0, 128], sizes = [8, 128], strides = [1, 1]} : vector<8x512xf32> to vector<8x128xf32>
    %cst_271 = arith.constant 5.000000e-01 : f32
    %659 = vector.broadcast %cst_271 : f32 to vector<8x128xf32>
    %660 = arith.mulf %659, %658 : vector<8x128xf32>
    %661 = math.tanh %660 : vector<8x128xf32>
    %cst_272 = arith.constant 1.000000e+00 : f32
    %662 = vector.broadcast %cst_272 : f32 to vector<8x128xf32>
    %663 = arith.addf %661, %662 : vector<8x128xf32>
    %cst_273 = arith.constant 5.000000e-01 : f32
    %664 = vector.broadcast %cst_273 : f32 to vector<8x128xf32>
    %665 = arith.mulf %664, %663 : vector<8x128xf32>
    %666 = vector.extract_strided_slice %649 {offsets = [0, 256], sizes = [8, 128], strides = [1, 1]} : vector<8x512xf32> to vector<8x128xf32>
    %667 = math.tanh %666 : vector<8x128xf32>
    %668 = vector.extract_strided_slice %649 {offsets = [0, 384], sizes = [8, 128], strides = [1, 1]} : vector<8x512xf32> to vector<8x128xf32>
    %cst_274 = arith.constant 5.000000e-01 : f32
    %669 = vector.broadcast %cst_274 : f32 to vector<8x128xf32>
    %670 = arith.mulf %669, %668 : vector<8x128xf32>
    %671 = math.tanh %670 : vector<8x128xf32>
    %cst_275 = arith.constant 1.000000e+00 : f32
    %672 = vector.broadcast %cst_275 : f32 to vector<8x128xf32>
    %673 = arith.addf %671, %672 : vector<8x128xf32>
    %cst_276 = arith.constant 5.000000e-01 : f32
    %674 = vector.broadcast %cst_276 : f32 to vector<8x128xf32>
    %675 = arith.mulf %674, %673 : vector<8x128xf32>
    %676 = arith.mulf %665, %639 : vector<8x128xf32>
    %677 = arith.mulf %657, %667 : vector<8x128xf32>
    %678 = arith.addf %676, %677 : vector<8x128xf32>
    %679 = math.tanh %678 : vector<8x128xf32>
    %680 = arith.mulf %675, %679 : vector<8x128xf32>
    %c8_i32_277 = arith.constant 8 : i32
    %681 = arith.muli %arg0, %c8_i32_277 : i32
    %682 = arith.addi %681, %c5_i32_264 : i32
    %c12_i32_278 = arith.constant 12 : i32
    %683 = arith.cmpi slt, %682, %c12_i32_278 : i32
    %684 = arith.select %683, %680, %638 : vector<8x128xf32>
    %685 = arith.select %683, %678, %639 : vector<8x128xf32>
    %686 = arith.index_cast %c5_i32_264 : i32 to index
    %c0_279 = arith.constant 0 : index
    %c0_280 = arith.constant 0 : index
    %687 = vector.load %arg8[%686, %c0_279, %c0_280] : memref<8x8x128xf32, #tpu.memory_space<vmem>>, vector<1x8x128xf32>
    %688 = vector.shape_cast %687 : vector<1x8x128xf32> to vector<8x128xf32>
    %689 = vector.shape_cast %684 : vector<8x128xf32> to vector<1x8x128xf32>
    tpu.vector_store %arg8[%686, %c0_279, %c0_280], %689 {strides = array<i32>} : memref<8x8x128xf32, #tpu.memory_space<vmem>>, vector<1x8x128xf32>,
    %c6_i32_281 = arith.constant 6 : i32
    %c8_i32_282 = arith.constant 8 : i32
    %690 = arith.muli %c6_i32_281, %c8_i32_282 : i32
    %691 = tpu.assume_multiple %690, 8 : i32
    %692 = arith.index_cast %691 : i32 to index
    %c0_283 = arith.constant 0 : index
    %693 = vector.load %arg11[%692, %c0_283] : memref<64x512xf32, #tpu.memory_space<vmem>>, vector<8x512xf32>
    %cst_284 = arith.constant dense<0.000000e+00> : vector<8x512xf32>
    %694 = tpu.matmul %684, %409, %cst_284 {dimension_numbers = #tpu.dot_dimension_numbers<[1], [0], [0], [1], [0, 0, 1, 1], [], []>} : vector<8x128xf32>, vector<128x512xf32>, vector<8x512xf32> -> vector<8x512xf32>
    %695 = arith.addf %693, %694 : vector<8x512xf32>
    %696 = vector.extract_strided_slice %695 {offsets = [0, 0], sizes = [8, 128], strides = [1, 1]} : vector<8x512xf32> to vector<8x128xf32>
    %cst_285 = arith.constant 5.000000e-01 : f32
    %697 = vector.broadcast %cst_285 : f32 to vector<8x128xf32>
    %698 = arith.mulf %697, %696 : vector<8x128xf32>
    %699 = math.tanh %698 : vector<8x128xf32>
    %cst_286 = arith.constant 1.000000e+00 : f32
    %700 = vector.broadcast %cst_286 : f32 to vector<8x128xf32>
    %701 = arith.addf %699, %700 : vector<8x128xf32>
    %cst_287 = arith.constant 5.000000e-01 : f32
    %702 = vector.broadcast %cst_287 : f32 to vector<8x128xf32>
    %703 = arith.mulf %702, %701 : vector<8x128xf32>
    %704 = vector.extract_strided_slice %695 {offsets = [0, 128], sizes = [8, 128], strides = [1, 1]} : vector<8x512xf32> to vector<8x128xf32>
    %cst_288 = arith.constant 5.000000e-01 : f32
    %705 = vector.broadcast %cst_288 : f32 to vector<8x128xf32>
    %706 = arith.mulf %705, %704 : vector<8x128xf32>
    %707 = math.tanh %706 : vector<8x128xf32>
    %cst_289 = arith.constant 1.000000e+00 : f32
    %708 = vector.broadcast %cst_289 : f32 to vector<8x128xf32>
    %709 = arith.addf %707, %708 : vector<8x128xf32>
    %cst_290 = arith.constant 5.000000e-01 : f32
    %710 = vector.broadcast %cst_290 : f32 to vector<8x128xf32>
    %711 = arith.mulf %710, %709 : vector<8x128xf32>
    %712 = vector.extract_strided_slice %695 {offsets = [0, 256], sizes = [8, 128], strides = [1, 1]} : vector<8x512xf32> to vector<8x128xf32>
    %713 = math.tanh %712 : vector<8x128xf32>
    %714 = vector.extract_strided_slice %695 {offsets = [0, 384], sizes = [8, 128], strides = [1, 1]} : vector<8x512xf32> to vector<8x128xf32>
    %cst_291 = arith.constant 5.000000e-01 : f32
    %715 = vector.broadcast %cst_291 : f32 to vector<8x128xf32>
    %716 = arith.mulf %715, %714 : vector<8x128xf32>
    %717 = math.tanh %716 : vector<8x128xf32>
    %cst_292 = arith.constant 1.000000e+00 : f32
    %718 = vector.broadcast %cst_292 : f32 to vector<8x128xf32>
    %719 = arith.addf %717, %718 : vector<8x128xf32>
    %cst_293 = arith.constant 5.000000e-01 : f32
    %720 = vector.broadcast %cst_293 : f32 to vector<8x128xf32>
    %721 = arith.mulf %720, %719 : vector<8x128xf32>
    %722 = arith.mulf %711, %685 : vector<8x128xf32>
    %723 = arith.mulf %703, %713 : vector<8x128xf32>
    %724 = arith.addf %722, %723 : vector<8x128xf32>
    %725 = math.tanh %724 : vector<8x128xf32>
    %726 = arith.mulf %721, %725 : vector<8x128xf32>
    %c8_i32_294 = arith.constant 8 : i32
    %727 = arith.muli %arg0, %c8_i32_294 : i32
    %728 = arith.addi %727, %c6_i32_281 : i32
    %c12_i32_295 = arith.constant 12 : i32
    %729 = arith.cmpi slt, %728, %c12_i32_295 : i32
    %730 = arith.select %729, %726, %684 : vector<8x128xf32>
    %731 = arith.select %729, %724, %685 : vector<8x128xf32>
    %732 = arith.index_cast %c6_i32_281 : i32 to index
    %c0_296 = arith.constant 0 : index
    %c0_297 = arith.constant 0 : index
    %733 = vector.load %arg8[%732, %c0_296, %c0_297] : memref<8x8x128xf32, #tpu.memory_space<vmem>>, vector<1x8x128xf32>
    %734 = vector.shape_cast %733 : vector<1x8x128xf32> to vector<8x128xf32>
    %735 = vector.shape_cast %730 : vector<8x128xf32> to vector<1x8x128xf32>
    tpu.vector_store %arg8[%732, %c0_296, %c0_297], %735 {strides = array<i32>} : memref<8x8x128xf32, #tpu.memory_space<vmem>>, vector<1x8x128xf32>,
    %c7_i32_298 = arith.constant 7 : i32
    %c8_i32_299 = arith.constant 8 : i32
    %736 = arith.muli %c7_i32_298, %c8_i32_299 : i32
    %737 = tpu.assume_multiple %736, 8 : i32
    %738 = arith.index_cast %737 : i32 to index
    %c0_300 = arith.constant 0 : index
    %739 = vector.load %arg11[%738, %c0_300] : memref<64x512xf32, #tpu.memory_space<vmem>>, vector<8x512xf32>
    %cst_301 = arith.constant dense<0.000000e+00> : vector<8x512xf32>
    %740 = tpu.matmul %730, %409, %cst_301 {dimension_numbers = #tpu.dot_dimension_numbers<[1], [0], [0], [1], [0, 0, 1, 1], [], []>} : vector<8x128xf32>, vector<128x512xf32>, vector<8x512xf32> -> vector<8x512xf32>
    %741 = arith.addf %739, %740 : vector<8x512xf32>
    %742 = vector.extract_strided_slice %741 {offsets = [0, 0], sizes = [8, 128], strides = [1, 1]} : vector<8x512xf32> to vector<8x128xf32>
    %cst_302 = arith.constant 5.000000e-01 : f32
    %743 = vector.broadcast %cst_302 : f32 to vector<8x128xf32>
    %744 = arith.mulf %743, %742 : vector<8x128xf32>
    %745 = math.tanh %744 : vector<8x128xf32>
    %cst_303 = arith.constant 1.000000e+00 : f32
    %746 = vector.broadcast %cst_303 : f32 to vector<8x128xf32>
    %747 = arith.addf %745, %746 : vector<8x128xf32>
    %cst_304 = arith.constant 5.000000e-01 : f32
    %748 = vector.broadcast %cst_304 : f32 to vector<8x128xf32>
    %749 = arith.mulf %748, %747 : vector<8x128xf32>
    %750 = vector.extract_strided_slice %741 {offsets = [0, 128], sizes = [8, 128], strides = [1, 1]} : vector<8x512xf32> to vector<8x128xf32>
    %cst_305 = arith.constant 5.000000e-01 : f32
    %751 = vector.broadcast %cst_305 : f32 to vector<8x128xf32>
    %752 = arith.mulf %751, %750 : vector<8x128xf32>
    %753 = math.tanh %752 : vector<8x128xf32>
    %cst_306 = arith.constant 1.000000e+00 : f32
    %754 = vector.broadcast %cst_306 : f32 to vector<8x128xf32>
    %755 = arith.addf %753, %754 : vector<8x128xf32>
    %cst_307 = arith.constant 5.000000e-01 : f32
    %756 = vector.broadcast %cst_307 : f32 to vector<8x128xf32>
    %757 = arith.mulf %756, %755 : vector<8x128xf32>
    %758 = vector.extract_strided_slice %741 {offsets = [0, 256], sizes = [8, 128], strides = [1, 1]} : vector<8x512xf32> to vector<8x128xf32>
    %759 = math.tanh %758 : vector<8x128xf32>
    %760 = vector.extract_strided_slice %741 {offsets = [0, 384], sizes = [8, 128], strides = [1, 1]} : vector<8x512xf32> to vector<8x128xf32>
    %cst_308 = arith.constant 5.000000e-01 : f32
    %761 = vector.broadcast %cst_308 : f32 to vector<8x128xf32>
    %762 = arith.mulf %761, %760 : vector<8x128xf32>
    %763 = math.tanh %762 : vector<8x128xf32>
    %cst_309 = arith.constant 1.000000e+00 : f32
    %764 = vector.broadcast %cst_309 : f32 to vector<8x128xf32>
    %765 = arith.addf %763, %764 : vector<8x128xf32>
    %cst_310 = arith.constant 5.000000e-01 : f32
    %766 = vector.broadcast %cst_310 : f32 to vector<8x128xf32>
    %767 = arith.mulf %766, %765 : vector<8x128xf32>
    %768 = arith.mulf %757, %731 : vector<8x128xf32>
    %769 = arith.mulf %749, %759 : vector<8x128xf32>
    %770 = arith.addf %768, %769 : vector<8x128xf32>
    %771 = math.tanh %770 : vector<8x128xf32>
    %772 = arith.mulf %767, %771 : vector<8x128xf32>
    %c8_i32_311 = arith.constant 8 : i32
    %773 = arith.muli %arg0, %c8_i32_311 : i32
    %774 = arith.addi %773, %c7_i32_298 : i32
    %c12_i32_312 = arith.constant 12 : i32
    %775 = arith.cmpi slt, %774, %c12_i32_312 : i32
    %776 = arith.select %775, %772, %730 : vector<8x128xf32>
    %777 = arith.select %775, %770, %731 : vector<8x128xf32>
    %778 = arith.index_cast %c7_i32_298 : i32 to index
    %c0_313 = arith.constant 0 : index
    %c0_314 = arith.constant 0 : index
    %779 = vector.load %arg8[%778, %c0_313, %c0_314] : memref<8x8x128xf32, #tpu.memory_space<vmem>>, vector<1x8x128xf32>
    %780 = vector.shape_cast %779 : vector<1x8x128xf32> to vector<8x128xf32>
    %781 = vector.shape_cast %776 : vector<8x128xf32> to vector<1x8x128xf32>
    tpu.vector_store %arg8[%778, %c0_313, %c0_314], %781 {strides = array<i32>} : memref<8x8x128xf32, #tpu.memory_space<vmem>>, vector<1x8x128xf32>,
    %c8_i32_315 = arith.constant 8 : i32
    %c1_316 = arith.constant 1 : index
    %c0_317 = arith.constant 0 : index
    %c0_318 = arith.constant 0 : index
    %782 = vector.load %arg13[%c1_316, %c0_317, %c0_318] : memref<2x8x128xf32, #tpu.memory_space<vmem>>, vector<1x8x128xf32>
    %783 = vector.shape_cast %782 : vector<1x8x128xf32> to vector<8x128xf32>
    %784 = vector.shape_cast %776 : vector<8x128xf32> to vector<1x8x128xf32>
    tpu.vector_store %arg13[%c1_316, %c0_317, %c0_318], %784 {strides = array<i32>} : memref<2x8x128xf32, #tpu.memory_space<vmem>>, vector<1x8x128xf32>,
    %c1_319 = arith.constant 1 : index
    %c0_320 = arith.constant 0 : index
    %c0_321 = arith.constant 0 : index
    %785 = vector.load %arg14[%c1_319, %c0_320, %c0_321] : memref<2x8x128xf32, #tpu.memory_space<vmem>>, vector<1x8x128xf32>
    %786 = vector.shape_cast %785 : vector<1x8x128xf32> to vector<8x128xf32>
    %787 = vector.shape_cast %777 : vector<8x128xf32> to vector<1x8x128xf32>
    tpu.vector_store %arg14[%c1_319, %c0_320, %c0_321], %787 {strides = array<i32>} : memref<2x8x128xf32, #tpu.memory_space<vmem>>, vector<1x8x128xf32>,
    %c1_322 = arith.constant 1 : index
    %c0_323 = arith.constant 0 : index
    %c0_324 = arith.constant 0 : index
    %788 = vector.load %arg9[%c1_322, %c0_323, %c0_324] : memref<2x8x128xf32, #tpu.memory_space<vmem>>, vector<1x8x128xf32>
    %789 = vector.shape_cast %788 : vector<1x8x128xf32> to vector<8x128xf32>
    %790 = vector.shape_cast %776 : vector<8x128xf32> to vector<1x8x128xf32>
    tpu.vector_store %arg9[%c1_322, %c0_323, %c0_324], %790 {strides = array<i32>} : memref<2x8x128xf32, #tpu.memory_space<vmem>>, vector<1x8x128xf32>,
    %c1_325 = arith.constant 1 : index
    %c0_326 = arith.constant 0 : index
    %c0_327 = arith.constant 0 : index
    %791 = vector.load %arg10[%c1_325, %c0_326, %c0_327] : memref<2x8x128xf32, #tpu.memory_space<vmem>>, vector<1x8x128xf32>
    %792 = vector.shape_cast %791 : vector<1x8x128xf32> to vector<8x128xf32>
    %793 = vector.shape_cast %777 : vector<8x128xf32> to vector<1x8x128xf32>
    tpu.vector_store %arg10[%c1_325, %c0_326, %c0_327], %793 {strides = array<i32>} : memref<2x8x128xf32, #tpu.memory_space<vmem>>, vector<1x8x128xf32>,
    return
  }
  func.func @transform_0(%arg0: i32) -> (i32, i32, i32) {
    %c0_i32 = arith.constant 0 : i32
    %c0_i32_0 = arith.constant 0 : i32
    %c0_i32_1 = arith.constant 0 : i32
    return %arg0, %c0_i32, %c0_i32_0 : i32, i32, i32
  }
  func.func @transform_1(%arg0: i32) -> (i32, i32) {
    %c0_i32 = arith.constant 0 : i32
    %c0_i32_0 = arith.constant 0 : i32
    %c0_i32_1 = arith.constant 0 : i32
    return %c0_i32, %c0_i32_0 : i32, i32
  }
  func.func @transform_2(%arg0: i32) -> (i32, i32, i32) {
    %c0_i32 = arith.constant 0 : i32
    %c0_i32_0 = arith.constant 0 : i32
    %c0_i32_1 = arith.constant 0 : i32
    %c0_i32_2 = arith.constant 0 : i32
    return %c0_i32, %c0_i32_0, %c0_i32_1 : i32, i32, i32
  }
  func.func @transform_3(%arg0: i32) -> (i32, i32, i32) {
    %c0_i32 = arith.constant 0 : i32
    %c0_i32_0 = arith.constant 0 : i32
    %c0_i32_1 = arith.constant 0 : i32
    %c0_i32_2 = arith.constant 0 : i32
    return %c0_i32, %c0_i32_0, %c0_i32_1 : i32, i32, i32
  }
  func.func @transform_4(%arg0: i32) -> (i32, i32, i32) {
    %c0_i32 = arith.constant 0 : i32
    %c0_i32_0 = arith.constant 0 : i32
    %c0_i32_1 = arith.constant 0 : i32
    %c0_i32_2 = arith.constant 0 : i32
    return %c0_i32, %c0_i32_0, %c0_i32_1 : i32, i32, i32
  }
  func.func @transform_5(%arg0: i32) -> (i32, i32, i32) {
    %c0_i32 = arith.constant 0 : i32
    %c0_i32_0 = arith.constant 0 : i32
    %c0_i32_1 = arith.constant 0 : i32
    %c0_i32_2 = arith.constant 0 : i32
    return %c0_i32, %c0_i32_0, %c0_i32_1 : i32, i32, i32
  }
  func.func @transform_6(%arg0: i32) -> (i32, i32, i32) {
    %c0_i32 = arith.constant 0 : i32
    %c0_i32_0 = arith.constant 0 : i32
    %c0_i32_1 = arith.constant 0 : i32
    %c0_i32_2 = arith.constant 0 : i32
    return %c0_i32, %c0_i32_0, %c0_i32_1 : i32, i32, i32
  }
  func.func @transform_7(%arg0: i32) -> (i32, i32, i32) {
    %c0_i32 = arith.constant 0 : i32
    %c0_i32_0 = arith.constant 0 : i32
    %c0_i32_1 = arith.constant 0 : i32
    return %arg0, %c0_i32, %c0_i32_0 : i32, i32, i32
  }
  func.func @transform_8(%arg0: i32) -> (i32, i32, i32) {
    %c0_i32 = arith.constant 0 : i32
    %c0_i32_0 = arith.constant 0 : i32
    %c0_i32_1 = arith.constant 0 : i32
    %c0_i32_2 = arith.constant 0 : i32
    return %c0_i32, %c0_i32_0, %c0_i32_1 : i32, i32, i32
  }
  func.func @transform_9(%arg0: i32) -> (i32, i32, i32) {
    %c0_i32 = arith.constant 0 : i32
    %c0_i32_0 = arith.constant 0 : i32
    %c0_i32_1 = arith.constant 0 : i32
    %c0_i32_2 = arith.constant 0 : i32
    return %c0_i32, %c0_i32_0, %c0_i32_1 : i32, i32, i32
  }
}

</mosaic_0001>

<bundles_post_ra>
// kernel: tpu_custom_call.1
= control target key start
LH: loop header
LB: loop body
LE: loop exit
PB: predicated region body
PF: predicated region fallthrough
CT: control target
= control target key end

     0   :  { %s7693_s0 = inlined_call_operand.hbm [shape: f32[16,8,32], index: 0, kind: input, shape index: {}]   ;;  %s7694_s1 = inlined_call_operand.hbm [shape: f32[32,512], index: 1, kind: input, shape index: {}]   ;;  %s7695_s2 = inlined_call_operand.hbm [shape: f32[1,128,512], index: 2, kind: input, shape index: {}]   ;;  %s7696_s3 = inlined_call_operand.hbm [shape: f32[2,128,512], index: 3, kind: input, shape index: {}]   ;;  %s7697_s4 = inlined_call_operand.hbm [shape: f32[2,1,512], index: 4, kind: input, shape index: {}]   ;;  %s7698_s5 = inlined_call_operand.vmem [shape: f32[2,8,128], index: 5, kind: input, shape index: {}]   ;;  %s7699_s6 = inlined_call_operand.hbm [shape: f32[2,8,128], index: 6, kind: input, shape index: {}]   ;;  %s7700_s7 = inlined_call_operand.hbm [shape: f32[16,8,128], index: 7, kind: output, shape index: {0}]   ;;  %s7701_s8 = inlined_call_operand.hbm [shape: f32[2,8,128], index: 8, kind: output, shape index: {1}]   ;;  %s7702_s9 = inlined_call_operand.hbm [shape: f32[2,8,128], index: 9, kind: output, shape index: {2}]  }
   0x1   :  { %7714 = sst [smem:[#allocation27_spill]] %s7693_s0 }
   0x2   :  { %7715 = sst [smem:[#allocation28_spill]] %s7702_s9 }
   0x3   :  { %15 = vsyncpa [#allocation7], 0 }
   0x4   :  { %17 = vsyncpa [#allocation7 + $0x1], 0 }
   0x5   :  { %18 = vsyncpa [#allocation10], 0 }
   0x6   :  { %19 = vsyncpa [#allocation13], 0 }
   0x7   :  { %20 = vsyncpa [#allocation16], 0 }
   0x8   :  { %21 = vsyncpa [#allocation8], 0 }
   0x9   :  { %23 = vsyncpa [#allocation8 + $0x1], 0 }
   0xa   :  { %24 = vsyncpa [#allocation19], 0  ;;  %s6205_s30 = smov 0   ;;  %s6207_s10 = smov 0  }
   0xb   :  { %s6209_s11 = smov 0   ;;  %s6211_s12 = smov 0  }
   0xc LB: > { %s6137_s13 = smov [#allocation9]   ;;  %s6226_s15 = sadd.s32 4294967295, %s6135_s12   ;;  %s6135_s12 = sphi %s6211_s12, %s7755_s12   ;;  %s6131_s11 = sphi %s6209_s11, %s7754_s11   ;;  %s6127_s10 = sphi %s6207_s10, %s7753_s10   ;;  %s6123_s30 = sphi %s6205_s30, %s7752_s30  }
   0xd   : > { %s267_s14 = sshll.u32 %s6137_s13, 4  ;;  %p4265_p0 = scmp.ge.s32.totalorder %s6135_s12, 1  ;;  %s6232_s14 = int_to_ptr.vmem [resolvable:$true] %s267_s14 }
   0xe   : > { %p7704_p1 = scmp.eq.s32.totalorder %s6226_s15, 0  ;;  %p255_p2 = scmp.lt.s32.totalorder %s6135_s12, 3 }
   0xf   : > { %s6138_s17 = smov [#allocation12]   ;;  %s6139_s20 = smov [#allocation11]  }
  0x10   : > { %p6234_p4 = pnand %p4265_p0, %p255_p2  ;;  %s293_s18 = sshll.u32 %s6138_s17, 4  ;;  %s6247_s18 = int_to_ptr.vmem [resolvable:$true] %s293_s18 }
  0x11   : > { %s280_s21 = sshll.u32 %s6139_s20, 4  ;;  %s5831_s24 = scalar_lea.hbm %s7694_s1, 2048  ;;  %s6249_s21 = int_to_ptr.vmem [resolvable:$true] %s280_s21 }
  0x12   : > { %s7716_s16 = scalar_select %p6234_p4, 1, 0 }
  0x13   : > { %p5583_p6 = pneg %p6234_p4  ;;  %p5832_p8 = scmp.ne.s32.totalorder %s7694_s1, %s5831_s24 }
  0x14   : > { %p5838_p12 = scmp.lt.u32.totalorder %s5831_s24, %s7694_s1 }
  0x15   : > { %p6243_p7 = pnand %p5583_p6, %p7704_p1 }
  0x17   : > { %p6259_p9 = pneg %p6243_p7 }
  0x19   : > { %p5834_p10 = pnand %p6259_p9, %p5832_p8 }
  0x1b   : > { %p5835_p11 = pneg %p5834_p10 }
  0x1d   : > { %p5840_p13 = pnand %p5838_p12, %p5835_p11 }
  0x1f   : > { %5843 = shalt.err (!%p5840_p13)
}
  0x20   : > { %s5844_s13 = scalar_lea.vmem %s6232_s14, 2048  ;;  %p5852_p5 = scmp.lt.s32.totalorder %s6232_s14, %s6232_s14 }
  0x21   : > { %p5845_p0 = scmp.ne.s32.totalorder %s6232_s14, %s5844_s13  ;;  %p5853_p3 = scmp.lt.s32.totalorder %s5844_s13, %s5844_s13 }
  0x23   : > { %p5847_p2 = pnand %p5845_p0, %p6259_p9  ;;  %p5854_p8 = por %p5853_p3, %p5852_p5 }
  0x25   : > { %p5848_p6 = pneg %p5847_p2 }
  0x27   : > { %p5855_p10 = pnand %p5854_p8, %p5848_p6 }
  0x29   : > { %5858 = shalt.err (!%p5855_p10)
}
  0x2a   : > { %s6140_s17 = smov 512   ;;  %s6141_s20 = smov 32  }
  0x2b   : > { %5586 = dma.hbm_to_vmem [thread:$0]  (!%p6243_p7), %s7694_s1, 2048, %s6232_s14, [#allocation10], %s6140_s17, %s6140_s17, %s6141_s20  }
  0x2c   : > { %s5859_s26 = scalar_lea.hbm %s7696_s3, 16384 }
  0x2d   : > { %p5860_p3 = scmp.ne.s32.totalorder %s7696_s3, %s5859_s26  ;;  %p5866_p12 = scmp.lt.u32.totalorder %s5859_s26, %s7696_s3 }
  0x2f   : > { %p5862_p5 = pnand %p5860_p3, %p6259_p9 }
  0x31   : > { %p5863_p11 = pneg %p5862_p5 }
  0x33   : > { %p5868_p13 = pnand %p5866_p12, %p5863_p11 }
  0x35   : > { %5871 = shalt.err (!%p5868_p13)
}
  0x36   : > { %s5872_s14 = scalar_lea.vmem %s6247_s18, 16384  ;;  %p5880_p8 = scmp.lt.s32.totalorder %s6247_s18, %s6247_s18 }
  0x37   : > { %p5873_p0 = scmp.ne.s32.totalorder %s6247_s18, %s5872_s14  ;;  %p5881_p10 = scmp.lt.s32.totalorder %s5872_s14, %s5872_s14 }
  0x39   : > { %p5875_p2 = pnand %p5873_p0, %p6259_p9  ;;  %p5882_p3 = por %p5881_p10, %p5880_p8 }
  0x3b   : > { %p5876_p6 = pneg %p5875_p2 }
  0x3d   : > { %p5883_p5 = pnand %p5882_p3, %p5876_p6 }
  0x3f   : > { %5886 = shalt.err (!%p5883_p5)
}
  0x40   : > { %5592 = dma.hbm_to_vmem [thread:$0]  (!%p6243_p7), %s7696_s3, 16384, %s6247_s18, [#allocation13], %s6140_s17, %s6140_s17, %s6141_s20  }
  0x41   : > { %s5887_s25 = scalar_lea.hbm %s7695_s2, 8192 }
  0x42   : > { %p5888_p11 = scmp.ne.s32.totalorder %s7695_s2, %s5887_s25  ;;  %p5894_p0 = scmp.lt.u32.totalorder %s5887_s25, %s7695_s2 }
  0x44   : > { %p5890_p12 = pnand %p5888_p11, %p6259_p9 }
  0x46   : > { %p5891_p13 = pneg %p5890_p12 }
  0x48   : > { %p5896_p2 = pnand %p5894_p0, %p5891_p13 }
  0x4a   : > { %5899 = shalt.err (!%p5896_p2)
}
  0x4b   : > { %s5900_s18 = scalar_lea.vmem %s6249_s21, 8192  ;;  %p5908_p3 = scmp.lt.s32.totalorder %s6249_s21, %s6249_s21 }
  0x4c   : > { %p5901_p6 = scmp.ne.s32.totalorder %s6249_s21, %s5900_s18  ;;  %p5909_p5 = scmp.lt.s32.totalorder %s5900_s18, %s5900_s18 }
  0x4e   : > { %p5903_p8 = pnand %p5901_p6, %p6259_p9  ;;  %p5910_p11 = por %p5909_p5, %p5908_p3 }
  0x50   : > { %p5904_p10 = pneg %p5903_p8 }
  0x52   : > { %p5911_p12 = pnand %p5910_p11, %p5904_p10 }
  0x54   : > { %5914 = shalt.err (!%p5911_p12)
}
  0x55   : > { %5589 = dma.hbm_to_vmem [thread:$0]  (!%p6243_p7), %s7695_s2, 8192, %s6249_s21, [#allocation10], %s6140_s17, %s6140_s17, %s6141_s20  }
  0x56   : > { %s6142_s22 = smov [#allocation14]   ;;  %s5915_s26 = scalar_lea.hbm %s7697_s4, 128 }
  0x57   : > { %s306_s23 = sshll.u32 %s6142_s22, 4  ;;  %p5916_p13 = scmp.ne.s32.totalorder %s7697_s4, %s5915_s26  ;;  %s307_s23 = int_to_ptr.vmem [resolvable:$true] %s306_s23 }
  0x58   : > { %p5922_p6 = scmp.lt.u32.totalorder %s5915_s26, %s7697_s4 }
  0x59   : > { %p5918_p0 = pnand %p5916_p13, %p6259_p9 }
  0x5b   : > { %p5919_p2 = pneg %p5918_p0 }
  0x5d   : > { %p5924_p8 = pnand %p5922_p6, %p5919_p2 }
  0x5f   : > { %5927 = shalt.err (!%p5924_p8)
}
  0x60   : > { %s5928_s21 = scalar_lea.vmem %s307_s23, 128  ;;  %p5936_p11 = scmp.lt.s32.totalorder %s307_s23, %s307_s23 }
  0x61   : > { %p5929_p10 = scmp.ne.s32.totalorder %s307_s23, %s5928_s21  ;;  %p5937_p12 = scmp.lt.s32.totalorder %s5928_s21, %s5928_s21 }
  0x63   : > { %p5931_p3 = pnand %p5929_p10, %p6259_p9  ;;  %p5938_p1 = por %p5937_p12, %p5936_p11 }
  0x65   : > { %p5932_p5 = pneg %p5931_p3 }
  0x67   : > { %p5939_p4 = pnand %p5938_p1, %p5932_p5 }
  0x69   : > { %5942 = shalt.err (!%p5939_p4)
}
  0x6a   : > { %s6143_s17 = smov 64   ;;  %s6144_s20 = smov 4  }
  0x6b   : > { %5595 = dma.hbm_to_vmem [thread:$0]  (!%p6243_p7), %s7697_s4, 128, %s307_s23, [#allocation13], %s6143_s17, %s6143_s17, %s6144_s20  }
  0x6c   : > { %s6145_s22 = smov [#allocation15]   ;;  %s5943_s28 = scalar_lea.hbm %s7699_s6, 256 }
  0x6d   : > { %s322_s24 = sshll.u32 %s6145_s22, 4  ;;  %p5944_p1 = scmp.ne.s32.totalorder %s7699_s6, %s5943_s28  ;;  %s323_s24 = int_to_ptr.vmem [resolvable:$true] %s322_s24 }
  0x6e   : > { %p5950_p0 = scmp.lt.u32.totalorder %s5943_s28, %s7699_s6 }
  0x6f   : > { %p5946_p4 = pnand %p5944_p1, %p6259_p9 }
  0x71   : > { %p5947_p13 = pneg %p5946_p4 }
  0x73   : > { %p5952_p2 = pnand %p5950_p0, %p5947_p13 }
  0x75   : > { %5955 = shalt.err (!%p5952_p2)
}
  0x76   : > { %s5956_s23 = scalar_lea.vmem %s323_s24, 256  ;;  %p5964_p3 = scmp.lt.s32.totalorder %s323_s24, %s323_s24 }
  0x77   : > { %p5957_p6 = scmp.ne.s32.totalorder %s323_s24, %s5956_s23  ;;  %p5965_p5 = scmp.lt.s32.totalorder %s5956_s23, %s5956_s23 }
  0x79   : > { %p5959_p8 = pnand %p5957_p6, %p6259_p9  ;;  %p5966_p11 = por %p5965_p5, %p5964_p3 }
  0x7b   : > { %p5960_p10 = pneg %p5959_p8 }
  0x7d   : > { %p5967_p12 = pnand %p5966_p11, %p5960_p10 }
  0x7f   : > { %5970 = shalt.err (!%p5967_p12)
}
  0x80   : > { %s7706_s17 = smov 128   ;;  %s7707_s27 = smov 8  }
  0x81   : > { %5598 = dma.hbm_to_vmem [thread:$0]  (!%p6243_p7), %s7699_s6, 256, %s323_s24, [#allocation16], %s7706_s17, %s7706_s17, %s7707_s27  }
  0x82   : > { %s4264_s9 = sadd.s32 4294967294, %s6135_s12   ;;  %s6376_s22 = sadd.s32 1, %s6135_s12  }
  0x83   : > { %s37_s25 = sadd.s32 1, %s6131_s11  ;;  %s34_s26 = ssub.s32 %s6135_s12, %s6376_s22 }
  0x84   : > { %p44_p9 = scmp.ne.s32.totalorder %s6131_s11, %s6127_s10  ;;  %p35_p1 = scmp.eq.s32.totalorder %s34_s26, 0 }
  0x85   : > { %p45_p4 = scmp.eq.s32.totalorder %s6135_s12, 0  ;;  %p50_p13 = scmp.ne.s32.totalorder %s6127_s10, %s6123_s30 }
  0x86   : > { %p7708_p0 = scmp.eq.s32.totalorder %s6226_s15, 1  ;;  %p7719_p6 = scmp.eq.s32.totalorder %s6226_s15, 0 }
  0x87   : > { %s6388_s19 = scalar_select %p35_p1, %s6131_s11, %s37_s25  }
  0x88   : > { %p46_p2 = por %p45_p4, %p44_p9  ;;  %p6392_p8 = por %p7719_p6, %p50_p13 }
  0x89   : > { %p6398_p7 = por %p7708_p0, %p44_p9  ;;  %p206_p10 = scmp.eq.s32.totalorder %s4264_s9, 1 }
  0x8a   : > { %p5612_p3 = scmp.lt.s32.totalorder %s6135_s12, 2  ;;  %s336_s29 = sand.u32 1, %s6131_s11  }
  0x8b   : > { %s7721_s24 = scalar_select %p6398_p7, 1, 0 }
  0x8c   : > { %p6404_p5 = por %p206_p10, %p50_p13  ;;  %s4272_s18 = sshll.u32 %s336_s29, 6 }
  0x8d   : > { %s4317_s21 = sshll.u32 %s6135_s12, 10  ;;  %s7723_s0 = sld [smem:[#allocation27_spill]] }
  0x8e   : > { %s7722_s13 = scalar_select %p6404_p5, 1, 0 }
  0x8f   : > { %s340_s25 = scalar_lea.vmem [#allocation6], %s4272_s18  ;;  %p6414_p11 = pnand %p5612_p3, %p46_p2 }
  0x90   : > { %s347_s26 = sshll.u32 %s340_s25, 4  ;;  %s6420_s17 = scalar_lea.sflag [#allocation7], %s336_s29  ;;  %s6418_s26 = int_to_ptr.vmem [resolvable:$true] %s347_s26 }
  0x91   : > { %p5973_p9 = pneg %p6414_p11 }
  0x93   : > { %s6412_s14 = scalar_lea.hbm %s7723_s0, %s4317_s21  ;;  %s5976_s23 = scalar_lea.hbm %s7723_s0, 2048 }
  0x94   : > { %s5971_s27 = scalar_lea.hbm %s6412_s14, 1024  ;;  %p5977_p13 = scmp.lt.u32.totalorder %s6412_s14, %s7723_s0 }
  0x95   : > { %p5972_p12 = scmp.ne.s32.totalorder %s6412_s14, %s5971_s27  ;;  %p5978_p2 = scmp.lt.u32.totalorder %s5976_s23, %s5971_s27 }
  0x96   : > { %p5980_p10 = scmp.lt.u32.totalorder %s5971_s27, %s6412_s14 }
  0x97   : > { %p5974_p1 = pnand %p5973_p9, %p5972_p12  ;;  %p5979_p6 = por %p5978_p2, %p5977_p13 }
  0x99   : > { %p5975_p4 = pneg %p5974_p1  ;;  %p5981_p3 = por %p5980_p10, %p5979_p6 }
  0x9b   : > { %p5982_p0 = pnand %p5981_p3, %p5975_p4 }
  0x9d   : > { %5985 = shalt.err (!%p5982_p0)
}
  0x9e   : > { %s5986_s29 = scalar_lea.vmem %s6418_s26, 1024  ;;  %s6148_s18 = smov [#allocation6]  }
  0x9f   : > { %p5987_p12 = scmp.ne.s32.totalorder %s6418_s26, %s5986_s29  ;;  %s5991_s21 = sshll.u32 %s6148_s18, 4  ;;  %s5992_s21 = int_to_ptr.vmem [resolvable:$false] %s5991_s21 }
  0xa0   : > { %s5993_s20 = scalar_lea.vmem %s5992_s21, 2048  ;;  %p5994_p7 = scmp.lt.s32.totalorder %s6418_s26, %s5992_s21 }
  0xa1   : > { %p5989_p1 = pnand %p5987_p12, %p5973_p9  ;;  %p5995_p13 = scmp.lt.s32.totalorder %s5993_s20, %s5986_s29 }
  0xa3   : > { %p5990_p5 = pneg %p5989_p1  ;;  %p5996_p2 = por %p5995_p13, %p5994_p7 }
  0xa5   : > { %p5997_p6 = pnand %p5996_p2, %p5990_p5 }
  0xa7   : > { %6000 = shalt.err (!%p5997_p6)
}
  0xa8   : > { %s7725_s27 = smov 8   ;;  %s7726_s23 = smov 128  }
  0xa9   : > { %5602 = dma.hbm_to_vmem [thread:$0]  (!%p6414_p11), %s6412_s14, 1024, %s6418_s26, %s6420_s17, %s7726_s23, %s7726_s23, %s7725_s27  }
  0xaa   : > { %p7727_p0 = scmp.ne.s32.totalorder %s7716_s16, 0 }
  0xab   : > { %s6454_s25 = sand.u32 (!%p7727_p0), 1, %s6127_s10  }
  0xac   : > { %359 = sbr.rel (%p7727_p0) target bundleno = 4318 (0x10de), region = 48  ;;  %s4276_s29 = sshll.u32 (!%p7727_p0), %s6454_s25, 6 }
  0xad   : > { %s362_s18 = scalar_lea.sflag (!%p7727_p0), [#allocation7], %s6454_s25  ;;  %s6458_s21 = scalar_lea.vmem (!%p7727_p0), [#allocation6], %s4276_s29 }
  0xb3   : > { %6098 = dma.done.wait (%p6392_p8), %s362_s18, 1024  }
  0xb4   : > { %6100 = vsyncadd (%p6392_p8), %s362_s18, 4294966272  ;;  %p7728_p7 = scmp.eq.s32.totalorder %s6226_s15, 0 }
  0xb6   : > { %6102 = dma.done.wait (%p7728_p7), [#allocation10], 10240   ;;  %p7729_p5 = pmov %p7728_p7 }
  0xb8   : > { %6104 = vsyncadd (%p7729_p5), [#allocation10], 4294957056  ;;  %p7730_p11 = pmov %p7729_p5 }
  0xb9   : > { %p7731_p9 = pmov %p7729_p5 }
  0xba   : > { %6106 = dma.done.wait (%p7730_p11), [#allocation13], 16512  }
  0xbb   : > { %6108 = vsyncadd (%p7731_p9), [#allocation13], 4294950784  ;;  %p7732_p4 = pmov %p7729_p5 }
  0xbd   : > { %6110 = dma.done.wait (%p7732_p4), [#allocation16], 256   ;;  %p7733_p10 = pmov %p7732_p4 }
  0xbe   : > { %s6476_s16 = scalar_lea.vmem [#allocation17], %s4276_s29  ;;  %p7734_p8 = scmp.ne.s32.totalorder %s6226_s15, 0 }
  0xbf   : > { %6112 = vsyncadd (%p7733_p10), [#allocation16], 4294967040  ;;  %v426_v0 = vld [vmem:[%s7698_s5] sm:$0xff] (!%p7734_p8)  ;;  %v427_v1 = vld [vmem:[%s7698_s5 + $0x8] sm:$0xff] (!%p7734_p8) }
  0xc0   : > { %425 = sbr.rel (%p7734_p8) target bundleno = 199 (0xc7), region = 76  ;;  %v430_v2 = vld [vmem:[#allocation15] sm:$0xff] (!%p7734_p8)  ;;  %428 = vst [vmem:[#allocation4] sm:$0xff] (!%p7734_p8), %v426_v0  ;;  %429 = vst [vmem:[#allocation4 + $0x8] sm:$0xff] (!%p7734_p8), %v427_v1  ;;  %v431_v3 = vld [vmem:[#allocation15 + $0x8] sm:$0xff] (!%p7734_p8) }
  0xc1   : > { %432 = vst [vmem:[#allocation5] sm:$0xff] (!%p7734_p8), %v430_v2  ;;  %433 = vst [vmem:[#allocation5 + $0x8] sm:$0xff] (!%p7734_p8), %v431_v3 }
  0xc7 PF: > { %v443_v4 = vld [vmem:[#allocation9 + $0x8] sm:$0xff]  ;;  %v445_v6 = vld [vmem:[#allocation9 + $0x18] sm:$0xff]  ;;  %v442_v9 = vld [vmem:[#allocation9] sm:$0xff]  ;;  %v7712_v11 = vmov 0.0   ;;  %vm480_vm0 = vcmask 261120   ;;  %s6696_s9 = sshll.u32 %s6226_s15, 3 }
  0xc8   : > { %v447_v5 = vld [vmem:[#allocation9 + $0x28] sm:$0xff]  ;;  %v449_v8 = vld [vmem:[#allocation9 + $0x38] sm:$0xff]  ;;  %v446_v10 = vld [vmem:[#allocation9 + $0x20] sm:$0xff]  ;;  %569 = vmatprep.mubr.f32.mxu0 %v7712_v11  ;;  %682 = vmatprep.mubr.f32.mxu1 %v7712_v11  ;;  %p1001_p3 = scmp.lt.s32.totalorder %s6696_s9, 12  ;;  %s1179_s27 = sadd.s32 1, %s6696_s9 }
  0xc9   : > { %v4319_v7 = vpack.c.bf16 %v447_v5, %v443_v4  ;;  %v4327_v12 = vpack.c.bf16 %v449_v8, %v445_v6  ;;  %v4321_v13 = vpack.c.bf16 %v446_v10, %v442_v9  ;;  %v444_v14 = vld [vmem:[#allocation9 + $0x10] sm:$0xff]  ;;  %v451_v16 = vld [vmem:[#allocation9 + $0x48] sm:$0xff]  ;;  %v453_v19 = vld [vmem:[#allocation9 + $0x58] sm:$0xff]  ;;  %p1180_p12 = scmp.lt.s32.totalorder %s1179_s27, 12  ;;  %s1359_s29 = sadd.s32 2, %s6696_s9 }
  0xca   : > { %v448_v15 = vld [vmem:[#allocation9 + $0x30] sm:$0xff]  ;;  %v455_v18 = vld [vmem:[#allocation9 + $0x68] sm:$0xff]  ;;  %v457_v20 = vld [vmem:[#allocation9 + $0x78] sm:$0xff]  ;;  %s1002_s20 = scalar_select %p1001_p3, 1, 0 }
  0xcb   : > { %4320 = vmatprep.subr.bf16.mxu0 %v4319_v7  ;;  %v4329_v17 = vpack.c.bf16 %v448_v15, %v444_v14  ;;  %4328 = vmatprep.subr.bf16.mxu1 %v4327_v12  ;;  %v4323_v21 = vpack.c.bf16 %v455_v18, %v451_v16  ;;  %v4331_v22 = vpack.c.bf16 %v457_v20, %v453_v19  ;;  %v450_v23 = vld [vmem:[#allocation9 + $0x40] sm:$0xff]  ;;  %v452_v25 = vld [vmem:[#allocation9 + $0x50] sm:$0xff]  ;;  %v764_v28 = vld [vmem:[#allocation12 + $0x8] sm:$0xff]  ;;  %s1181_s23 = scalar_select %p1180_p12, 1, 0 }
  0xcc   : > { %4322 = vmatpush1.bf16.msra.mxu0 %v4321_v13  ;;  %v454_v24 = vld [vmem:[#allocation9 + $0x60] sm:$0xff]  ;;  %v456_v27 = vld [vmem:[#allocation9 + $0x70] sm:$0xff]  ;;  %v768_v30 = vld [vmem:[#allocation12 + $0x28] sm:$0xff]  ;;  %p1360_p1 = scmp.lt.s32.totalorder %s1359_s29, 12  ;;  %s1719_s28 = sadd.s32 4, %s6696_s9 }
  0xcd   : > { %4330 = vmatpush1.bf16.msra.mxu1 %v4329_v17  ;;  %v4325_v26 = vpack.c.bf16 %v454_v24, %v450_v23  ;;  %4324 = vmatprep.subr.bf16.mxu0 %v4323_v21  ;;  %v4333_v29 = vpack.c.bf16 %v456_v27, %v452_v25  ;;  %v766_v31 = vld [vmem:[#allocation12 + $0x18] sm:$0xff]  ;;  %v6488_v33 = vpack.c.bf16 %v768_v30, %v764_v28  ;;  %v763_v35 = vld [vmem:[#allocation12] sm:$0xff]  ;;  %v765_v37 = vld [vmem:[#allocation12 + $0x10] sm:$0xff]  ;;  %p1720_p2 = scmp.lt.s32.totalorder %s1719_s28, 12  ;;  %s1899_s26 = sadd.s32 5, %s6696_s9 }
  0xce   : > { %4332 = vmatprep.subr.bf16.mxu1 %v4331_v22  ;;  %v770_v32 = vld [vmem:[#allocation12 + $0x38] sm:$0xff]  ;;  %v767_v36 = vld [vmem:[#allocation12 + $0x20] sm:$0xff]  ;;  %v769_v40 = vld [vmem:[#allocation12 + $0x30] sm:$0xff]  ;;  %s1361_s18 = scalar_select %p1360_p1, 1, 0 }
  0xcf   : > { %v6490_v34 = vpack.c.bf16 %v770_v32, %v766_v31  ;;  %v434_v38 = vld [vmem:[%s6458_s21] sm:$0xff]  ;;  %v6493_v39 = vpack.c.bf16 %v767_v36, %v763_v35  ;;  %v772_v41 = vld [vmem:[#allocation12 + $0x48] sm:$0xff]  ;;  %v6496_v42 = vpack.c.bf16 %v769_v40, %v765_v37  ;;  %v774_v44 = vld [vmem:[#allocation12 + $0x58] sm:$0xff]  ;;  %s1721_s14 = scalar_select %p1720_p2, 1, 0 }
  0xd0   : > { %4326 = vmatpush1.bf16.msra.mxu0 %v4325_v26  ;;  %v776_v43 = vld [vmem:[#allocation12 + $0x68] sm:$0xff]  ;;  %v778_v45 = vld [vmem:[#allocation12 + $0x78] sm:$0xff]  ;;  %v771_v47 = vld [vmem:[#allocation12 + $0x40] sm:$0xff]  ;;  %p1900_p6 = scmp.lt.s32.totalorder %s1899_s26, 12  ;;  %s2079_s27 = sadd.s32 6, %s6696_s9 }
  0xd1   : > { %4334 = vmatpush1.bf16.msra.mxu1 %v4333_v29  ;;  %4336 = vmatprep.subr.bf16.mxu0 %v6488_v33  ;;  %v6499_v46 = vpack.c.bf16 %v776_v43, %v772_v41  ;;  %v775_v48 = vld [vmem:[#allocation12 + $0x60] sm:$0xff]  ;;  %v773_v49 = vld [vmem:[#allocation12 + $0x50] sm:$0xff]  ;;  %v435_v50 = vld [vmem:[%s6458_s21 + $0x8] sm:$0xff]  ;;  %v6503_v51 = vpack.c.bf16 %v778_v45, %v774_v44  ;;  %p2080_p0 = scmp.lt.s32.totalorder %s2079_s27, 12  ;;  %s2259_s29 = sadd.s32 7, %s6696_s9 }
  0xd2   : > { %4368 = vmatprep.subr.bf16.mxu1 %v6490_v34  ;;  %v777_v52 = vld [vmem:[#allocation12 + $0x70] sm:$0xff]  ;;  %v780_v53 = vld [vmem:[#allocation12 + $0x88] sm:$0xff]  ;;  %v6507_v54 = vpack.c.bf16 %v775_v48, %v771_v47  ;;  %v782_v56 = vld [vmem:[#allocation12 + $0x98] sm:$0xff]  ;;  %p2260_p7 = scmp.lt.s32.totalorder %s2259_s29, 12  ;;  %s4089_s28 = sshll.u32 %s6476_s16, 4  ;;  %s7587_s28 = int_to_ptr.vmem [resolvable:$true] %s4089_s28 }
  0xd3   : > { %4284 = vmatmul.mubr.msk.f32.vlgmr.msra.gmra.mrb[0].mxu0 %vm480_vm0, %v434_v38  ;;  %v784_v55 = vld [vmem:[#allocation12 + $0xa8] sm:$0xff]  ;;  %v786_v57 = vld [vmem:[#allocation12 + $0xb8] sm:$0xff]  ;;  %v6511_v58 = vpack.c.bf16 %v777_v52, %v773_v49  ;;  %v779_v59 = vld [vmem:[#allocation12 + $0x80] sm:$0xff]  ;;  %p7740_p11 = scmp.eq.s32.totalorder %s6226_s15, 1 }
  0xd4   : > { %4292 = vmatmul.mubr.msk.f32.vlgmr.msra.gmra.mrb[0].mxu1 %vm480_vm0, %v434_v38  ;;  %4338 = vmatpush1.bf16.msra.mxu0 %v6493_v39  ;;  %v783_v60 = vld [vmem:[#allocation12 + $0xa0] sm:$0xff]  ;;  %v6515_v61 = vpack.c.bf16 %v784_v55, %v780_v53  ;;  %v781_v62 = vld [vmem:[#allocation12 + $0x90] sm:$0xff]  ;;  %v6519_v0 = vpack.c.bf16 %v786_v57, %v782_v56  ;;  %v788_v1 = vld [vmem:[#allocation12 + $0xc8] sm:$0xff] }
  0xd5   : > { %4370 = vmatpush1.bf16.msra.mxu1 %v6496_v42  ;;  %575 = vmatprep.mubr.f32.mxu0 %v7712_v11  ;;  %v785_v63 = vld [vmem:[#allocation12 + $0xb0] sm:$0xff]  ;;  %v792_v2 = vld [vmem:[#allocation12 + $0xe8] sm:$0xff]  ;;  %v6524_v4 = vpack.c.bf16 %v783_v60, %v779_v59  ;;  %v790_v5 = vld [vmem:[#allocation12 + $0xd8] sm:$0xff] }
  0xd6   : > { %688 = vmatprep.mubr.f32.mxu1 %v7712_v11  ;;  %4340 = vmatprep.subr.bf16.mxu0 %v6499_v46  ;;  %v436_v3 = vld [vmem:[%s6458_s21 + $0x10] sm:$0xff]  ;;  %v794_v6 = vld [vmem:[#allocation12 + $0xf8] sm:$0xff]  ;;  %v6528_v7 = vpack.c.bf16 %v785_v63, %v781_v62  ;;  %v787_v8 = vld [vmem:[#allocation12 + $0xc0] sm:$0xff]  ;;  %v6532_v10 = vpack.c.bf16 %v792_v2, %v788_v1 }
  0xd7   : > { %4285 = vmatmul.mubr.msk.f32.gmra.mrb[2].mxu0 %vm480_vm0, %v435_v50  ;;  %4372 = vmatprep.subr.bf16.mxu1 %v6503_v51  ;;  %v791_v9 = vld [vmem:[#allocation12 + $0xe0] sm:$0xff]  ;;  %v789_v12 = vld [vmem:[#allocation12 + $0xd0] sm:$0xff]  ;;  %v6536_v14 = vpack.c.bf16 %v794_v6, %v790_v5  ;;  %v796_v15 = vld [vmem:[#allocation12 + $0x108] sm:$0xff] }
  0xd8   : > { %4293 = vmatmul.mubr.msk.f32.gmra.mrb[2].mxu1 %vm480_vm0, %v435_v50  ;;  %4342 = vmatpush1.bf16.msra.mxu0 %v6507_v54  ;;  %v793_v13 = vld [vmem:[#allocation12 + $0xf0] sm:$0xff]  ;;  %v800_v16 = vld [vmem:[#allocation12 + $0x128] sm:$0xff]  ;;  %v437_v17 = vld [vmem:[%s6458_s21 + $0x18] sm:$0xff]  ;;  %v6541_v18 = vpack.c.bf16 %v791_v9, %v787_v8 }
  0xd9   : > { %4374 = vmatpush1.bf16.msra.mxu1 %v6511_v58  ;;  %581 = vmatprep.mubr.f32.mxu0 %v7712_v11  ;;  %v798_v19 = vld [vmem:[#allocation12 + $0x118] sm:$0xff]  ;;  %v6545_v21 = vpack.c.bf16 %v793_v13, %v789_v12  ;;  %v795_v22 = vld [vmem:[#allocation12 + $0x100] sm:$0xff]  ;;  %v6549_v24 = vpack.c.bf16 %v800_v16, %v796_v15  ;;  %v797_v25 = vld [vmem:[#allocation12 + $0x110] sm:$0xff] }
  0xda   : > { %694 = vmatprep.mubr.f32.mxu1 %v7712_v11  ;;  %4344 = vmatprep.subr.bf16.mxu0 %v6515_v61  ;;  %v802_v20 = vld [vmem:[#allocation12 + $0x138] sm:$0xff]  ;;  %v799_v23 = vld [vmem:[#allocation12 + $0x120] sm:$0xff]  ;;  %v801_v26 = vld [vmem:[#allocation12 + $0x130] sm:$0xff] }
  0xdb   : > { %4286 = vmatmul.mubr.msk.f32.gmra.mrb[4].mxu0 %vm480_vm0, %v436_v3  ;;  %4376 = vmatprep.subr.bf16.mxu1 %v6519_v0  ;;  %v6553_v27 = vpack.c.bf16 %v802_v20, %v798_v19  ;;  %v804_v28 = vld [vmem:[#allocation12 + $0x148] sm:$0xff]  ;;  %v438_v30 = vld [vmem:[%s6458_s21 + $0x20] sm:$0xff]  ;;  %v6558_v31 = vpack.c.bf16 %v799_v23, %v795_v22  ;;  %v806_v32 = vld [vmem:[#allocation12 + $0x158] sm:$0xff]  ;;  %v6562_v36 = vpack.c.bf16 %v801_v26, %v797_v25  ;;  %v460_v25 = vlaneseq }
  0xdc   : > { %4294 = vmatmul.mubr.msk.f32.gmra.mrb[4].mxu1 %vm480_vm0, %v436_v3  ;;  %4346 = vmatpush1.bf16.msra.mxu0 %v6524_v4  ;;  %v808_v29 = vld [vmem:[#allocation12 + $0x168] sm:$0xff]  ;;  %v810_v35 = vld [vmem:[#allocation12 + $0x178] sm:$0xff]  ;;  %v803_v37 = vld [vmem:[#allocation12 + $0x140] sm:$0xff] }
  0xdd   : > { %4378 = vmatpush1.bf16.msra.mxu1 %v6528_v7  ;;  %587 = vmatprep.mubr.f32.mxu0 %v7712_v11  ;;  %v807_v38 = vld [vmem:[#allocation12 + $0x160] sm:$0xff]  ;;  %v6566_v40 = vpack.c.bf16 %v808_v29, %v804_v28  ;;  %v805_v41 = vld [vmem:[#allocation12 + $0x150] sm:$0xff]  ;;  %v6570_v44 = vpack.c.bf16 %v810_v35, %v806_v32  ;;  %v812_v45 = vld [vmem:[#allocation12 + $0x188] sm:$0xff]  ;;  %v6664_v26 = vshrl.u32 %v460_v25, 7 }
  0xde   : > { %700 = vmatprep.mubr.f32.mxu1 %v7712_v11  ;;  %4348 = vmatprep.subr.bf16.mxu0 %v6532_v10  ;;  %v809_v43 = vld [vmem:[#allocation12 + $0x170] sm:$0xff]  ;;  %v816_v47 = vld [vmem:[#allocation12 + $0x1a8] sm:$0xff]  ;;  %v6575_v49 = vpack.c.bf16 %v807_v38, %v803_v37  ;;  %v814_v50 = vld [vmem:[#allocation12 + $0x198] sm:$0xff] }
  0xdf   : > { %4287 = vmatmul.mubr.msk.f32.gmra.mrb[6].mxu0 %vm480_vm0, %v437_v17  ;;  %4380 = vmatprep.subr.bf16.mxu1 %v6536_v14  ;;  %v439_v48 = vld [vmem:[%s6458_s21 + $0x28] sm:$0xff]  ;;  %v818_v52 = vld [vmem:[#allocation12 + $0x1b8] sm:$0xff]  ;;  %v6579_v53 = vpack.c.bf16 %v809_v43, %v805_v41  ;;  %v811_v55 = vld [vmem:[#allocation12 + $0x180] sm:$0xff]  ;;  %v6583_v57 = vpack.c.bf16 %v816_v47, %v812_v45  ;;  %v462_v28 = vsub.s32 0, %v6664_v26  ;;  %v7711_v35 = vsub.s32 2, %v6664_v26 }
  0xe0   : > { %4295 = vmatmul.mubr.msk.f32.gmra.mrb[6].mxu1 %vm480_vm0, %v437_v17  ;;  %4350 = vmatpush1.bf16.msra.mxu0 %v6541_v18  ;;  %v815_v56 = vld [vmem:[#allocation12 + $0x1a0] sm:$0xff]  ;;  %v813_v59 = vld [vmem:[#allocation12 + $0x190] sm:$0xff]  ;;  %v6587_v62 = vpack.c.bf16 %v818_v52, %v814_v50  ;;  %v820_v63 = vld [vmem:[#allocation12 + $0x1c8] sm:$0xff] }
  0xe1   : > { %4382 = vmatpush1.bf16.msra.mxu1 %v6545_v21  ;;  %593 = vmatprep.mubr.f32.mxu0 %v7712_v11  ;;  %v817_v60 = vld [vmem:[#allocation12 + $0x1b0] sm:$0xff]  ;;  %v824_v1 = vld [vmem:[#allocation12 + $0x1e8] sm:$0xff]  ;;  %v6592_v3 = vpack.c.bf16 %v815_v56, %v811_v55  ;;  %v822_v5 = vld [vmem:[#allocation12 + $0x1d8] sm:$0xff] }
  0xe2   : > { %706 = vmatprep.mubr.f32.mxu1 %v7712_v11  ;;  %4352 = vmatprep.subr.bf16.mxu0 %v6549_v24  ;;  %v440_v2 = vld [vmem:[%s6458_s21 + $0x30] sm:$0xff]  ;;  %v826_v6 = vld [vmem:[#allocation12 + $0x1f8] sm:$0xff]  ;;  %v6596_v8 = vpack.c.bf16 %v817_v60, %v813_v59  ;;  %v819_v9 = vld [vmem:[#allocation12 + $0x1c0] sm:$0xff]  ;;  %v6600_v13 = vpack.c.bf16 %v824_v1, %v820_v63 }
  0xe3   : > { %4288 = vmatmul.mubr.msk.f32.gmra.mrb[8].mxu0 %vm480_vm0, %v438_v30  ;;  %4384 = vmatprep.subr.bf16.mxu1 %v6553_v27  ;;  %v823_v12 = vld [vmem:[#allocation12 + $0x1e0] sm:$0xff]  ;;  %v821_v15 = vld [vmem:[#allocation12 + $0x1d0] sm:$0xff]  ;;  %v6604_v17 = vpack.c.bf16 %v826_v6, %v822_v5  ;;  %v441_v19 = vld [vmem:[%s6458_s21 + $0x38] sm:$0xff]  ;;  %s1539_s21 = sadd.s32 3, %s6696_s9  ;;  %s6150_s9 = smov [#allocation18]  }
  0xe4   : > { %4296 = vmatmul.mubr.msk.f32.gmra.mrb[8].mxu1 %vm480_vm0, %v438_v30  ;;  %4354 = vmatpush1.bf16.msra.mxu0 %v6558_v31  ;;  %v825_v16 = vld [vmem:[#allocation12 + $0x1f0] sm:$0xff]  ;;  %v6609_v20 = vpack.c.bf16 %v823_v12, %v819_v9  ;;  %v6621_v23 = vld [vmem:[#allocation4] sm:$0xff]  ;;  %v466_v30 = vsub.s32 1, %v6664_v26  ;;  %p1540_p13 = scmp.lt.s32.totalorder %s1539_s21, 12  ;;  %s4102_s21 = sshll.u32 %s6150_s9, 4  ;;  %s7578_s21 = int_to_ptr.vmem [resolvable:$true] %s4102_s21 }
  0xe5   : > { %4386 = vmatpush1.bf16.msra.mxu1 %v6562_v36  ;;  %599 = vmatprep.mubr.f32.mxu0 %v7712_v11  ;;  %v6613_v22 = vpack.c.bf16 %v825_v16, %v821_v15  ;;  %v458_v29 = vld [vmem:[#allocation14] sm:$0xf]  ;;  %v6690_v15 = vld [vmem:[#allocation5] sm:$0xff]  ;;  %s6001_s29 = scalar_lea.vmem %s7578_s21, 256  ;;  %p6008_p10 = scmp.lt.s32.totalorder %s7578_s21, %s7578_s21 }
  0xe6   : > { %712 = vmatprep.mubr.f32.mxu1 %v7712_v11  ;;  %4356 = vmatprep.subr.bf16.mxu0 %v6566_v40  ;;  %v6670_v32 = vrot.slane %v458_v29, %v462_v28  ;;  %v6675_v37 = vrot.slane %v458_v29, %v466_v30  ;;  %v6680_v43 = vrot.slane %v458_v29, %v7711_v35  ;;  %s1541_s17 = scalar_select %p1540_p13, 1, 0 }
  0xe7   : > { %4289 = vmatmul.mubr.msk.f32.gmra.mrb[10].mxu0 %vm480_vm0, %v439_v48  ;;  %4388 = vmatprep.subr.bf16.mxu1 %v6570_v44  ;;  %p6002_p5 = scmp.ne.s32.totalorder %s7578_s21, %s6001_s29  ;;  %p6009_p8 = scmp.lt.s32.totalorder %s6001_s29, %s6001_s29 }
  0xe8   : > { %4297 = vmatmul.mubr.msk.f32.gmra.mrb[10].mxu1 %vm480_vm0, %v439_v48  ;;  %4358 = vmatpush1.bf16.msra.mxu0 %v6575_v49  ;;  %v7710_v48 = vsub.s32 3, %v6664_v26 }
  0xe9   : > { %4390 = vmatpush1.bf16.msra.mxu1 %v6579_v53  ;;  %605 = vmatprep.mubr.f32.mxu0 %v7712_v11  ;;  %p6003_p9 = pnand %p6002_p5, %p7740_p11  ;;  %p6010_p3 = por %p6009_p8, %p6008_p10 }
  0xea   : > { %718 = vmatprep.mubr.f32.mxu1 %v7712_v11  ;;  %4360 = vmatprep.subr.bf16.mxu0 %v6583_v57  ;;  %v6687_v60 = vrot.slane %v458_v29, %v7710_v48 }
  0xeb   : > { %4290 = vmatmul.mubr.msk.f32.gmra.mrb[12].mxu0 %vm480_vm0, %v440_v2  ;;  %4392 = vmatprep.subr.bf16.mxu1 %v6587_v62  ;;  %p6004_p4 = pneg %p6003_p9 }
  0xec   : > { %4298 = vmatmul.mubr.msk.f32.gmra.mrb[12].mxu1 %vm480_vm0, %v440_v2  ;;  %4362 = vmatpush1.bf16.msra.mxu0 %v6592_v3 }
  0xed   : > { %4394 = vmatpush1.bf16.msra.mxu1 %v6596_v8  ;;  %611 = vmatprep.mubr.f32.mxu0 %v7712_v11  ;;  %p6011_p12 = pnand %p6010_p3, %p6004_p4 }
  0xee   : > { %724 = vmatprep.mubr.f32.mxu1 %v7712_v11  ;;  %4364 = vmatprep.subr.bf16.mxu0 %v6600_v13 }
  0xef   : > { %4291 = vmatmul.mubr.msk.f32.gmra.mrb[14].mxu0 %vm480_vm0, %v441_v19  ;;  %4396 = vmatprep.subr.bf16.mxu1 %v6604_v17 }
  0xf0   : > { %4299 = vmatmul.mubr.msk.f32.gmra.mrb[14].mxu1 %vm480_vm0, %v441_v19  ;;  %4366 = vmatpush1.bf16.msra.mxu0 %v6609_v20 }
  0xf1   : > { %4398 = vmatpush1.bf16.msra.mxu1 %v6613_v22  ;;  %900 = vmatprep.mubr.f32.mxu0 %v7712_v11 }
  0xf2   : > { %971 = vmatprep.mubr.f32.mxu1 %v7712_v11  ;;  %4400 = vmatprep.subr.bf16.mxu0 %v6488_v33 }
  0xf3   : > { %901 = vmatmul.mubr.f32.vlgmr.msra.gmra.mrb[0].mxu0 %v6621_v23  ;;  %4432 = vmatprep.subr.bf16.mxu1 %v6490_v34 }
  0xf4   : > { %972 = vmatmul.mubr.f32.vlgmr.msra.gmra.mrb[0].mxu1 %v6621_v23  ;;  %4402 = vmatpush1.bf16.msra.mxu0 %v6493_v39 }
  0xf5   : > { %4434 = vmatpush1.bf16.msra.mxu1 %v6496_v42  ;;  %4404 = vmatprep.subr.bf16.mxu0 %v6499_v46 }
  0xf6   : > { %4436 = vmatprep.subr.bf16.mxu1 %v6503_v51  ;;  %1079 = vmatprep.mubr.f32.mxu0 %v7712_v11 }
  0xf7   : > { %1150 = vmatprep.mubr.f32.mxu1 %v7712_v11 }
  0xf8   : > { %4406 = vmatpush1.bf16.msra.mxu0 %v6507_v54 }
  0xf9   : > { %4438 = vmatpush1.bf16.msra.mxu1 %v6511_v58  ;;  %4408 = vmatprep.subr.bf16.mxu0 %v6515_v61 }
  0xfa   : > { %4440 = vmatprep.subr.bf16.mxu1 %v6519_v0 }
  0xfc   : > { %4410 = vmatpush1.bf16.msra.mxu0 %v6524_v4 }
  0xfd   : > { %4442 = vmatpush1.bf16.msra.mxu1 %v6528_v7  ;;  %4412 = vmatprep.subr.bf16.mxu0 %v6532_v10 }
  0xfe   : > { %4444 = vmatprep.subr.bf16.mxu1 %v6536_v14 }
 0x100   : > { %4414 = vmatpush1.bf16.msra.mxu0 %v6541_v18 }
 0x101   : > { %4446 = vmatpush1.bf16.msra.mxu1 %v6545_v21  ;;  %4416 = vmatprep.subr.bf16.mxu0 %v6549_v24 }
 0x102   : > { %4448 = vmatprep.subr.bf16.mxu1 %v6553_v27 }
 0x104   : > { %4418 = vmatpush1.bf16.msra.mxu0 %v6558_v31 }
 0x105   : > { %4450 = vmatpush1.bf16.msra.mxu1 %v6562_v36  ;;  %4420 = vmatprep.subr.bf16.mxu0 %v6566_v40 }
 0x106   : > { %4452 = vmatprep.subr.bf16.mxu1 %v6570_v44 }
 0x108   : > { %4422 = vmatpush1.bf16.msra.mxu0 %v6575_v49 }
 0x109   : > { %4454 = vmatpush1.bf16.msra.mxu1 %v6579_v53  ;;  %4424 = vmatprep.subr.bf16.mxu0 %v6583_v57 }
 0x10a   : > { %4456 = vmatprep.subr.bf16.mxu1 %v6587_v62 }
 0x10c   : > { %4426 = vmatpush1.bf16.msra.mxu0 %v6592_v3 }
 0x10d   : > { %4458 = vmatpush1.bf16.msra.mxu1 %v6596_v8  ;;  %4428 = vmatprep.subr.bf16.mxu0 %v6600_v13 }
 0x10e   : > { %4460 = vmatprep.subr.bf16.mxu1 %v6604_v17 }
 0x110   : > { %4430 = vmatpush1.bf16.msra.mxu0 %v6609_v20 }
 0x111   : > { %4462 = vmatpush1.bf16.msra.mxu1 %v6613_v22  ;;  %4464 = vmatprep.subr.bf16.mxu0 %v6488_v33 }
 0x112   : > { %4496 = vmatprep.subr.bf16.mxu1 %v6490_v34 }
 0x1c6   : > { %v902_v38 = vpop.f32.mrb[0].mxu0 }
 0x1c7   : > { %v5423_v41 = vadd.f32 %v902_v38, %v6670_v32  ;;  %v973_v45 = vpop.f32.mrb[0].mxu1  ;;  %v904_v47 = vpop.f32.mrb[1].mxu0 }
 0x1c8   : > { %v5424_v50 = vadd.f32 %v904_v47, %v6675_v37  ;;  %v975_v52 = vpop.f32.mrb[1].mxu1  ;;  %v5439_v59 = vadd.f32 %v973_v45, %v6680_v43 }
 0x1c9   : > { %v982_v55 = vmul.f32 0.5, %v5423_v41  ;;  %v5440_v63 = vadd.f32 %v975_v52, %v6687_v60 }
 0x1ca   : > { %v986_v56 = vmul.f32 0.5, %v5424_v50  ;;  %v1003_v50 = vstv %s1002_s20  ;;  %s1901_s20 = scalar_select %p1900_p6, 1, 0 }
 0x1cb   : > { %5671 = vtanh.f32 %v982_v55  ;;  %v991_v1 = vmul.f32 0.5, %v5440_v63  ;;  %vm6700_vm1 = vcmp.eq.s32.totalorder %v1003_v50, 1 }
 0x1cc   : > { %5673 = vtanh.f32 %v986_v56 }
 0x1cd   : > { %5675 = vtanh.f32 %v5439_v59 }
 0x1ce   : > { %5677 = vtanh.f32 %v991_v1 }
 0x1d5   : > { %v5672_v2 = vpop.eup %5671 }
 0x1d6   : > { %v5674_v5 = vpop.eup %5673  ;;  %v984_v6 = vadd.f32 1.0, %v5672_v2 }
 0x1d7   : > { %v988_v9 = vadd.f32 1.0, %v5674_v5  ;;  %v5676_v16 = vpop.eup %5675 }
 0x1d8   : > { %v985_v12 = vmul.f32 0.5, %v984_v6  ;;  %v5678_v41 = vpop.eup %5677 }
 0x1d9   : > { %v989_v19 = vmul.f32 0.5, %v988_v9  ;;  %v993_v45 = vadd.f32 1.0, %v5678_v41 }
 0x1da   : > { %v996_v25 = vmul.f32 %v5676_v16, %v985_v12 }
 0x1db   : > { %v995_v29 = vmul.f32 %v989_v19, %v6690_v15  ;;  %v994_v47 = vmul.f32 0.5, %v993_v45 }
 0x1dd   : > { %v6693_v38 = vadd.f32 %v996_v25, %v995_v29 }
 0x1df   : > { %5679 = vtanh.f32 %v6693_v38 }
 0x1e9   : > { %v5680_v52 = vpop.eup %5679 }
 0x1ea   : > { %v999_v55 = vmul.f32 %v5680_v52, %v994_v47 }
 0x1ec   : > { %v6707_v59 = vsel %vm6700_vm1, %v999_v55, %v6621_v23 }
 0x1ed   : > { %1080 = vmatmul.mubr.f32.vlgmr.msra.gmra.mrb[2].mxu0 %v6707_v59  ;;  %1151 = vmatmul.mubr.f32.vlgmr.msra.gmra.mrb[2].mxu1 %v6707_v59 }
 0x1ee   : > { %4466 = vmatpush1.bf16.msra.mxu0 %v6493_v39  ;;  %4498 = vmatpush1.bf16.msra.mxu1 %v6496_v42 }
 0x1ef   : > { %4468 = vmatprep.subr.bf16.mxu0 %v6499_v46  ;;  %4500 = vmatprep.subr.bf16.mxu1 %v6503_v51 }
 0x1f0   : > { %1259 = vmatprep.mubr.f32.mxu0 %v7712_v11  ;;  %1330 = vmatprep.mubr.f32.mxu1 %v7712_v11 }
 0x1f2   : > { %4470 = vmatpush1.bf16.msra.mxu0 %v6507_v54  ;;  %4502 = vmatpush1.bf16.msra.mxu1 %v6511_v58 }
 0x1f3   : > { %4472 = vmatprep.subr.bf16.mxu0 %v6515_v61  ;;  %4504 = vmatprep.subr.bf16.mxu1 %v6519_v0 }
 0x1f6   : > { %4474 = vmatpush1.bf16.msra.mxu0 %v6524_v4  ;;  %4506 = vmatpush1.bf16.msra.mxu1 %v6528_v7 }
 0x1f7   : > { %4476 = vmatprep.subr.bf16.mxu0 %v6532_v10  ;;  %4508 = vmatprep.subr.bf16.mxu1 %v6536_v14 }
 0x1fa   : > { %4478 = vmatpush1.bf16.msra.mxu0 %v6541_v18  ;;  %4510 = vmatpush1.bf16.msra.mxu1 %v6545_v21 }
 0x1fb   : > { %4480 = vmatprep.subr.bf16.mxu0 %v6549_v24  ;;  %4512 = vmatprep.subr.bf16.mxu1 %v6553_v27 }
 0x1fe   : > { %4482 = vmatpush1.bf16.msra.mxu0 %v6558_v31  ;;  %4514 = vmatpush1.bf16.msra.mxu1 %v6562_v36 }
 0x1ff   : > { %4484 = vmatprep.subr.bf16.mxu0 %v6566_v40  ;;  %4516 = vmatprep.subr.bf16.mxu1 %v6570_v44 }
 0x202   : > { %4486 = vmatpush1.bf16.msra.mxu0 %v6575_v49  ;;  %4518 = vmatpush1.bf16.msra.mxu1 %v6579_v53 }
 0x203   : > { %4488 = vmatprep.subr.bf16.mxu0 %v6583_v57  ;;  %4520 = vmatprep.subr.bf16.mxu1 %v6587_v62 }
 0x206   : > { %4490 = vmatpush1.bf16.msra.mxu0 %v6592_v3  ;;  %4522 = vmatpush1.bf16.msra.mxu1 %v6596_v8 }
 0x207   : > { %4492 = vmatprep.subr.bf16.mxu0 %v6600_v13  ;;  %4524 = vmatprep.subr.bf16.mxu1 %v6604_v17 }
 0x20a   : > { %4494 = vmatpush1.bf16.msra.mxu0 %v6609_v20  ;;  %4526 = vmatpush1.bf16.msra.mxu1 %v6613_v22 }
 0x20b   : > { %4528 = vmatprep.subr.bf16.mxu0 %v6488_v33  ;;  %4560 = vmatprep.subr.bf16.mxu1 %v6490_v34 }
 0x2c0   : > { %v1081_v23 = vpop.f32.mrb[2].mxu0  ;;  %v1152_v63 = vpop.f32.mrb[2].mxu1 }
 0x2c1   : > { %v5425_v1 = vadd.f32 %v1081_v23, %v6670_v32  ;;  %v1083_v2 = vpop.f32.mrb[3].mxu0  ;;  %v1154_v5 = vpop.f32.mrb[3].mxu1  ;;  %v5441_v16 = vadd.f32 %v1152_v63, %v6680_v43  ;;  %v6750_v23 = vstv %s1181_s23  ;;  %v1006_v63 = vsel %vm6700_vm1, %v6693_v38, %v6690_v15  ;;  %s2081_s23 = scalar_select %p2080_p0, 1, 0 }
 0x2c2   : > { %v5426_v6 = vadd.f32 %v1083_v2, %v6675_v37  ;;  %v5442_v19 = vadd.f32 %v1154_v5, %v6687_v60  ;;  %vm1183_vm2 = vcmp.eq.s32.totalorder %v6750_v23, 1 }
 0x2c3   : > { %v1161_v9 = vmul.f32 0.5, %v5425_v1 }
 0x2c4   : > { %v1165_v12 = vmul.f32 0.5, %v5426_v6  ;;  %v1170_v25 = vmul.f32 0.5, %v5442_v19 }
 0x2c5   : > { %5681 = vtanh.f32 %v1161_v9 }
 0x2c6   : > { %5683 = vtanh.f32 %v1165_v12 }
 0x2c7   : > { %5685 = vtanh.f32 %v5441_v16 }
 0x2c8   : > { %5687 = vtanh.f32 %v1170_v25 }
 0x2cf   : > { %v5682_v29 = vpop.eup %5681 }
 0x2d0   : > { %v5684_v41 = vpop.eup %5683  ;;  %v1163_v45 = vadd.f32 1.0, %v5682_v29 }
 0x2d1   : > { %v1167_v47 = vadd.f32 1.0, %v5684_v41  ;;  %v5686_v52 = vpop.eup %5685 }
 0x2d2   : > { %v1164_v50 = vmul.f32 0.5, %v1163_v45  ;;  %v5688_v9 = vpop.eup %5687 }
 0x2d3   : > { %v1168_v55 = vmul.f32 0.5, %v1167_v47  ;;  %v1172_v12 = vadd.f32 1.0, %v5688_v9 }
 0x2d4   : > { %v1175_v1 = vmul.f32 %v5686_v52, %v1164_v50 }
 0x2d5   : > { %v1174_v2 = vmul.f32 %v1168_v55, %v1006_v63  ;;  %v1173_v16 = vmul.f32 0.5, %v1172_v12 }
 0x2d7   : > { %v1176_v5 = vadd.f32 %v1175_v1, %v1174_v2 }
 0x2d9   : > { %5689 = vtanh.f32 %v1176_v5  ;;  %v6759_v6 = vsel %vm1183_vm2, %v1176_v5, %v1006_v63 }
 0x2e3   : > { %v5690_v19 = vpop.eup %5689 }
 0x2e4   : > { %v1178_v25 = vmul.f32 %v5690_v19, %v1173_v16 }
 0x2e6   : > { %v6764_v29 = vsel %vm1183_vm2, %v1178_v25, %v6707_v59 }
 0x2e7   : > { %1260 = vmatmul.mubr.f32.vlgmr.msra.gmra.mrb[4].mxu0 %v6764_v29  ;;  %1331 = vmatmul.mubr.f32.vlgmr.msra.gmra.mrb[4].mxu1 %v6764_v29 }
 0x2e8   : > { %4530 = vmatpush1.bf16.msra.mxu0 %v6493_v39  ;;  %4562 = vmatpush1.bf16.msra.mxu1 %v6496_v42 }
 0x2e9   : > { %4532 = vmatprep.subr.bf16.mxu0 %v6499_v46  ;;  %4564 = vmatprep.subr.bf16.mxu1 %v6503_v51 }
 0x2ea   : > { %1439 = vmatprep.mubr.f32.mxu0 %v7712_v11  ;;  %1510 = vmatprep.mubr.f32.mxu1 %v7712_v11 }
 0x2ec   : > { %4534 = vmatpush1.bf16.msra.mxu0 %v6507_v54  ;;  %4566 = vmatpush1.bf16.msra.mxu1 %v6511_v58 }
 0x2ed   : > { %4536 = vmatprep.subr.bf16.mxu0 %v6515_v61  ;;  %4568 = vmatprep.subr.bf16.mxu1 %v6519_v0 }
 0x2f0   : > { %4538 = vmatpush1.bf16.msra.mxu0 %v6524_v4  ;;  %4570 = vmatpush1.bf16.msra.mxu1 %v6528_v7 }
 0x2f1   : > { %4540 = vmatprep.subr.bf16.mxu0 %v6532_v10  ;;  %4572 = vmatprep.subr.bf16.mxu1 %v6536_v14 }
 0x2f4   : > { %4542 = vmatpush1.bf16.msra.mxu0 %v6541_v18  ;;  %4574 = vmatpush1.bf16.msra.mxu1 %v6545_v21 }
 0x2f5   : > { %4544 = vmatprep.subr.bf16.mxu0 %v6549_v24  ;;  %4576 = vmatprep.subr.bf16.mxu1 %v6553_v27 }
 0x2f8   : > { %4546 = vmatpush1.bf16.msra.mxu0 %v6558_v31  ;;  %4578 = vmatpush1.bf16.msra.mxu1 %v6562_v36 }
 0x2f9   : > { %4548 = vmatprep.subr.bf16.mxu0 %v6566_v40  ;;  %4580 = vmatprep.subr.bf16.mxu1 %v6570_v44 }
 0x2fc   : > { %4550 = vmatpush1.bf16.msra.mxu0 %v6575_v49  ;;  %4582 = vmatpush1.bf16.msra.mxu1 %v6579_v53 }
 0x2fd   : > { %4552 = vmatprep.subr.bf16.mxu0 %v6583_v57  ;;  %4584 = vmatprep.subr.bf16.mxu1 %v6587_v62 }
 0x300   : > { %4554 = vmatpush1.bf16.msra.mxu0 %v6592_v3  ;;  %4586 = vmatpush1.bf16.msra.mxu1 %v6596_v8 }
 0x301   : > { %4556 = vmatprep.subr.bf16.mxu0 %v6600_v13  ;;  %4588 = vmatprep.subr.bf16.mxu1 %v6604_v17 }
 0x304   : > { %4558 = vmatpush1.bf16.msra.mxu0 %v6609_v20  ;;  %4590 = vmatpush1.bf16.msra.mxu1 %v6613_v22 }
 0x305   : > { %4592 = vmatprep.subr.bf16.mxu0 %v6488_v33  ;;  %4624 = vmatprep.subr.bf16.mxu1 %v6490_v34 }
 0x3ba   : > { %v1261_v15 = vpop.f32.mrb[4].mxu0  ;;  %v1332_v38 = vpop.f32.mrb[4].mxu1 }
 0x3bb   : > { %v5427_v41 = vadd.f32 %v1261_v15, %v6670_v32  ;;  %v1263_v45 = vpop.f32.mrb[5].mxu0  ;;  %v1334_v47 = vpop.f32.mrb[5].mxu1  ;;  %v5443_v63 = vadd.f32 %v1332_v38, %v6680_v43 }
 0x3bc   : > { %v5428_v50 = vadd.f32 %v1263_v45, %v6675_v37  ;;  %v5444_v1 = vadd.f32 %v1334_v47, %v6687_v60 }
 0x3bd   : > { %v1341_v52 = vmul.f32 0.5, %v5427_v41  ;;  %v6807_v41 = vstv %s1361_s18  ;;  %s2261_s18 = scalar_select %p2260_p7, 1, 0 }
 0x3be   : > { %v1345_v55 = vmul.f32 0.5, %v5428_v50  ;;  %v1350_v2 = vmul.f32 0.5, %v5444_v1  ;;  %vm1363_vm3 = vcmp.eq.s32.totalorder %v6807_v41, 1 }
 0x3bf   : > { %5691 = vtanh.f32 %v1341_v52 }
 0x3c0   : > { %5693 = vtanh.f32 %v1345_v55 }
 0x3c1   : > { %5695 = vtanh.f32 %v5443_v63 }
 0x3c2   : > { %5697 = vtanh.f32 %v1350_v2 }
 0x3c9   : > { %v5692_v5 = vpop.eup %5691 }
 0x3ca   : > { %v5694_v9 = vpop.eup %5693  ;;  %v1343_v12 = vadd.f32 1.0, %v5692_v5 }
 0x3cb   : > { %v1347_v16 = vadd.f32 1.0, %v5694_v9  ;;  %v5696_v25 = vpop.eup %5695 }
 0x3cc   : > { %v1344_v19 = vmul.f32 0.5, %v1343_v12  ;;  %v5698_v52 = vpop.eup %5697 }
 0x3cd   : > { %v1348_v15 = vmul.f32 0.5, %v1347_v16  ;;  %v1352_v55 = vadd.f32 1.0, %v5698_v52 }
 0x3ce   : > { %v1355_v45 = vmul.f32 %v5696_v25, %v1344_v19 }
 0x3cf   : > { %v1354_v38 = vmul.f32 %v1348_v15, %v6759_v6  ;;  %v1353_v63 = vmul.f32 0.5, %v1352_v55 }
 0x3d1   : > { %v1356_v50 = vadd.f32 %v1355_v45, %v1354_v38 }
 0x3d3   : > { %5699 = vtanh.f32 %v1356_v50  ;;  %v6814_v47 = vsel %vm1363_vm3, %v1356_v50, %v6759_v6 }
 0x3dd   : > { %v5700_v1 = vpop.eup %5699 }
 0x3de   : > { %v1358_v2 = vmul.f32 %v5700_v1, %v1353_v63 }
 0x3e0   : > { %v6819_v5 = vsel %vm1363_vm3, %v1358_v2, %v6764_v29 }
 0x3e1   : > { %1440 = vmatmul.mubr.f32.vlgmr.msra.gmra.mrb[6].mxu0 %v6819_v5  ;;  %1511 = vmatmul.mubr.f32.vlgmr.msra.gmra.mrb[6].mxu1 %v6819_v5 }
 0x3e2   : > { %4594 = vmatpush1.bf16.msra.mxu0 %v6493_v39  ;;  %4626 = vmatpush1.bf16.msra.mxu1 %v6496_v42 }
 0x3e3   : > { %4596 = vmatprep.subr.bf16.mxu0 %v6499_v46  ;;  %4628 = vmatprep.subr.bf16.mxu1 %v6503_v51 }
 0x3e4   : > { %1619 = vmatprep.mubr.f32.mxu0 %v7712_v11  ;;  %1690 = vmatprep.mubr.f32.mxu1 %v7712_v11 }
 0x3e6   : > { %4598 = vmatpush1.bf16.msra.mxu0 %v6507_v54  ;;  %4630 = vmatpush1.bf16.msra.mxu1 %v6511_v58 }
 0x3e7   : > { %4600 = vmatprep.subr.bf16.mxu0 %v6515_v61  ;;  %4632 = vmatprep.subr.bf16.mxu1 %v6519_v0 }
 0x3ea   : > { %4602 = vmatpush1.bf16.msra.mxu0 %v6524_v4  ;;  %4634 = vmatpush1.bf16.msra.mxu1 %v6528_v7 }
 0x3eb   : > { %4604 = vmatprep.subr.bf16.mxu0 %v6532_v10  ;;  %4636 = vmatprep.subr.bf16.mxu1 %v6536_v14 }
 0x3ee   : > { %4606 = vmatpush1.bf16.msra.mxu0 %v6541_v18  ;;  %4638 = vmatpush1.bf16.msra.mxu1 %v6545_v21 }
 0x3ef   : > { %4608 = vmatprep.subr.bf16.mxu0 %v6549_v24  ;;  %4640 = vmatprep.subr.bf16.mxu1 %v6553_v27 }
 0x3f2   : > { %4610 = vmatpush1.bf16.msra.mxu0 %v6558_v31  ;;  %4642 = vmatpush1.bf16.msra.mxu1 %v6562_v36 }
 0x3f3   : > { %4612 = vmatprep.subr.bf16.mxu0 %v6566_v40  ;;  %4644 = vmatprep.subr.bf16.mxu1 %v6570_v44 }
 0x3f6   : > { %4614 = vmatpush1.bf16.msra.mxu0 %v6575_v49  ;;  %4646 = vmatpush1.bf16.msra.mxu1 %v6579_v53 }
 0x3f7   : > { %4616 = vmatprep.subr.bf16.mxu0 %v6583_v57  ;;  %4648 = vmatprep.subr.bf16.mxu1 %v6587_v62 }
 0x3fa   : > { %4618 = vmatpush1.bf16.msra.mxu0 %v6592_v3  ;;  %4650 = vmatpush1.bf16.msra.mxu1 %v6596_v8 }
 0x3fb   : > { %4620 = vmatprep.subr.bf16.mxu0 %v6600_v13  ;;  %4652 = vmatprep.subr.bf16.mxu1 %v6604_v17 }
 0x3fe   : > { %4622 = vmatpush1.bf16.msra.mxu0 %v6609_v20  ;;  %4654 = vmatpush1.bf16.msra.mxu1 %v6613_v22 }
 0x3ff   : > { %4656 = vmatprep.subr.bf16.mxu0 %v6488_v33  ;;  %4688 = vmatprep.subr.bf16.mxu1 %v6490_v34 }
 0x4b4   : > { %v1441_v6 = vpop.f32.mrb[6].mxu0  ;;  %v1512_v9 = vpop.f32.mrb[6].mxu1 }
 0x4b5   : > { %v5429_v12 = vadd.f32 %v1441_v6, %v6670_v32  ;;  %v1443_v16 = vpop.f32.mrb[7].mxu0  ;;  %v1514_v19 = vpop.f32.mrb[7].mxu1  ;;  %v5445_v38 = vadd.f32 %v1512_v9, %v6680_v43 }
 0x4b6   : > { %v5430_v25 = vadd.f32 %v1443_v16, %v6675_v37  ;;  %v5446_v50 = vadd.f32 %v1514_v19, %v6687_v60 }
 0x4b7   : > { %v1521_v15 = vmul.f32 0.5, %v5429_v12 }
 0x4b8   : > { %v1525_v45 = vmul.f32 0.5, %v5430_v25  ;;  %v1530_v52 = vmul.f32 0.5, %v5446_v50  ;;  %v6862_v25 = vstv %s1541_s17  ;;  %s4318_s17 = sshll.u32 %s6226_s15, 10 }
 0x4b9   : > { %5701 = vtanh.f32 %v1521_v15  ;;  %vm1543_vm4 = vcmp.eq.s32.totalorder %v6862_v25, 1 }
 0x4ba   : > { %5703 = vtanh.f32 %v1525_v45 }
 0x4bb   : > { %5705 = vtanh.f32 %v5445_v38 }
 0x4bc   : > { %5707 = vtanh.f32 %v1530_v52 }
 0x4c3   : > { %v5702_v55 = vpop.eup %5701 }
 0x4c4   : > { %v5704_v63 = vpop.eup %5703  ;;  %v1523_v1 = vadd.f32 1.0, %v5702_v55 }
 0x4c5   : > { %v1527_v2 = vadd.f32 1.0, %v5704_v63  ;;  %v5706_v16 = vpop.eup %5705 }
 0x4c6   : > { %v1524_v6 = vmul.f32 0.5, %v1523_v1  ;;  %v5708_v38 = vpop.eup %5707 }
 0x4c7   : > { %v1528_v12 = vmul.f32 0.5, %v1527_v2  ;;  %v1532_v50 = vadd.f32 1.0, %v5708_v38 }
 0x4c8   : > { %v1535_v15 = vmul.f32 %v5706_v16, %v1524_v6 }
 0x4c9   : > { %v1534_v9 = vmul.f32 %v1528_v12, %v6814_v47  ;;  %v1533_v52 = vmul.f32 0.5, %v1532_v50 }
 0x4cb   : > { %v1536_v45 = vadd.f32 %v1535_v15, %v1534_v9 }
 0x4cd   : > { %5709 = vtanh.f32 %v1536_v45  ;;  %v6869_v19 = vsel %vm1543_vm4, %v1536_v45, %v6814_v47 }
 0x4d7   : > { %v5710_v55 = vpop.eup %5709 }
 0x4d8   : > { %v1538_v63 = vmul.f32 %v5710_v55, %v1533_v52 }
 0x4da   : > { %v6874_v1 = vsel %vm1543_vm4, %v1538_v63, %v6819_v5 }
 0x4db   : > { %1620 = vmatmul.mubr.f32.vlgmr.msra.gmra.mrb[8].mxu0 %v6874_v1  ;;  %1691 = vmatmul.mubr.f32.vlgmr.msra.gmra.mrb[8].mxu1 %v6874_v1 }
 0x4dc   : > { %4658 = vmatpush1.bf16.msra.mxu0 %v6493_v39  ;;  %4690 = vmatpush1.bf16.msra.mxu1 %v6496_v42 }
 0x4dd   : > { %4660 = vmatprep.subr.bf16.mxu0 %v6499_v46  ;;  %4692 = vmatprep.subr.bf16.mxu1 %v6503_v51 }
 0x4de   : > { %1799 = vmatprep.mubr.f32.mxu0 %v7712_v11  ;;  %1870 = vmatprep.mubr.f32.mxu1 %v7712_v11 }
 0x4e0   : > { %4662 = vmatpush1.bf16.msra.mxu0 %v6507_v54  ;;  %4694 = vmatpush1.bf16.msra.mxu1 %v6511_v58 }
 0x4e1   : > { %4664 = vmatprep.subr.bf16.mxu0 %v6515_v61  ;;  %4696 = vmatprep.subr.bf16.mxu1 %v6519_v0 }
 0x4e4   : > { %4666 = vmatpush1.bf16.msra.mxu0 %v6524_v4  ;;  %4698 = vmatpush1.bf16.msra.mxu1 %v6528_v7 }
 0x4e5   : > { %4668 = vmatprep.subr.bf16.mxu0 %v6532_v10  ;;  %4700 = vmatprep.subr.bf16.mxu1 %v6536_v14 }
 0x4e8   : > { %4670 = vmatpush1.bf16.msra.mxu0 %v6541_v18  ;;  %4702 = vmatpush1.bf16.msra.mxu1 %v6545_v21 }
 0x4e9   : > { %4672 = vmatprep.subr.bf16.mxu0 %v6549_v24  ;;  %4704 = vmatprep.subr.bf16.mxu1 %v6553_v27 }
 0x4ec   : > { %4674 = vmatpush1.bf16.msra.mxu0 %v6558_v31  ;;  %4706 = vmatpush1.bf16.msra.mxu1 %v6562_v36 }
 0x4ed   : > { %4676 = vmatprep.subr.bf16.mxu0 %v6566_v40  ;;  %4708 = vmatprep.subr.bf16.mxu1 %v6570_v44 }
 0x4f0   : > { %4678 = vmatpush1.bf16.msra.mxu0 %v6575_v49  ;;  %4710 = vmatpush1.bf16.msra.mxu1 %v6579_v53 }
 0x4f1   : > { %4680 = vmatprep.subr.bf16.mxu0 %v6583_v57  ;;  %4712 = vmatprep.subr.bf16.mxu1 %v6587_v62 }
 0x4f4   : > { %4682 = vmatpush1.bf16.msra.mxu0 %v6592_v3  ;;  %4714 = vmatpush1.bf16.msra.mxu1 %v6596_v8 }
 0x4f5   : > { %4684 = vmatprep.subr.bf16.mxu0 %v6600_v13  ;;  %4716 = vmatprep.subr.bf16.mxu1 %v6604_v17 }
 0x4f8   : > { %4686 = vmatpush1.bf16.msra.mxu0 %v6609_v20  ;;  %4718 = vmatpush1.bf16.msra.mxu1 %v6613_v22 }
 0x4f9   : > { %4720 = vmatprep.subr.bf16.mxu0 %v6488_v33  ;;  %4752 = vmatprep.subr.bf16.mxu1 %v6490_v34 }
 0x5ae   : > { %v1621_v47 = vpop.f32.mrb[8].mxu0  ;;  %v1692_v2 = vpop.f32.mrb[8].mxu1 }
 0x5af   : > { %v5431_v6 = vadd.f32 %v1621_v47, %v6670_v32  ;;  %v1623_v16 = vpop.f32.mrb[9].mxu0  ;;  %v1694_v12 = vpop.f32.mrb[9].mxu1  ;;  %v5447_v38 = vadd.f32 %v1692_v2, %v6680_v43 }
 0x5b0   : > { %v5432_v15 = vadd.f32 %v1623_v16, %v6675_v37  ;;  %v5448_v50 = vadd.f32 %v1694_v12, %v6687_v60 }
 0x5b1   : > { %v1701_v9 = vmul.f32 0.5, %v5431_v6 }
 0x5b2   : > { %v1705_v45 = vmul.f32 0.5, %v5432_v15  ;;  %v1710_v52 = vmul.f32 0.5, %v5448_v50  ;;  %v6917_v15 = vstv %s1721_s14  ;;  %s6151_s14 = smov [#allocation20]  }
 0x5b3   : > { %5711 = vtanh.f32 %v1701_v9  ;;  %vm1723_vm5 = vcmp.eq.s32.totalorder %v6917_v15, 1  ;;  %s4115_s26 = sshll.u32 %s6151_s14, 4  ;;  %s7590_s26 = int_to_ptr.vmem [resolvable:$true] %s4115_s26 }
 0x5b4   : > { %5713 = vtanh.f32 %v1705_v45 }
 0x5b5   : > { %5715 = vtanh.f32 %v5447_v38 }
 0x5b6   : > { %5717 = vtanh.f32 %v1710_v52 }
 0x5bd   : > { %v5712_v55 = vpop.eup %5711 }
 0x5be   : > { %v5714_v63 = vpop.eup %5713  ;;  %v1703_v47 = vadd.f32 1.0, %v5712_v55 }
 0x5bf   : > { %v1707_v48 = vadd.f32 1.0, %v5714_v63  ;;  %v5716_v16 = vpop.eup %5715 }
 0x5c0   : > { %v1704_v35 = vmul.f32 0.5, %v1703_v47  ;;  %v5718_v38 = vpop.eup %5717 }
 0x5c1   : > { %v1708_v6 = vmul.f32 0.5, %v1707_v48  ;;  %v1712_v50 = vadd.f32 1.0, %v5718_v38 }
 0x5c2   : > { %v1715_v9 = vmul.f32 %v5716_v16, %v1704_v35 }
 0x5c3   : > { %v1714_v2 = vmul.f32 %v1708_v6, %v6869_v19  ;;  %v1713_v52 = vmul.f32 0.5, %v1712_v50 }
 0x5c5   : > { %v1716_v45 = vadd.f32 %v1715_v9, %v1714_v2 }
 0x5c7   : > { %5719 = vtanh.f32 %v1716_v45  ;;  %v6924_v12 = vsel %vm1723_vm5, %v1716_v45, %v6869_v19 }
 0x5d1   : > { %v5720_v55 = vpop.eup %5719 }
 0x5d2   : > { %v1718_v63 = vmul.f32 %v5720_v55, %v1713_v52 }
 0x5d4   : > { %v6929_v35 = vsel %vm1723_vm5, %v1718_v63, %v6874_v1 }
 0x5d5   : > { %1800 = vmatmul.mubr.f32.vlgmr.msra.gmra.mrb[10].mxu0 %v6929_v35  ;;  %1871 = vmatmul.mubr.f32.vlgmr.msra.gmra.mrb[10].mxu1 %v6929_v35 }
 0x5d6   : > { %4722 = vmatpush1.bf16.msra.mxu0 %v6493_v39  ;;  %4754 = vmatpush1.bf16.msra.mxu1 %v6496_v42 }
 0x5d7   : > { %4724 = vmatprep.subr.bf16.mxu0 %v6499_v46  ;;  %4756 = vmatprep.subr.bf16.mxu1 %v6503_v51 }
 0x5d8   : > { %1979 = vmatprep.mubr.f32.mxu0 %v7712_v11  ;;  %2050 = vmatprep.mubr.f32.mxu1 %v7712_v11 }
 0x5da   : > { %4726 = vmatpush1.bf16.msra.mxu0 %v6507_v54  ;;  %4758 = vmatpush1.bf16.msra.mxu1 %v6511_v58 }
 0x5db   : > { %4728 = vmatprep.subr.bf16.mxu0 %v6515_v61  ;;  %4760 = vmatprep.subr.bf16.mxu1 %v6519_v0 }
 0x5de   : > { %4730 = vmatpush1.bf16.msra.mxu0 %v6524_v4  ;;  %4762 = vmatpush1.bf16.msra.mxu1 %v6528_v7 }
 0x5df   : > { %4732 = vmatprep.subr.bf16.mxu0 %v6532_v10  ;;  %4764 = vmatprep.subr.bf16.mxu1 %v6536_v14 }
 0x5e2   : > { %4734 = vmatpush1.bf16.msra.mxu0 %v6541_v18  ;;  %4766 = vmatpush1.bf16.msra.mxu1 %v6545_v21 }
 0x5e3   : > { %4736 = vmatprep.subr.bf16.mxu0 %v6549_v24  ;;  %4768 = vmatprep.subr.bf16.mxu1 %v6553_v27 }
 0x5e6   : > { %4738 = vmatpush1.bf16.msra.mxu0 %v6558_v31  ;;  %4770 = vmatpush1.bf16.msra.mxu1 %v6562_v36 }
 0x5e7   : > { %4740 = vmatprep.subr.bf16.mxu0 %v6566_v40  ;;  %4772 = vmatprep.subr.bf16.mxu1 %v6570_v44 }
 0x5ea   : > { %4742 = vmatpush1.bf16.msra.mxu0 %v6575_v49  ;;  %4774 = vmatpush1.bf16.msra.mxu1 %v6579_v53 }
 0x5eb   : > { %4744 = vmatprep.subr.bf16.mxu0 %v6583_v57  ;;  %4776 = vmatprep.subr.bf16.mxu1 %v6587_v62 }
 0x5ee   : > { %4746 = vmatpush1.bf16.msra.mxu0 %v6592_v3  ;;  %4778 = vmatpush1.bf16.msra.mxu1 %v6596_v8 }
 0x5ef   : > { %4748 = vmatprep.subr.bf16.mxu0 %v6600_v13  ;;  %4780 = vmatprep.subr.bf16.mxu1 %v6604_v17 }
 0x5f2   : > { %4750 = vmatpush1.bf16.msra.mxu0 %v6609_v20  ;;  %4782 = vmatpush1.bf16.msra.mxu1 %v6613_v22 }
 0x5f3   : > { %4784 = vmatprep.subr.bf16.mxu0 %v6488_v33  ;;  %4816 = vmatprep.subr.bf16.mxu1 %v6490_v34 }
 0x6a8   : > { %v1801_v48 = vpop.f32.mrb[10].mxu0  ;;  %v1872_v19 = vpop.f32.mrb[10].mxu1 }
 0x6a9   : > { %v5433_v47 = vadd.f32 %v1801_v48, %v6670_v32  ;;  %v1803_v16 = vpop.f32.mrb[11].mxu0  ;;  %v1874_v6 = vpop.f32.mrb[11].mxu1  ;;  %v5449_v38 = vadd.f32 %v1872_v19, %v6680_v43 }
 0x6aa   : > { %v5434_v9 = vadd.f32 %v1803_v16, %v6675_v37  ;;  %v5450_v33 = vadd.f32 %v1874_v6, %v6687_v60 }
 0x6ab   : > { %v1881_v2 = vmul.f32 0.5, %v5433_v47 }
 0x6ac   : > { %v1885_v45 = vmul.f32 0.5, %v5434_v9  ;;  %v1890_v34 = vmul.f32 0.5, %v5450_v33  ;;  %v6972_v9 = vstv %s1901_s20 }
 0x6ad   : > { %5721 = vtanh.f32 %v1881_v2  ;;  %vm1903_vm6 = vcmp.eq.s32.totalorder %v6972_v9, 1 }
 0x6ae   : > { %5723 = vtanh.f32 %v1885_v45 }
 0x6af   : > { %5725 = vtanh.f32 %v5449_v38 }
 0x6b0   : > { %5727 = vtanh.f32 %v1890_v34 }
 0x6b7   : > { %v5722_v50 = vpop.eup %5721 }
 0x6b8   : > { %v5724_v52 = vpop.eup %5723  ;;  %v1883_v55 = vadd.f32 1.0, %v5722_v50 }
 0x6b9   : > { %v1887_v63 = vadd.f32 1.0, %v5724_v52  ;;  %v5726_v16 = vpop.eup %5725 }
 0x6ba   : > { %v1884_v48 = vmul.f32 0.5, %v1883_v55  ;;  %v5728_v38 = vpop.eup %5727 }
 0x6bb   : > { %v1888_v47 = vmul.f32 0.5, %v1887_v63  ;;  %v1892_v33 = vadd.f32 1.0, %v5728_v38  ;;  %v2280_v63 = vld [vmem:[#allocation11] sm:$0xff]  ;;  %v2291_v38 = vld [vmem:[#allocation11 + $0x58] sm:$0xff] }
 0x6bc   : > { %v1895_v2 = vmul.f32 %v5726_v16, %v1884_v48  ;;  %v2284_v48 = vld [vmem:[#allocation11 + $0x20] sm:$0xff]  ;;  %v2282_v16 = vld [vmem:[#allocation11 + $0x10] sm:$0xff] }
 0x6bd   : > { %v1894_v19 = vmul.f32 %v1888_v47, %v6924_v12  ;;  %v1893_v34 = vmul.f32 0.5, %v1892_v33  ;;  %v2286_v47 = vld [vmem:[#allocation11 + $0x30] sm:$0xff]  ;;  %v2295_v33 = vld [vmem:[#allocation11 + $0x78] sm:$0xff] }
 0x6bf   : > { %v1896_v45 = vadd.f32 %v1895_v2, %v1894_v19  ;;  %v2289_v2 = vld [vmem:[#allocation11 + $0x48] sm:$0xff] }
 0x6c1   : > { %5729 = vtanh.f32 %v1896_v45  ;;  %v6979_v6 = vsel %vm1903_vm6, %v1896_v45, %v6924_v12  ;;  %v2293_v45 = vld [vmem:[#allocation11 + $0x68] sm:$0xff] }
 0x6cb   : > { %v5730_v50 = vpop.eup %5729 }
 0x6cc   : > { %v1898_v52 = vmul.f32 %v5730_v50, %v1893_v34 }
 0x6ce   : > { %v6984_v55 = vsel %vm1903_vm6, %v1898_v52, %v6929_v35  ;;  %v4849_v52 = vpack.c.bf16 %v2284_v48, %v2280_v63  ;;  %v2306_v63 = vld [vmem:[#allocation11 + $0xd0] sm:$0xff] }
 0x6cf   : > { %1980 = vmatmul.mubr.f32.vlgmr.msra.gmra.mrb[12].mxu0 %v6984_v55  ;;  %2051 = vmatmul.mubr.f32.vlgmr.msra.gmra.mrb[12].mxu1 %v6984_v55  ;;  %v2310_v48 = vld [vmem:[#allocation11 + $0xf0] sm:$0xff] }
 0x6d0   : > { %4786 = vmatpush1.bf16.msra.mxu0 %v6493_v39  ;;  %4818 = vmatpush1.bf16.msra.mxu1 %v6496_v42  ;;  %v2281_v39 = vld [vmem:[#allocation11 + $0x8] sm:$0xff] }
 0x6d1   : > { %4788 = vmatprep.subr.bf16.mxu0 %v6499_v46  ;;  %4820 = vmatprep.subr.bf16.mxu1 %v6503_v51  ;;  %v2285_v42 = vld [vmem:[#allocation11 + $0x28] sm:$0xff]  ;;  %v2283_v46 = vld [vmem:[#allocation11 + $0x18] sm:$0xff] }
 0x6d2   : > { %2159 = vmatprep.mubr.f32.mxu0 %v7712_v11  ;;  %2230 = vmatprep.mubr.f32.mxu1 %v7712_v11  ;;  %v4847_v51 = vpack.c.bf16 %v2285_v42, %v2281_v39  ;;  %v4881_v39 = vpack.c.bf16 %v2286_v47, %v2282_v16  ;;  %v2288_v42 = vld [vmem:[#allocation11 + $0x40] sm:$0xff]  ;;  %v2313_v16 = vld [vmem:[#allocation11 + $0x108] sm:$0xff] }
 0x6d3   : > { %v2317_v47 = vld [vmem:[#allocation11 + $0x128] sm:$0xff] }
 0x6d4   : > { %4790 = vmatpush1.bf16.msra.mxu0 %v6507_v54  ;;  %4822 = vmatpush1.bf16.msra.mxu1 %v6511_v58  ;;  %v2287_v54 = vld [vmem:[#allocation11 + $0x38] sm:$0xff] }
 0x6d5   : > { %4792 = vmatprep.subr.bf16.mxu0 %v6515_v61  ;;  %4824 = vmatprep.subr.bf16.mxu1 %v6519_v0  ;;  %v4879_v58 = vpack.c.bf16 %v2287_v54, %v2283_v46  ;;  %v2292_v46 = vld [vmem:[#allocation11 + $0x60] sm:$0xff]  ;;  %v2290_v54 = vld [vmem:[#allocation11 + $0x50] sm:$0xff] }
 0x6d8   : > { %4794 = vmatpush1.bf16.msra.mxu0 %v6524_v4  ;;  %4826 = vmatpush1.bf16.msra.mxu1 %v6528_v7 }
 0x6d9   : > { %4796 = vmatprep.subr.bf16.mxu0 %v6532_v10  ;;  %4828 = vmatprep.subr.bf16.mxu1 %v6536_v14 }
 0x6dc   : > { %4798 = vmatpush1.bf16.msra.mxu0 %v6541_v18  ;;  %4830 = vmatpush1.bf16.msra.mxu1 %v6545_v21 }
 0x6dd   : > { %4800 = vmatprep.subr.bf16.mxu0 %v6549_v24  ;;  %4832 = vmatprep.subr.bf16.mxu1 %v6553_v27 }
 0x6e0   : > { %4802 = vmatpush1.bf16.msra.mxu0 %v6558_v31  ;;  %4834 = vmatpush1.bf16.msra.mxu1 %v6562_v36 }
 0x6e1   : > { %4804 = vmatprep.subr.bf16.mxu0 %v6566_v40  ;;  %4836 = vmatprep.subr.bf16.mxu1 %v6570_v44 }
 0x6e4   : > { %4806 = vmatpush1.bf16.msra.mxu0 %v6575_v49  ;;  %4838 = vmatpush1.bf16.msra.mxu1 %v6579_v53 }
 0x6e5   : > { %4808 = vmatprep.subr.bf16.mxu0 %v6583_v57  ;;  %4840 = vmatprep.subr.bf16.mxu1 %v6587_v62 }
 0x6e8   : > { %4810 = vmatpush1.bf16.msra.mxu0 %v6592_v3  ;;  %4842 = vmatpush1.bf16.msra.mxu1 %v6596_v8  ;;  %v7025_v3 = vstv %s2081_s23  ;;  %s7585_s23 = scalar_lea.hbm %s7700_s7, %s4318_s17 }
 0x6e9   : > { %4812 = vmatprep.subr.bf16.mxu0 %v6600_v13  ;;  %4844 = vmatprep.subr.bf16.mxu1 %v6604_v17  ;;  %vm2083_vm7 = vcmp.eq.s32.totalorder %v7025_v3, 1 }
 0x6ec   : > { %4814 = vmatpush1.bf16.msra.mxu0 %v6609_v20  ;;  %4846 = vmatpush1.bf16.msra.mxu1 %v6613_v22 }
 0x6ed   : > { %4848 = vmatprep.subr.bf16.mxu0 %v4847_v51  ;;  %4880 = vmatprep.subr.bf16.mxu1 %v4879_v58  ;;  %v4851_v51 = vpack.c.bf16 %v2293_v45, %v2289_v2  ;;  %v2294_v58 = vld [vmem:[#allocation11 + $0x70] sm:$0xff]  ;;  %v2315_v2 = vld [vmem:[#allocation11 + $0x118] sm:$0xff] }
 0x7a2   : > { %v1981_v61 = vpop.f32.mrb[12].mxu0  ;;  %v2052_v0 = vpop.f32.mrb[12].mxu1 }
 0x7a3   : > { %v5435_v4 = vadd.f32 %v1981_v61, %v6670_v32  ;;  %v1983_v7 = vpop.f32.mrb[13].mxu0  ;;  %v2054_v10 = vpop.f32.mrb[13].mxu1  ;;  %v5451_v24 = vadd.f32 %v2052_v0, %v6680_v43  ;;  %v2297_v61 = vld [vmem:[#allocation11 + $0x88] sm:$0xff] }
 0x7a4   : > { %v5436_v14 = vadd.f32 %v1983_v7, %v6675_v37  ;;  %v5452_v27 = vadd.f32 %v2054_v10, %v6687_v60  ;;  %v2299_v7 = vld [vmem:[#allocation11 + $0x98] sm:$0xff] }
 0x7a5   : > { %v2061_v18 = vmul.f32 0.5, %v5435_v4  ;;  %v2301_v4 = vld [vmem:[#allocation11 + $0xa8] sm:$0xff]  ;;  %v2303_v10 = vld [vmem:[#allocation11 + $0xb8] sm:$0xff] }
 0x7a6   : > { %v2065_v21 = vmul.f32 0.5, %v5436_v14  ;;  %v2070_v31 = vmul.f32 0.5, %v5452_v27  ;;  %v4853_v14 = vpack.c.bf16 %v2292_v46, %v2288_v42  ;;  %v4855_v27 = vpack.c.bf16 %v2301_v4, %v2297_v61  ;;  %v2318_v42 = vld [vmem:[#allocation11 + $0x130] sm:$0xff]  ;;  %v2321_v46 = vld [vmem:[#allocation11 + $0x148] sm:$0xff]  ;;  %v2320_v4 = vld [vmem:[#allocation11 + $0x140] sm:$0xff] }
 0x7a7   : > { %5731 = vtanh.f32 %v2061_v18  ;;  %v4885_v18 = vpack.c.bf16 %v2294_v58, %v2290_v54  ;;  %v2327_v54 = vld [vmem:[#allocation11 + $0x178] sm:$0xff] }
 0x7a8   : > { %5733 = vtanh.f32 %v2065_v21  ;;  %v2296_v21 = vld [vmem:[#allocation11 + $0x80] sm:$0xff] }
 0x7a9   : > { %5735 = vtanh.f32 %v5451_v24  ;;  %v2300_v24 = vld [vmem:[#allocation11 + $0xa0] sm:$0xff] }
 0x7aa   : > { %5737 = vtanh.f32 %v2070_v31  ;;  %v4887_v31 = vpack.c.bf16 %v2303_v10, %v2299_v7  ;;  %v2324_v7 = vld [vmem:[#allocation11 + $0x160] sm:$0xff] }
 0x7b1   : > { %v5732_v36 = vpop.eup %5731 }
 0x7b2   : > { %v5734_v40 = vpop.eup %5733  ;;  %v2063_v44 = vadd.f32 1.0, %v5732_v36  ;;  %v2298_v36 = vld [vmem:[#allocation11 + $0x90] sm:$0xff] }
 0x7b3   : > { %v2067_v49 = vadd.f32 1.0, %v5734_v40  ;;  %v5736_v57 = vpop.eup %5735  ;;  %v2302_v40 = vld [vmem:[#allocation11 + $0xb0] sm:$0xff] }
 0x7b4   : > { %v2064_v53 = vmul.f32 0.5, %v2063_v44  ;;  %v5738_v22 = vpop.eup %5737  ;;  %v2305_v44 = vld [vmem:[#allocation11 + $0xc8] sm:$0xff] }
 0x7b5   : > { %v2068_v62 = vmul.f32 0.5, %v2067_v49  ;;  %v2072_v12 = vadd.f32 1.0, %v5738_v22  ;;  %v2309_v49 = vld [vmem:[#allocation11 + $0xe8] sm:$0xff] }
 0x7b6   : > { %v2075_v8 = vmul.f32 %v5736_v57, %v2064_v53  ;;  %v2307_v53 = vld [vmem:[#allocation11 + $0xd8] sm:$0xff]  ;;  %v4859_v22 = vpack.c.bf16 %v2309_v49, %v2305_v44  ;;  %v2328_v49 = vld [vmem:[#allocation11 + $0x180] sm:$0xff] }
 0x7b7   : > { %v2074_v13 = vmul.f32 %v2068_v62, %v6979_v6  ;;  %v2073_v19 = vmul.f32 0.5, %v2072_v12  ;;  %v2311_v57 = vld [vmem:[#allocation11 + $0xf8] sm:$0xff]  ;;  %v4857_v62 = vpack.c.bf16 %v2300_v24, %v2296_v21  ;;  %v2326_v21 = vld [vmem:[#allocation11 + $0x170] sm:$0xff]  ;;  %v2329_v24 = vld [vmem:[#allocation11 + $0x188] sm:$0xff] }
 0x7b8   : > { %v4891_v12 = vpack.c.bf16 %v2311_v57, %v2307_v53  ;;  %v2332_v53 = vld [vmem:[#allocation11 + $0x1a0] sm:$0xff] }
 0x7b9   : > { %v2076_v17 = vadd.f32 %v2075_v8, %v2074_v13  ;;  %v4889_v8 = vpack.c.bf16 %v2302_v40, %v2298_v36  ;;  %v2304_v13 = vld [vmem:[#allocation11 + $0xc0] sm:$0xff]  ;;  %v2335_v36 = vld [vmem:[#allocation11 + $0x1b8] sm:$0xff]  ;;  %v4869_v40 = vpack.c.bf16 %v2324_v7, %v2320_v4 }
 0x7ba   : > { %v2641_v7 = vld [vmem:[#allocation12 + $0x278] sm:$0xff] }
 0x7bb   : > { %5739 = vtanh.f32 %v2076_v17  ;;  %v7032_v20 = vsel %vm2083_vm7, %v2076_v17, %v6979_v6  ;;  %v4883_v6 = vpack.c.bf16 %v2295_v33, %v2291_v38  ;;  %v2308_v17 = vld [vmem:[#allocation11 + $0xe0] sm:$0xff]  ;;  %v4893_v38 = vpack.c.bf16 %v2310_v48, %v2306_v63  ;;  %v2343_v63 = vld [vmem:[#allocation11 + $0x1f8] sm:$0xff] }
 0x7bc   : > { %v4861_v45 = vpack.c.bf16 %v2308_v17, %v2304_v13  ;;  %v2312_v33 = vld [vmem:[#allocation11 + $0x100] sm:$0xff]  ;;  %v2334_v13 = vld [vmem:[#allocation11 + $0x1b0] sm:$0xff]  ;;  %v2337_v17 = vld [vmem:[#allocation11 + $0x1c8] sm:$0xff]  ;;  %v4873_v48 = vpack.c.bf16 %v2332_v53, %v2328_v49 }
 0x7bd   : > { %v2649_v53 = vld [vmem:[#allocation12 + $0x2b8] sm:$0xff] }
 0x7c5   : > { %v5740_v34 = vpop.eup %5739 }
 0x7c6   : > { %v2078_v50 = vmul.f32 %v5740_v34, %v2073_v19  ;;  %v2319_v19 = vld [vmem:[#allocation11 + $0x138] sm:$0xff]  ;;  %v2316_v34 = vld [vmem:[#allocation11 + $0x120] sm:$0xff] }
 0x7c7   : > { %v4865_v58 = vpack.c.bf16 %v2316_v34, %v2312_v33  ;;  %v2342_v33 = vld [vmem:[#allocation11 + $0x1f0] sm:$0xff] }
 0x7c8   : > { %v7037_v0 = vsel %vm2083_vm7, %v2078_v50, %v6984_v55  ;;  %v4863_v50 = vpack.c.bf16 %v2317_v47, %v2313_v16  ;;  %v2336_v47 = vld [vmem:[#allocation11 + $0x1c0] sm:$0xff] }
 0x7c9   : > { %2160 = vmatmul.mubr.f32.vlgmr.msra.gmra.mrb[14].mxu0 %v7037_v0  ;;  %2231 = vmatmul.mubr.f32.vlgmr.msra.gmra.mrb[14].mxu1 %v7037_v0 }
 0x7ca   : > { %4850 = vmatpush1.bf16.msra.mxu0 %v4849_v52  ;;  %4882 = vmatpush1.bf16.msra.mxu1 %v4881_v39  ;;  %v4895_v52 = vpack.c.bf16 %v2319_v19, %v2315_v2  ;;  %v2314_v39 = vld [vmem:[#allocation11 + $0x110] sm:$0xff] }
 0x7cb   : > { %4852 = vmatprep.subr.bf16.mxu0 %v4851_v51  ;;  %4884 = vmatprep.subr.bf16.mxu1 %v4883_v6  ;;  %v2325_v51 = vld [vmem:[#allocation11 + $0x168] sm:$0xff]  ;;  %v2323_v6 = vld [vmem:[#allocation11 + $0x158] sm:$0xff]  ;;  %v4897_v61 = vpack.c.bf16 %v2318_v42, %v2314_v39 }
 0x7cc   : > { %2431 = vmatprep.mubr.f32.mxu0 %v7712_v11  ;;  %2544 = vmatprep.mubr.f32.mxu1 %v7712_v11  ;;  %v4867_v10 = vpack.c.bf16 %v2325_v51, %v2321_v46  ;;  %v2628_v46 = vld [vmem:[#allocation12 + $0x210] sm:$0xff] }
 0x7cd   : > { %v2632_v51 = vld [vmem:[#allocation12 + $0x230] sm:$0xff] }
 0x7ce   : > { %4854 = vmatpush1.bf16.msra.mxu0 %v4853_v14  ;;  %4886 = vmatpush1.bf16.msra.mxu1 %v4885_v18  ;;  %v4899_v14 = vpack.c.bf16 %v2327_v54, %v2323_v6  ;;  %v2322_v18 = vld [vmem:[#allocation11 + $0x150] sm:$0xff]  ;;  %v7078_v6 = vpack.c.bf16 %v2632_v51, %v2628_v46  ;;  %v2635_v54 = vld [vmem:[#allocation12 + $0x248] sm:$0xff]  ;;  %v2658_v46 = vld [vmem:[#allocation12 + $0x300] sm:$0xff] }
 0x7cf   : > { %4856 = vmatprep.subr.bf16.mxu0 %v4855_v27  ;;  %4888 = vmatprep.subr.bf16.mxu1 %v4887_v31  ;;  %v2333_v27 = vld [vmem:[#allocation11 + $0x1a8] sm:$0xff]  ;;  %v2331_v31 = vld [vmem:[#allocation11 + $0x198] sm:$0xff]  ;;  %v4901_v44 = vpack.c.bf16 %v2326_v21, %v2322_v18  ;;  %v2662_v51 = vld [vmem:[#allocation12 + $0x320] sm:$0xff] }
 0x7d0   : > { %v4871_v57 = vpack.c.bf16 %v2333_v27, %v2329_v24  ;;  %v2636_v24 = vld [vmem:[#allocation12 + $0x250] sm:$0xff] }
 0x7d1   : > { %v2640_v27 = vld [vmem:[#allocation12 + $0x270] sm:$0xff] }
 0x7d2   : > { %4858 = vmatpush1.bf16.msra.mxu0 %v4857_v62  ;;  %4890 = vmatpush1.bf16.msra.mxu1 %v4889_v8  ;;  %v4903_v62 = vpack.c.bf16 %v2335_v36, %v2331_v31  ;;  %v2330_v8 = vld [vmem:[#allocation11 + $0x190] sm:$0xff]  ;;  %v7090_v31 = vpack.c.bf16 %v2640_v27, %v2636_v24  ;;  %v2643_v36 = vld [vmem:[#allocation12 + $0x288] sm:$0xff]  ;;  %v2669_v27 = vld [vmem:[#allocation12 + $0x358] sm:$0xff] }
 0x7d3   : > { %4860 = vmatprep.subr.bf16.mxu0 %v4859_v22  ;;  %4892 = vmatprep.subr.bf16.mxu1 %v4891_v12  ;;  %v2341_v22 = vld [vmem:[#allocation11 + $0x1e8] sm:$0xff]  ;;  %v2339_v12 = vld [vmem:[#allocation11 + $0x1d8] sm:$0xff]  ;;  %v4905_v16 = vpack.c.bf16 %v2334_v13, %v2330_v8 }
 0x7d4   : > { %v4875_v2 = vpack.c.bf16 %v2341_v22, %v2337_v17  ;;  %v4907_v19 = vpack.c.bf16 %v2343_v63, %v2339_v12  ;;  %v2644_v17 = vld [vmem:[#allocation12 + $0x290] sm:$0xff]  ;;  %v2651_v63 = vld [vmem:[#allocation12 + $0x2c8] sm:$0xff] }
 0x7d5   : > { %v2648_v22 = vld [vmem:[#allocation12 + $0x2b0] sm:$0xff]  ;;  %v2671_v24 = vld [vmem:[#allocation12 + $0x368] sm:$0xff] }
 0x7d6   : > { %4862 = vmatpush1.bf16.msra.mxu0 %v4861_v45  ;;  %4894 = vmatpush1.bf16.msra.mxu1 %v4893_v38  ;;  %v2340_v45 = vld [vmem:[#allocation11 + $0x1e0] sm:$0xff]  ;;  %v2338_v38 = vld [vmem:[#allocation11 + $0x1d0] sm:$0xff]  ;;  %v7102_v12 = vpack.c.bf16 %v2648_v22, %v2644_v17 }
 0x7d7   : > { %4864 = vmatprep.subr.bf16.mxu0 %v4863_v50  ;;  %4896 = vmatprep.subr.bf16.mxu1 %v4895_v52  ;;  %v4877_v34 = vpack.c.bf16 %v2340_v45, %v2336_v47  ;;  %v4909_v50 = vpack.c.bf16 %v2342_v33, %v2338_v38  ;;  %v2626_v52 = vld [vmem:[#allocation12 + $0x200] sm:$0xff]  ;;  %v2668_v17 = vld [vmem:[#allocation12 + $0x350] sm:$0xff] }
 0x7d8   : > { %v2654_v45 = vld [vmem:[#allocation12 + $0x2e0] sm:$0xff]  ;;  %v2672_v22 = vld [vmem:[#allocation12 + $0x370] sm:$0xff] }
 0x7da   : > { %4866 = vmatpush1.bf16.msra.mxu0 %v4865_v58  ;;  %4898 = vmatpush1.bf16.msra.mxu1 %v4897_v61  ;;  %v2639_v58 = vld [vmem:[#allocation12 + $0x268] sm:$0xff]  ;;  %v2637_v61 = vld [vmem:[#allocation12 + $0x258] sm:$0xff] }
 0x7db   : > { %4868 = vmatprep.subr.bf16.mxu0 %v4867_v10  ;;  %4900 = vmatprep.subr.bf16.mxu1 %v4899_v14  ;;  %v7083_v4 = vpack.c.bf16 %v2639_v58, %v2635_v54  ;;  %v2634_v10 = vld [vmem:[#allocation12 + $0x240] sm:$0xff]  ;;  %v7085_v18 = vpack.c.bf16 %v2641_v7, %v2637_v61  ;;  %v7123_v58 = vpack.c.bf16 %v2662_v51, %v2658_v46  ;;  %v2660_v61 = vld [vmem:[#allocation12 + $0x310] sm:$0xff]  ;;  %v2683_v51 = vld [vmem:[#allocation12 + $0x3c8] sm:$0xff] }
 0x7dc   : > { %v2638_v14 = vld [vmem:[#allocation12 + $0x260] sm:$0xff]  ;;  %v2664_v7 = vld [vmem:[#allocation12 + $0x330] sm:$0xff] }
 0x7dd   : > { %v7087_v21 = vpack.c.bf16 %v2638_v14, %v2634_v10  ;;  %v7126_v10 = vpack.c.bf16 %v2664_v7, %v2660_v61  ;;  %v2667_v14 = vld [vmem:[#allocation12 + $0x348] sm:$0xff]  ;;  %v2685_v7 = vld [vmem:[#allocation12 + $0x3d8] sm:$0xff] }
 0x7de   : > { %4870 = vmatpush1.bf16.msra.mxu0 %v4869_v40  ;;  %4902 = vmatpush1.bf16.msra.mxu1 %v4901_v44  ;;  %v2647_v40 = vld [vmem:[#allocation12 + $0x2a8] sm:$0xff]  ;;  %v2645_v44 = vld [vmem:[#allocation12 + $0x298] sm:$0xff] }
 0x7df   : > { %4872 = vmatprep.subr.bf16.mxu0 %v4871_v57  ;;  %4904 = vmatprep.subr.bf16.mxu1 %v4903_v62  ;;  %v7095_v49 = vpack.c.bf16 %v2647_v40, %v2643_v36  ;;  %v2642_v57 = vld [vmem:[#allocation12 + $0x280] sm:$0xff]  ;;  %v7097_v8 = vpack.c.bf16 %v2649_v53, %v2645_v44  ;;  %v7131_v36 = vpack.c.bf16 %v2671_v24, %v2667_v14  ;;  %v2673_v40 = vld [vmem:[#allocation12 + $0x378] sm:$0xff]  ;;  %v2687_v61 = vld [vmem:[#allocation12 + $0x3e8] sm:$0xff] }
 0x7e0   : > { %v2646_v62 = vld [vmem:[#allocation12 + $0x2a0] sm:$0xff]  ;;  %v7155_v14 = vpack.c.bf16 %v2687_v61, %v2683_v51  ;;  %v2689_v24 = vld [vmem:[#allocation12 + $0x3f8] sm:$0xff] }
 0x7e1   : > { %v7099_v13 = vpack.c.bf16 %v2646_v62, %v2642_v57  ;;  %v2666_v44 = vld [vmem:[#allocation12 + $0x340] sm:$0xff]  ;;  %v7133_v57 = vpack.c.bf16 %v2673_v40, %v2669_v27 }
 0x7e2   : > { %4874 = vmatpush1.bf16.msra.mxu0 %v4873_v48  ;;  %4906 = vmatpush1.bf16.msra.mxu1 %v4905_v16  ;;  %v2655_v48 = vld [vmem:[#allocation12 + $0x2e8] sm:$0xff]  ;;  %v2653_v16 = vld [vmem:[#allocation12 + $0x2d8] sm:$0xff]  ;;  %v2670_v53 = vld [vmem:[#allocation12 + $0x360] sm:$0xff] }
 0x7e3   : > { %4876 = vmatprep.subr.bf16.mxu0 %v4875_v2  ;;  %4908 = vmatprep.subr.bf16.mxu1 %v4907_v19  ;;  %v7107_v47 = vpack.c.bf16 %v2655_v48, %v2651_v63  ;;  %v2657_v2 = vld [vmem:[#allocation12 + $0x2f8] sm:$0xff]  ;;  %v2650_v19 = vld [vmem:[#allocation12 + $0x2c0] sm:$0xff]  ;;  %v7135_v62 = vpack.c.bf16 %v2670_v53, %v2666_v44  ;;  %v7138_v63 = vpack.c.bf16 %v2672_v22, %v2668_v17  ;;  %v2675_v48 = vld [vmem:[#allocation12 + $0x388] sm:$0xff] }
 0x7e4   : > { %v7109_v38 = vpack.c.bf16 %v2657_v2, %v2653_v16  ;;  %v7111_v33 = vpack.c.bf16 %v2654_v45, %v2650_v19  ;;  %v2679_v16 = vld [vmem:[#allocation12 + $0x3a8] sm:$0xff]  ;;  %v2677_v2 = vld [vmem:[#allocation12 + $0x398] sm:$0xff]  ;;  %v2682_v27 = vld [vmem:[#allocation12 + $0x3c0] sm:$0xff]  ;;  %v7157_v44 = vpack.c.bf16 %v2689_v24, %v2685_v7 }
 0x7e5   : > { %v7143_v19 = vpack.c.bf16 %v2679_v16, %v2675_v48  ;;  %v2681_v45 = vld [vmem:[#allocation12 + $0x3b8] sm:$0xff]  ;;  %v2686_v40 = vld [vmem:[#allocation12 + $0x3e0] sm:$0xff]  ;;  %v2684_v17 = vld [vmem:[#allocation12 + $0x3d0] sm:$0xff] }
 0x7e6   : > { %4878 = vmatpush1.bf16.msra.mxu0 %v4877_v34  ;;  %4910 = vmatpush1.bf16.msra.mxu1 %v4909_v50  ;;  %v2652_v34 = vld [vmem:[#allocation12 + $0x2d0] sm:$0xff]  ;;  %v7159_v53 = vpack.c.bf16 %v2686_v40, %v2682_v27 }
 0x7e7   : > { %v2656_v50 = vld [vmem:[#allocation12 + $0x2f0] sm:$0xff] }
 0x7e8   : > { %v2688_v22 = vld [vmem:[#allocation12 + $0x3f0] sm:$0xff] }
 0x7e9   : > { %2432 = vmatmul.mubr.f32.vlgmr.msra.gmra.mrb[16].mxu0 %v6707_v59  ;;  %2545 = vmatmul.mubr.f32.vlgmr.msra.gmra.mrb[16].mxu1 %v6707_v59  ;;  %v2627_v59 = vld [vmem:[#allocation12 + $0x208] sm:$0xff]  ;;  %v7162_v48 = vpack.c.bf16 %v2688_v22, %v2684_v17 }
 0x7ea   : > { %2437 = vmatprep.mubr.f32.mxu0 %v7712_v11  ;;  %2550 = vmatprep.mubr.f32.mxu1 %v7712_v11 }
 0x7ed   : > { %2438 = vmatmul.mubr.f32.gmra.mrb[18].mxu0 %v6764_v29  ;;  %2551 = vmatmul.mubr.f32.gmra.mrb[18].mxu1 %v6764_v29  ;;  %v2631_v29 = vld [vmem:[#allocation12 + $0x228] sm:$0xff] }
 0x7ee   : > { %2443 = vmatprep.mubr.f32.mxu0 %v7712_v11  ;;  %2556 = vmatprep.mubr.f32.mxu1 %v7712_v11 }
 0x7f1   : > { %2444 = vmatmul.mubr.f32.gmra.mrb[20].mxu0 %v6819_v5  ;;  %2557 = vmatmul.mubr.f32.gmra.mrb[20].mxu1 %v6819_v5  ;;  %v2629_v5 = vld [vmem:[#allocation12 + $0x218] sm:$0xff] }
 0x7f2   : > { %2449 = vmatprep.mubr.f32.mxu0 %v7712_v11  ;;  %2562 = vmatprep.mubr.f32.mxu1 %v7712_v11 }
 0x7f5   : > { %2450 = vmatmul.mubr.f32.gmra.mrb[22].mxu0 %v6874_v1  ;;  %2563 = vmatmul.mubr.f32.gmra.mrb[22].mxu1 %v6874_v1  ;;  %v7071_v1 = vpack.c.bf16 %v2631_v29, %v2627_v59  ;;  %v7114_v59 = vpack.c.bf16 %v2656_v50, %v2652_v34  ;;  %v2659_v29 = vld [vmem:[#allocation12 + $0x308] sm:$0xff]  ;;  %v2674_v34 = vld [vmem:[#allocation12 + $0x380] sm:$0xff] }
 0x7f6   : > { %2455 = vmatprep.mubr.f32.mxu0 %v7712_v11  ;;  %2568 = vmatprep.mubr.f32.mxu1 %v7712_v11  ;;  %v2678_v50 = vld [vmem:[#allocation12 + $0x3a0] sm:$0xff] }
 0x7f7   : > { %4912 = vmatprep.subr.bf16.mxu0 %v7071_v1 }
 0x7f9   : > { %2456 = vmatmul.mubr.f32.gmra.mrb[24].mxu0 %v6929_v35  ;;  %2569 = vmatmul.mubr.f32.gmra.mrb[24].mxu1 %v6929_v35  ;;  %v2633_v35 = vld [vmem:[#allocation12 + $0x238] sm:$0xff] }
 0x7fa   : > { %2461 = vmatprep.mubr.f32.mxu0 %v7712_v11  ;;  %2574 = vmatprep.mubr.f32.mxu1 %v7712_v11  ;;  %v7073_v39 = vpack.c.bf16 %v2633_v35, %v2629_v5  ;;  %v2663_v5 = vld [vmem:[#allocation12 + $0x328] sm:$0xff]  ;;  %v2661_v35 = vld [vmem:[#allocation12 + $0x318] sm:$0xff] }
 0x7fc   : > { %4944 = vmatprep.subr.bf16.mxu1 %v7073_v39 }
 0x7fd   : > { %2462 = vmatmul.mubr.f32.gmra.mrb[26].mxu0 %v6984_v55  ;;  %2575 = vmatmul.mubr.f32.gmra.mrb[26].mxu1 %v6984_v55  ;;  %v2630_v55 = vld [vmem:[#allocation12 + $0x220] sm:$0xff] }
 0x7fe   : > { %2467 = vmatprep.mubr.f32.mxu0 %v7712_v11  ;;  %2580 = vmatprep.mubr.f32.mxu1 %v7712_v11  ;;  %v7075_v42 = vpack.c.bf16 %v2630_v55, %v2626_v52  ;;  %v7119_v52 = vpack.c.bf16 %v2663_v5, %v2659_v29  ;;  %v2665_v55 = vld [vmem:[#allocation12 + $0x338] sm:$0xff]  ;;  %v7145_v29 = vpack.c.bf16 %v2681_v45, %v2677_v2 }
 0x7ff   : > { %4946 = vmatpush1.bf16.msra.mxu1 %v7078_v6  ;;  %v7121_v54 = vpack.c.bf16 %v2665_v55, %v2661_v35  ;;  %v7147_v5 = vpack.c.bf16 %v2678_v50, %v2674_v34  ;;  %v2676_v35 = vld [vmem:[#allocation12 + $0x390] sm:$0xff] }
 0x800   : > { %4914 = vmatpush1.bf16.msra.mxu0 %v7075_v42  ;;  %4948 = vmatprep.subr.bf16.mxu1 %v7085_v18  ;;  %v2680_v55 = vld [vmem:[#allocation12 + $0x3b0] sm:$0xff] }
 0x801   : > { %2468 = vmatmul.mubr.f32.gmra.mrb[28].mxu0 %v7037_v0  ;;  %2581 = vmatmul.mubr.f32.gmra.mrb[28].mxu1 %v7037_v0  ;;  %v7150_v46 = vpack.c.bf16 %v2680_v55, %v2676_v35 }
 0x802   : > { %2473 = vmatprep.mubr.f32.mxu0 %v7712_v11  ;;  %2586 = vmatprep.mubr.f32.mxu1 %v7712_v11 }
 0x803   : > { %4916 = vmatprep.subr.bf16.mxu0 %v7083_v4  ;;  %4950 = vmatpush1.bf16.msra.mxu1 %v7090_v31 }
 0x804   : > { %4918 = vmatpush1.bf16.msra.mxu0 %v7087_v21  ;;  %4952 = vmatprep.subr.bf16.mxu1 %v7097_v8 }
 0x805   : > { %4920 = vmatprep.subr.bf16.mxu0 %v7095_v49 }
 0x807   : > { %4954 = vmatpush1.bf16.msra.mxu1 %v7102_v12 }
 0x808   : > { %4922 = vmatpush1.bf16.msra.mxu0 %v7099_v13  ;;  %4956 = vmatprep.subr.bf16.mxu1 %v7109_v38 }
 0x809   : > { %4924 = vmatprep.subr.bf16.mxu0 %v7107_v47 }
 0x80b   : > { %4958 = vmatpush1.bf16.msra.mxu1 %v7114_v59 }
 0x80c   : > { %4926 = vmatpush1.bf16.msra.mxu0 %v7111_v33  ;;  %4960 = vmatprep.subr.bf16.mxu1 %v7121_v54 }
 0x80d   : > { %4928 = vmatprep.subr.bf16.mxu0 %v7119_v52 }
 0x80f   : > { %4962 = vmatpush1.bf16.msra.mxu1 %v7126_v10 }
 0x810   : > { %4930 = vmatpush1.bf16.msra.mxu0 %v7123_v58  ;;  %4964 = vmatprep.subr.bf16.mxu1 %v7133_v57 }
 0x811   : > { %4932 = vmatprep.subr.bf16.mxu0 %v7131_v36 }
 0x813   : > { %4966 = vmatpush1.bf16.msra.mxu1 %v7138_v63 }
 0x814   : > { %4934 = vmatpush1.bf16.msra.mxu0 %v7135_v62  ;;  %4968 = vmatprep.subr.bf16.mxu1 %v7145_v29 }
 0x815   : > { %4936 = vmatprep.subr.bf16.mxu0 %v7143_v19 }
 0x817   : > { %4970 = vmatpush1.bf16.msra.mxu1 %v7150_v46 }
 0x818   : > { %4938 = vmatpush1.bf16.msra.mxu0 %v7147_v5  ;;  %4972 = vmatprep.subr.bf16.mxu1 %v7157_v44 }
 0x819   : > { %4940 = vmatprep.subr.bf16.mxu0 %v7155_v14 }
 0x81b   : > { %4974 = vmatpush1.bf16.msra.mxu1 %v7162_v48 }
 0x81c   : > { %4942 = vmatpush1.bf16.msra.mxu0 %v7159_v53  ;;  %5008 = vmatprep.subr.bf16.mxu1 %v7073_v39 }
 0x81d   : > { %4976 = vmatprep.subr.bf16.mxu0 %v7071_v1 }
 0x89c   : > { %v2161_v16 = vpop.f32.mrb[14].mxu0  ;;  %v2232_v2 = vpop.f32.mrb[14].mxu1 }
 0x89d   : > { %v5437_v45 = vadd.f32 %v2161_v16, %v6670_v32  ;;  %v2163_v34 = vpop.f32.mrb[15].mxu0  ;;  %v2234_v50 = vpop.f32.mrb[15].mxu1  ;;  %v5453_v61 = vadd.f32 %v2232_v2, %v6680_v43 }
 0x89e   : > { %v5438_v35 = vadd.f32 %v2163_v34, %v6675_v37  ;;  %v5454_v7 = vadd.f32 %v2234_v50, %v6687_v60 }
 0x89f   : > { %v2241_v55 = vmul.f32 0.5, %v5437_v45  ;;  %v7174_v45 = vstv %s2261_s18 }
 0x8a0   : > { %v2245_v51 = vmul.f32 0.5, %v5438_v35  ;;  %v2250_v24 = vmul.f32 0.5, %v5454_v7  ;;  %vm2263_vm8 = vcmp.eq.s32.totalorder %v7174_v45, 1 }
 0x8a1   : > { %5741 = vtanh.f32 %v2241_v55 }
 0x8a2   : > { %5743 = vtanh.f32 %v2245_v51 }
 0x8a3   : > { %5745 = vtanh.f32 %v5453_v61 }
 0x8a4   : > { %5747 = vtanh.f32 %v2250_v24 }
 0x8ab   : > { %v5742_v27 = vpop.eup %5741 }
 0x8ac   : > { %v5744_v40 = vpop.eup %5743  ;;  %v2243_v32 = vadd.f32 1.0, %v5742_v27 }
 0x8ad   : > { %v2247_v17 = vadd.f32 1.0, %v5744_v40  ;;  %v5746_v37 = vpop.eup %5745 }
 0x8ae   : > { %v2244_v22 = vmul.f32 0.5, %v2243_v32  ;;  %v5748_v50 = vpop.eup %5747 }
 0x8af   : > { %v2248_v16 = vmul.f32 0.5, %v2247_v17  ;;  %v2252_v35 = vadd.f32 1.0, %v5748_v50 }
 0x8b0   : > { %v2255_v34 = vmul.f32 %v5746_v37, %v2244_v22  ;;  %v7737_v22 = vsub.s32 2, %v6664_v26 }
 0x8b1   : > { %v2254_v43 = vmul.f32 %v2248_v16, %v7032_v20  ;;  %v2253_v55 = vmul.f32 0.5, %v2252_v35 }
 0x8b3   : > { %v2256_v2 = vadd.f32 %v2255_v34, %v2254_v43 }
 0x8b5   : > { %5749 = vtanh.f32 %v2256_v2  ;;  %v2265_v60 = vsel %vm2263_vm8, %v2256_v2, %v7032_v20  ;;  %v7186_v20 = vld [vmem:[#allocation4 + $0x8] sm:$0xff] }
 0x8b6   : > { %2269 = vst [vmem:[#allocation5] sm:$0xff] %v2265_v60  ;;  %2271 = vst [vmem:[#allocation20] sm:$0xff] %v2265_v60 }
 0x8bf   : > { %v5750_v51 = vpop.eup %5749 }
 0x8c0   : > { %v2258_v61 = vmul.f32 %v5750_v51, %v2253_v55 }
 0x8c2   : > { %v2264_v7 = vsel %vm2263_vm8, %v2258_v61, %v7037_v0  ;;  %v2345_v0 = vld [vmem:[#allocation14 + $0x4] sm:$0xf] }
 0x8c3   : > { %2268 = vst [vmem:[#allocation4] sm:$0xff] %v2264_v7  ;;  %2474 = vmatmul.mubr.f32.gmra.mrb[30].mxu0 %v2264_v7  ;;  %2270 = vst [vmem:[#allocation18] sm:$0xff] %v2264_v7  ;;  %2587 = vmatmul.mubr.f32.gmra.mrb[30].mxu1 %v2264_v7  ;;  %v7226_v24 = vrot.slane %v2345_v0, %v462_v28  ;;  %v7230_v27 = vrot.slane %v2345_v0, %v466_v30  ;;  %v7738_v30 = vsub.s32 3, %v6664_v26 }
 0x8c4   : > { %2762 = vmatprep.mubr.f32.mxu0 %v7712_v11  ;;  %2833 = vmatprep.mubr.f32.mxu1 %v7712_v11  ;;  %v7235_v37 = vrot.slane %v2345_v0, %v7737_v22  ;;  %v7244_v22 = vld [vmem:[#allocation5 + $0x8] sm:$0xff] }
 0x8c5   : > { %v7241_v50 = vrot.slane %v2345_v0, %v7738_v30 }
 0x8c7   : > { %2763 = vmatmul.mubr.f32.vlgmr.msra.gmra.mrb[16].mxu0 %v7186_v20  ;;  %2834 = vmatmul.mubr.f32.vlgmr.msra.gmra.mrb[16].mxu1 %v7186_v20 }
 0x8c8   : > { %4978 = vmatpush1.bf16.msra.mxu0 %v7075_v42  ;;  %5010 = vmatpush1.bf16.msra.mxu1 %v7078_v6 }
 0x8c9   : > { %4980 = vmatprep.subr.bf16.mxu0 %v7083_v4  ;;  %5012 = vmatprep.subr.bf16.mxu1 %v7085_v18 }
 0x8ca   : > { %2933 = vmatprep.mubr.f32.mxu0 %v7712_v11  ;;  %3004 = vmatprep.mubr.f32.mxu1 %v7712_v11 }
 0x8cc   : > { %4982 = vmatpush1.bf16.msra.mxu0 %v7087_v21  ;;  %5014 = vmatpush1.bf16.msra.mxu1 %v7090_v31 }
 0x8cd   : > { %4984 = vmatprep.subr.bf16.mxu0 %v7095_v49  ;;  %5016 = vmatprep.subr.bf16.mxu1 %v7097_v8 }
 0x8d0   : > { %4986 = vmatpush1.bf16.msra.mxu0 %v7099_v13  ;;  %5018 = vmatpush1.bf16.msra.mxu1 %v7102_v12 }
 0x8d1   : > { %4988 = vmatprep.subr.bf16.mxu0 %v7107_v47  ;;  %5020 = vmatprep.subr.bf16.mxu1 %v7109_v38 }
 0x8d4   : > { %4990 = vmatpush1.bf16.msra.mxu0 %v7111_v33  ;;  %5022 = vmatpush1.bf16.msra.mxu1 %v7114_v59 }
 0x8d5   : > { %4992 = vmatprep.subr.bf16.mxu0 %v7119_v52  ;;  %5024 = vmatprep.subr.bf16.mxu1 %v7121_v54 }
 0x8d8   : > { %4994 = vmatpush1.bf16.msra.mxu0 %v7123_v58  ;;  %5026 = vmatpush1.bf16.msra.mxu1 %v7126_v10 }
 0x8d9   : > { %4996 = vmatprep.subr.bf16.mxu0 %v7131_v36  ;;  %5028 = vmatprep.subr.bf16.mxu1 %v7133_v57 }
 0x8dc   : > { %4998 = vmatpush1.bf16.msra.mxu0 %v7135_v62  ;;  %5030 = vmatpush1.bf16.msra.mxu1 %v7138_v63 }
 0x8dd   : > { %5000 = vmatprep.subr.bf16.mxu0 %v7143_v19  ;;  %5032 = vmatprep.subr.bf16.mxu1 %v7145_v29 }
 0x8e0   : > { %5002 = vmatpush1.bf16.msra.mxu0 %v7147_v5  ;;  %5034 = vmatpush1.bf16.msra.mxu1 %v7150_v46 }
 0x8e1   : > { %5004 = vmatprep.subr.bf16.mxu0 %v7155_v14  ;;  %5036 = vmatprep.subr.bf16.mxu1 %v7157_v44 }
 0x8e4   : > { %5006 = vmatpush1.bf16.msra.mxu0 %v7159_v53  ;;  %5038 = vmatpush1.bf16.msra.mxu1 %v7162_v48 }
 0x8e5   : > { %5040 = vmatprep.subr.bf16.mxu0 %v7071_v1  ;;  %5072 = vmatprep.subr.bf16.mxu1 %v7073_v39 }
 0x99a   : > { %v2764_v40 = vpop.f32.mrb[16].mxu0  ;;  %v2835_v32 = vpop.f32.mrb[16].mxu1 }
 0x99b   : > { %v5455_v17 = vadd.f32 %v2764_v40, %v7226_v24  ;;  %v2766_v16 = vpop.f32.mrb[17].mxu0  ;;  %v2837_v34 = vpop.f32.mrb[17].mxu1  ;;  %v5471_v28 = vadd.f32 %v2835_v32, %v7235_v37 }
 0x99c   : > { %v5456_v43 = vadd.f32 %v2766_v16, %v7230_v27  ;;  %v5472_v35 = vadd.f32 %v2837_v34, %v7241_v50 }
 0x99d   : > { %v2844_v2 = vmul.f32 0.5, %v5455_v17 }
 0x99e   : > { %v2848_v60 = vmul.f32 0.5, %v5456_v43  ;;  %v2853_v55 = vmul.f32 0.5, %v5472_v35 }
 0x99f   : > { %5751 = vtanh.f32 %v2844_v2 }
 0x9a0   : > { %5753 = vtanh.f32 %v2848_v60 }
 0x9a1   : > { %5755 = vtanh.f32 %v5471_v28 }
 0x9a2   : > { %5757 = vtanh.f32 %v2853_v55 }
 0x9a9   : > { %v5752_v51 = vpop.eup %5751 }
 0x9aa   : > { %v5754_v61 = vpop.eup %5753  ;;  %v2846_v7 = vadd.f32 1.0, %v5752_v51 }
 0x9ab   : > { %v2850_v40 = vadd.f32 1.0, %v5754_v61  ;;  %v5756_v16 = vpop.eup %5755 }
 0x9ac   : > { %v2847_v17 = vmul.f32 0.5, %v2846_v7  ;;  %v5758_v34 = vpop.eup %5757 }
 0x9ad   : > { %v2851_v32 = vmul.f32 0.5, %v2850_v40  ;;  %v2855_v2 = vadd.f32 1.0, %v5758_v34 }
 0x9ae   : > { %v2858_v43 = vmul.f32 %v5756_v16, %v2847_v17 }
 0x9af   : > { %v2857_v26 = vmul.f32 %v2851_v32, %v7244_v22  ;;  %v2856_v60 = vmul.f32 0.5, %v2855_v2 }
 0x9b1   : > { %v7247_v0 = vadd.f32 %v2858_v43, %v2857_v26 }
 0x9b3   : > { %5759 = vtanh.f32 %v7247_v0 }
 0x9bd   : > { %v5760_v28 = vpop.eup %5759 }
 0x9be   : > { %v2861_v30 = vmul.f32 %v5760_v28, %v2856_v60 }
 0x9c0   : > { %v7253_v35 = vsel %vm6700_vm1, %v2861_v30, %v7186_v20 }
 0x9c1   : > { %2864 = vst [vmem:[%s6476_s16] sm:$0xff] %v7253_v35  ;;  %2934 = vmatmul.mubr.f32.vlgmr.msra.gmra.mrb[18].mxu0 %v7253_v35  ;;  %3005 = vmatmul.mubr.f32.vlgmr.msra.gmra.mrb[18].mxu1 %v7253_v35 }
 0x9c2   : > { %5042 = vmatpush1.bf16.msra.mxu0 %v7075_v42  ;;  %5074 = vmatpush1.bf16.msra.mxu1 %v7078_v6 }
 0x9c3   : > { %5044 = vmatprep.subr.bf16.mxu0 %v7083_v4  ;;  %5076 = vmatprep.subr.bf16.mxu1 %v7085_v18 }
 0x9c4   : > { %3105 = vmatprep.mubr.f32.mxu0 %v7712_v11  ;;  %3176 = vmatprep.mubr.f32.mxu1 %v7712_v11 }
 0x9c6   : > { %5046 = vmatpush1.bf16.msra.mxu0 %v7087_v21  ;;  %5078 = vmatpush1.bf16.msra.mxu1 %v7090_v31 }
 0x9c7   : > { %5048 = vmatprep.subr.bf16.mxu0 %v7095_v49  ;;  %5080 = vmatprep.subr.bf16.mxu1 %v7097_v8 }
 0x9ca   : > { %5050 = vmatpush1.bf16.msra.mxu0 %v7099_v13  ;;  %5082 = vmatpush1.bf16.msra.mxu1 %v7102_v12 }
 0x9cb   : > { %5052 = vmatprep.subr.bf16.mxu0 %v7107_v47  ;;  %5084 = vmatprep.subr.bf16.mxu1 %v7109_v38 }
 0x9ce   : > { %5054 = vmatpush1.bf16.msra.mxu0 %v7111_v33  ;;  %5086 = vmatpush1.bf16.msra.mxu1 %v7114_v59 }
 0x9cf   : > { %5056 = vmatprep.subr.bf16.mxu0 %v7119_v52  ;;  %5088 = vmatprep.subr.bf16.mxu1 %v7121_v54 }
 0x9d2   : > { %5058 = vmatpush1.bf16.msra.mxu0 %v7123_v58  ;;  %5090 = vmatpush1.bf16.msra.mxu1 %v7126_v10 }
 0x9d3   : > { %5060 = vmatprep.subr.bf16.mxu0 %v7131_v36  ;;  %5092 = vmatprep.subr.bf16.mxu1 %v7133_v57 }
 0x9d6   : > { %5062 = vmatpush1.bf16.msra.mxu0 %v7135_v62  ;;  %5094 = vmatpush1.bf16.msra.mxu1 %v7138_v63 }
 0x9d7   : > { %5064 = vmatprep.subr.bf16.mxu0 %v7143_v19  ;;  %5096 = vmatprep.subr.bf16.mxu1 %v7145_v29 }
 0x9da   : > { %5066 = vmatpush1.bf16.msra.mxu0 %v7147_v5  ;;  %5098 = vmatpush1.bf16.msra.mxu1 %v7150_v46 }
 0x9db   : > { %5068 = vmatprep.subr.bf16.mxu0 %v7155_v14  ;;  %5100 = vmatprep.subr.bf16.mxu1 %v7157_v44 }
 0x9de   : > { %5070 = vmatpush1.bf16.msra.mxu0 %v7159_v53  ;;  %5102 = vmatpush1.bf16.msra.mxu1 %v7162_v48 }
 0x9df   : > { %5104 = vmatprep.subr.bf16.mxu0 %v7071_v1  ;;  %5136 = vmatprep.subr.bf16.mxu1 %v7073_v39 }
 0xa94   : > { %v2935_v20 = vpop.f32.mrb[18].mxu0  ;;  %v3006_v55 = vpop.f32.mrb[18].mxu1 }
 0xa95   : > { %v5457_v51 = vadd.f32 %v2935_v20, %v7226_v24  ;;  %v2937_v61 = vpop.f32.mrb[19].mxu0  ;;  %v3008_v7 = vpop.f32.mrb[19].mxu1  ;;  %v5473_v32 = vadd.f32 %v3006_v55, %v7235_v37 }
 0xa96   : > { %v5458_v40 = vadd.f32 %v2937_v61, %v7230_v27  ;;  %v5474_v43 = vadd.f32 %v3008_v7, %v7241_v50 }
 0xa97   : > { %v3015_v17 = vmul.f32 0.5, %v5457_v51  ;;  %v2863_v51 = vsel %vm6700_vm1, %v7247_v0, %v7244_v22 }
 0xa98   : > { %v3019_v16 = vmul.f32 0.5, %v5458_v40  ;;  %v3024_v26 = vmul.f32 0.5, %v5474_v43 }
 0xa99   : > { %5761 = vtanh.f32 %v3015_v17 }
 0xa9a   : > { %5763 = vtanh.f32 %v3019_v16 }
 0xa9b   : > { %5765 = vtanh.f32 %v5473_v32 }
 0xa9c   : > { %5767 = vtanh.f32 %v3024_v26 }
 0xaa3   : > { %v5762_v34 = vpop.eup %5761 }
 0xaa4   : > { %v5764_v2 = vpop.eup %5763  ;;  %v3017_v60 = vadd.f32 1.0, %v5762_v34 }
 0xaa5   : > { %v3021_v28 = vadd.f32 1.0, %v5764_v2  ;;  %v5766_v20 = vpop.eup %5765 }
 0xaa6   : > { %v3018_v30 = vmul.f32 0.5, %v3017_v60  ;;  %v5768_v17 = vpop.eup %5767 }
 0xaa7   : > { %v3022_v11 = vmul.f32 0.5, %v3021_v28  ;;  %v3026_v16 = vadd.f32 1.0, %v5768_v17 }
 0xaa8   : > { %v3029_v55 = vmul.f32 %v5766_v20, %v3018_v30 }
 0xaa9   : > { %v3028_v61 = vmul.f32 %v3022_v11, %v2863_v51  ;;  %v3027_v32 = vmul.f32 0.5, %v3026_v16  ;;  %v7739_v11 = vmov 0.0  }
 0xaab   : > { %v3030_v40 = vadd.f32 %v3029_v55, %v3028_v61 }
 0xaad   : > { %5769 = vtanh.f32 %v3030_v40  ;;  %v7303_v7 = vsel %vm1183_vm2, %v3030_v40, %v2863_v51 }
 0xab7   : > { %v5770_v43 = vpop.eup %5769 }
 0xab8   : > { %v3032_v26 = vmul.f32 %v5770_v43, %v3027_v32 }
 0xaba   : > { %v7308_v34 = vsel %vm1183_vm2, %v3032_v26, %v7253_v35 }
 0xabb   : > { %4301 = vst [vmem:[%s6476_s16 + $0x8] sm:$0xff] %v7308_v34  ;;  %3106 = vmatmul.mubr.f32.vlgmr.msra.gmra.mrb[20].mxu0 %v7308_v34  ;;  %3177 = vmatmul.mubr.f32.vlgmr.msra.gmra.mrb[20].mxu1 %v7308_v34 }
 0xabc   : > { %5106 = vmatpush1.bf16.msra.mxu0 %v7075_v42  ;;  %5138 = vmatpush1.bf16.msra.mxu1 %v7078_v6 }
 0xabd   : > { %5108 = vmatprep.subr.bf16.mxu0 %v7083_v4  ;;  %5140 = vmatprep.subr.bf16.mxu1 %v7085_v18 }
 0xabe   : > { %3277 = vmatprep.mubr.f32.mxu0 %v7739_v11  ;;  %3348 = vmatprep.mubr.f32.mxu1 %v7739_v11 }
 0xac0   : > { %5110 = vmatpush1.bf16.msra.mxu0 %v7087_v21  ;;  %5142 = vmatpush1.bf16.msra.mxu1 %v7090_v31 }
 0xac1   : > { %5112 = vmatprep.subr.bf16.mxu0 %v7095_v49  ;;  %5144 = vmatprep.subr.bf16.mxu1 %v7097_v8 }
 0xac4   : > { %5114 = vmatpush1.bf16.msra.mxu0 %v7099_v13  ;;  %5146 = vmatpush1.bf16.msra.mxu1 %v7102_v12 }
 0xac5   : > { %5116 = vmatprep.subr.bf16.mxu0 %v7107_v47  ;;  %5148 = vmatprep.subr.bf16.mxu1 %v7109_v38 }
 0xac8   : > { %5118 = vmatpush1.bf16.msra.mxu0 %v7111_v33  ;;  %5150 = vmatpush1.bf16.msra.mxu1 %v7114_v59 }
 0xac9   : > { %5120 = vmatprep.subr.bf16.mxu0 %v7119_v52  ;;  %5152 = vmatprep.subr.bf16.mxu1 %v7121_v54 }
 0xacc   : > { %5122 = vmatpush1.bf16.msra.mxu0 %v7123_v58  ;;  %5154 = vmatpush1.bf16.msra.mxu1 %v7126_v10 }
 0xacd   : > { %5124 = vmatprep.subr.bf16.mxu0 %v7131_v36  ;;  %5156 = vmatprep.subr.bf16.mxu1 %v7133_v57 }
 0xad0   : > { %5126 = vmatpush1.bf16.msra.mxu0 %v7135_v62  ;;  %5158 = vmatpush1.bf16.msra.mxu1 %v7138_v63 }
 0xad1   : > { %5128 = vmatprep.subr.bf16.mxu0 %v7143_v19  ;;  %5160 = vmatprep.subr.bf16.mxu1 %v7145_v29 }
 0xad4   : > { %5130 = vmatpush1.bf16.msra.mxu0 %v7147_v5  ;;  %5162 = vmatpush1.bf16.msra.mxu1 %v7150_v46 }
 0xad5   : > { %5132 = vmatprep.subr.bf16.mxu0 %v7155_v14  ;;  %5164 = vmatprep.subr.bf16.mxu1 %v7157_v44 }
 0xad8   : > { %5134 = vmatpush1.bf16.msra.mxu0 %v7159_v53  ;;  %5166 = vmatpush1.bf16.msra.mxu1 %v7162_v48 }
 0xad9   : > { %5168 = vmatprep.subr.bf16.mxu0 %v7071_v1  ;;  %5200 = vmatprep.subr.bf16.mxu1 %v7073_v39 }
 0xb8e   : > { %v3107_v56 = vpop.f32.mrb[20].mxu0  ;;  %v3178_v23 = vpop.f32.mrb[20].mxu1 }
 0xb8f   : > { %v5459_v22 = vadd.f32 %v3107_v56, %v7226_v24  ;;  %v3109_v0 = vpop.f32.mrb[21].mxu0  ;;  %v3180_v35 = vpop.f32.mrb[21].mxu1  ;;  %v5475_v30 = vadd.f32 %v3178_v23, %v7235_v37 }
 0xb90   : > { %v5460_v2 = vadd.f32 %v3109_v0, %v7230_v27  ;;  %v5476_v20 = vadd.f32 %v3180_v35, %v7241_v50 }
 0xb91   : > { %v3187_v60 = vmul.f32 0.5, %v5459_v22 }
 0xb92   : > { %v3191_v28 = vmul.f32 0.5, %v5460_v2  ;;  %v3196_v51 = vmul.f32 0.5, %v5476_v20 }
 0xb93   : > { %5771 = vtanh.f32 %v3187_v60 }
 0xb94   : > { %5773 = vtanh.f32 %v3191_v28 }
 0xb95   : > { %5775 = vtanh.f32 %v5475_v30 }
 0xb96   : > { %5777 = vtanh.f32 %v3196_v51 }
 0xb9d   : > { %v5772_v55 = vpop.eup %5771 }
 0xb9e   : > { %v5774_v61 = vpop.eup %5773  ;;  %v3189_v40 = vadd.f32 1.0, %v5772_v55 }
 0xb9f   : > { %v3193_v17 = vadd.f32 1.0, %v5774_v61  ;;  %v5776_v32 = vpop.eup %5775 }
 0xba0   : > { %v3190_v16 = vmul.f32 0.5, %v3189_v40  ;;  %v5778_v0 = vpop.eup %5777 }
 0xba1   : > { %v3194_v43 = vmul.f32 0.5, %v3193_v17  ;;  %v3198_v35 = vadd.f32 1.0, %v5778_v0 }
 0xba2   : > { %v3201_v26 = vmul.f32 %v5776_v32, %v3190_v16 }
 0xba3   : > { %v3200_v56 = vmul.f32 %v3194_v43, %v7303_v7  ;;  %v3199_v2 = vmul.f32 0.5, %v3198_v35 }
 0xba5   : > { %v3202_v22 = vadd.f32 %v3201_v26, %v3200_v56 }
 0xba7   : > { %5779 = vtanh.f32 %v3202_v22  ;;  %v7356_v23 = vsel %vm1363_vm3, %v3202_v22, %v7303_v7 }
 0xbb1   : > { %v5780_v60 = vpop.eup %5779 }
 0xbb2   : > { %v3204_v28 = vmul.f32 %v5780_v60, %v3199_v2 }
 0xbb4   : > { %v7361_v30 = vsel %vm1363_vm3, %v3204_v28, %v7308_v34 }
 0xbb5   : > { %4302 = vst [vmem:[%s6476_s16 + $0x10] sm:$0xff] %v7361_v30  ;;  %3278 = vmatmul.mubr.f32.vlgmr.msra.gmra.mrb[22].mxu0 %v7361_v30  ;;  %3349 = vmatmul.mubr.f32.vlgmr.msra.gmra.mrb[22].mxu1 %v7361_v30 }
 0xbb6   : > { %5170 = vmatpush1.bf16.msra.mxu0 %v7075_v42  ;;  %5202 = vmatpush1.bf16.msra.mxu1 %v7078_v6 }
 0xbb7   : > { %5172 = vmatprep.subr.bf16.mxu0 %v7083_v4  ;;  %5204 = vmatprep.subr.bf16.mxu1 %v7085_v18 }
 0xbb8   : > { %3449 = vmatprep.mubr.f32.mxu0 %v7739_v11  ;;  %3520 = vmatprep.mubr.f32.mxu1 %v7739_v11 }
 0xbba   : > { %5174 = vmatpush1.bf16.msra.mxu0 %v7087_v21  ;;  %5206 = vmatpush1.bf16.msra.mxu1 %v7090_v31 }
 0xbbb   : > { %5176 = vmatprep.subr.bf16.mxu0 %v7095_v49  ;;  %5208 = vmatprep.subr.bf16.mxu1 %v7097_v8 }
 0xbbe   : > { %5178 = vmatpush1.bf16.msra.mxu0 %v7099_v13  ;;  %5210 = vmatpush1.bf16.msra.mxu1 %v7102_v12 }
 0xbbf   : > { %5180 = vmatprep.subr.bf16.mxu0 %v7107_v47  ;;  %5212 = vmatprep.subr.bf16.mxu1 %v7109_v38 }
 0xbc2   : > { %5182 = vmatpush1.bf16.msra.mxu0 %v7111_v33  ;;  %5214 = vmatpush1.bf16.msra.mxu1 %v7114_v59 }
 0xbc3   : > { %5184 = vmatprep.subr.bf16.mxu0 %v7119_v52  ;;  %5216 = vmatprep.subr.bf16.mxu1 %v7121_v54 }
 0xbc6   : > { %5186 = vmatpush1.bf16.msra.mxu0 %v7123_v58  ;;  %5218 = vmatpush1.bf16.msra.mxu1 %v7126_v10 }
 0xbc7   : > { %5188 = vmatprep.subr.bf16.mxu0 %v7131_v36  ;;  %5220 = vmatprep.subr.bf16.mxu1 %v7133_v57 }
 0xbca   : > { %5190 = vmatpush1.bf16.msra.mxu0 %v7135_v62  ;;  %5222 = vmatpush1.bf16.msra.mxu1 %v7138_v63 }
 0xbcb   : > { %5192 = vmatprep.subr.bf16.mxu0 %v7143_v19  ;;  %5224 = vmatprep.subr.bf16.mxu1 %v7145_v29 }
 0xbce   : > { %5194 = vmatpush1.bf16.msra.mxu0 %v7147_v5  ;;  %5226 = vmatpush1.bf16.msra.mxu1 %v7150_v46 }
 0xbcf   : > { %5196 = vmatprep.subr.bf16.mxu0 %v7155_v14  ;;  %5228 = vmatprep.subr.bf16.mxu1 %v7157_v44 }
 0xbd2   : > { %5198 = vmatpush1.bf16.msra.mxu0 %v7159_v53  ;;  %5230 = vmatpush1.bf16.msra.mxu1 %v7162_v48 }
 0xbd3   : > { %5232 = vmatprep.subr.bf16.mxu0 %v7071_v1  ;;  %5264 = vmatprep.subr.bf16.mxu1 %v7073_v39 }
 0xc88   : > { %v3279_v41 = vpop.f32.mrb[22].mxu0  ;;  %v3350_v7 = vpop.f32.mrb[22].mxu1 }
 0xc89   : > { %v5461_v34 = vadd.f32 %v3279_v41, %v7226_v24  ;;  %v3281_v20 = vpop.f32.mrb[23].mxu0  ;;  %v3352_v51 = vpop.f32.mrb[23].mxu1  ;;  %v5477_v17 = vadd.f32 %v3350_v7, %v7235_v37 }
 0xc8a   : > { %v5462_v55 = vadd.f32 %v3281_v20, %v7230_v27  ;;  %v5478_v16 = vadd.f32 %v3352_v51, %v7241_v50 }
 0xc8b   : > { %v3359_v61 = vmul.f32 0.5, %v5461_v34 }
 0xc8c   : > { %v3363_v40 = vmul.f32 0.5, %v5462_v55  ;;  %v3368_v32 = vmul.f32 0.5, %v5478_v16 }
 0xc8d   : > { %5781 = vtanh.f32 %v3359_v61 }
 0xc8e   : > { %5783 = vtanh.f32 %v3363_v40 }
 0xc8f   : > { %5785 = vtanh.f32 %v5477_v17 }
 0xc90   : > { %5787 = vtanh.f32 %v3368_v32 }
 0xc97   : > { %v5782_v43 = vpop.eup %5781 }
 0xc98   : > { %v5784_v26 = vpop.eup %5783  ;;  %v3361_v56 = vadd.f32 1.0, %v5782_v43 }
 0xc99   : > { %v3365_v22 = vadd.f32 1.0, %v5784_v26  ;;  %v5786_v35 = vpop.eup %5785 }
 0xc9a   : > { %v3362_v0 = vmul.f32 0.5, %v3361_v56  ;;  %v5788_v34 = vpop.eup %5787 }
 0xc9b   : > { %v3366_v2 = vmul.f32 0.5, %v3365_v22  ;;  %v3370_v20 = vadd.f32 1.0, %v5788_v34 }
 0xc9c   : > { %v3373_v60 = vmul.f32 %v5786_v35, %v3362_v0 }
 0xc9d   : > { %v3372_v28 = vmul.f32 %v3366_v2, %v7356_v23  ;;  %v3371_v51 = vmul.f32 0.5, %v3370_v20 }
 0xc9f   : > { %v3374_v41 = vadd.f32 %v3373_v60, %v3372_v28 }
 0xca1   : > { %5789 = vtanh.f32 %v3374_v41  ;;  %v7409_v7 = vsel %vm1543_vm4, %v3374_v41, %v7356_v23 }
 0xcab   : > { %v5790_v55 = vpop.eup %5789 }
 0xcac   : > { %v3376_v61 = vmul.f32 %v5790_v55, %v3371_v51 }
 0xcae   : > { %v7414_v40 = vsel %vm1543_vm4, %v3376_v61, %v7361_v30 }
 0xcaf   : > { %4303 = vst [vmem:[%s6476_s16 + $0x18] sm:$0xff] %v7414_v40  ;;  %3450 = vmatmul.mubr.f32.vlgmr.msra.gmra.mrb[24].mxu0 %v7414_v40  ;;  %3521 = vmatmul.mubr.f32.vlgmr.msra.gmra.mrb[24].mxu1 %v7414_v40 }
 0xcb0   : > { %5234 = vmatpush1.bf16.msra.mxu0 %v7075_v42  ;;  %5266 = vmatpush1.bf16.msra.mxu1 %v7078_v6 }
 0xcb1   : > { %5236 = vmatprep.subr.bf16.mxu0 %v7083_v4  ;;  %5268 = vmatprep.subr.bf16.mxu1 %v7085_v18 }
 0xcb2   : > { %3621 = vmatprep.mubr.f32.mxu0 %v7739_v11  ;;  %3692 = vmatprep.mubr.f32.mxu1 %v7739_v11 }
 0xcb4   : > { %5238 = vmatpush1.bf16.msra.mxu0 %v7087_v21  ;;  %5270 = vmatpush1.bf16.msra.mxu1 %v7090_v31 }
 0xcb5   : > { %5240 = vmatprep.subr.bf16.mxu0 %v7095_v49  ;;  %5272 = vmatprep.subr.bf16.mxu1 %v7097_v8 }
 0xcb8   : > { %5242 = vmatpush1.bf16.msra.mxu0 %v7099_v13  ;;  %5274 = vmatpush1.bf16.msra.mxu1 %v7102_v12 }
 0xcb9   : > { %5244 = vmatprep.subr.bf16.mxu0 %v7107_v47  ;;  %5276 = vmatprep.subr.bf16.mxu1 %v7109_v38 }
 0xcbc   : > { %5246 = vmatpush1.bf16.msra.mxu0 %v7111_v33  ;;  %5278 = vmatpush1.bf16.msra.mxu1 %v7114_v59 }
 0xcbd   : > { %5248 = vmatprep.subr.bf16.mxu0 %v7119_v52  ;;  %5280 = vmatprep.subr.bf16.mxu1 %v7121_v54 }
 0xcc0   : > { %5250 = vmatpush1.bf16.msra.mxu0 %v7123_v58  ;;  %5282 = vmatpush1.bf16.msra.mxu1 %v7126_v10 }
 0xcc1   : > { %5252 = vmatprep.subr.bf16.mxu0 %v7131_v36  ;;  %5284 = vmatprep.subr.bf16.mxu1 %v7133_v57 }
 0xcc4   : > { %5254 = vmatpush1.bf16.msra.mxu0 %v7135_v62  ;;  %5286 = vmatpush1.bf16.msra.mxu1 %v7138_v63 }
 0xcc5   : > { %5256 = vmatprep.subr.bf16.mxu0 %v7143_v19  ;;  %5288 = vmatprep.subr.bf16.mxu1 %v7145_v29 }
 0xcc8   : > { %5258 = vmatpush1.bf16.msra.mxu0 %v7147_v5  ;;  %5290 = vmatpush1.bf16.msra.mxu1 %v7150_v46 }
 0xcc9   : > { %5260 = vmatprep.subr.bf16.mxu0 %v7155_v14  ;;  %5292 = vmatprep.subr.bf16.mxu1 %v7157_v44 }
 0xccc   : > { %5262 = vmatpush1.bf16.msra.mxu0 %v7159_v53  ;;  %5294 = vmatpush1.bf16.msra.mxu1 %v7162_v48 }
 0xccd   : > { %5296 = vmatprep.subr.bf16.mxu0 %v7071_v1  ;;  %5328 = vmatprep.subr.bf16.mxu1 %v7073_v39 }
 0xd82   : > { %v3451_v25 = vpop.f32.mrb[24].mxu0  ;;  %v3522_v23 = vpop.f32.mrb[24].mxu1 }
 0xd83   : > { %v5463_v30 = vadd.f32 %v3451_v25, %v7226_v24  ;;  %v3453_v17 = vpop.f32.mrb[25].mxu0  ;;  %v3524_v16 = vpop.f32.mrb[25].mxu1  ;;  %v5479_v56 = vadd.f32 %v3522_v23, %v7235_v37 }
 0xd84   : > { %v5464_v32 = vadd.f32 %v3453_v17, %v7230_v27  ;;  %v5480_v22 = vadd.f32 %v3524_v16, %v7241_v50 }
 0xd85   : > { %v3531_v43 = vmul.f32 0.5, %v5463_v30 }
 0xd86   : > { %v3535_v26 = vmul.f32 0.5, %v5464_v32  ;;  %v3540_v0 = vmul.f32 0.5, %v5480_v22 }
 0xd87   : > { %5791 = vtanh.f32 %v3531_v43 }
 0xd88   : > { %5793 = vtanh.f32 %v3535_v26 }
 0xd89   : > { %5795 = vtanh.f32 %v5479_v56 }
 0xd8a   : > { %5797 = vtanh.f32 %v3540_v0 }
 0xd91   : > { %v5792_v35 = vpop.eup %5791 }
 0xd92   : > { %v5794_v2 = vpop.eup %5793  ;;  %v3533_v60 = vadd.f32 1.0, %v5792_v35 }
 0xd93   : > { %v3537_v28 = vadd.f32 1.0, %v5794_v2  ;;  %v5796_v34 = vpop.eup %5795 }
 0xd94   : > { %v3534_v41 = vmul.f32 0.5, %v3533_v60  ;;  %v5798_v23 = vpop.eup %5797 }
 0xd95   : > { %v3538_v20 = vmul.f32 0.5, %v3537_v28  ;;  %v3542_v30 = vadd.f32 1.0, %v5798_v23 }
 0xd96   : > { %v3545_v51 = vmul.f32 %v5796_v34, %v3534_v41 }
 0xd97   : > { %v3544_v55 = vmul.f32 %v3538_v20, %v7409_v7  ;;  %v3543_v17 = vmul.f32 0.5, %v3542_v30 }
 0xd99   : > { %v3546_v61 = vadd.f32 %v3545_v51, %v3544_v55 }
 0xd9b   : > { %5799 = vtanh.f32 %v3546_v61  ;;  %v7462_v25 = vsel %vm1723_vm5, %v3546_v61, %v7409_v7 }
 0xda5   : > { %v5800_v16 = vpop.eup %5799 }
 0xda6   : > { %v3548_v32 = vmul.f32 %v5800_v16, %v3543_v17 }
 0xda8   : > { %v7467_v43 = vsel %vm1723_vm5, %v3548_v32, %v7414_v40 }
 0xda9   : > { %4304 = vst [vmem:[%s6476_s16 + $0x20] sm:$0xff] %v7467_v43  ;;  %3622 = vmatmul.mubr.f32.vlgmr.msra.gmra.mrb[26].mxu0 %v7467_v43  ;;  %3693 = vmatmul.mubr.f32.vlgmr.msra.gmra.mrb[26].mxu1 %v7467_v43 }
 0xdaa   : > { %5298 = vmatpush1.bf16.msra.mxu0 %v7075_v42  ;;  %5330 = vmatpush1.bf16.msra.mxu1 %v7078_v6 }
 0xdab   : > { %5300 = vmatprep.subr.bf16.mxu0 %v7083_v4  ;;  %5332 = vmatprep.subr.bf16.mxu1 %v7085_v18 }
 0xdac   : > { %3793 = vmatprep.mubr.f32.mxu0 %v7739_v11  ;;  %3864 = vmatprep.mubr.f32.mxu1 %v7739_v11 }
 0xdae   : > { %5302 = vmatpush1.bf16.msra.mxu0 %v7087_v21  ;;  %5334 = vmatpush1.bf16.msra.mxu1 %v7090_v31 }
 0xdaf   : > { %5304 = vmatprep.subr.bf16.mxu0 %v7095_v49  ;;  %5336 = vmatprep.subr.bf16.mxu1 %v7097_v8 }
 0xdb2   : > { %5306 = vmatpush1.bf16.msra.mxu0 %v7099_v13  ;;  %5338 = vmatpush1.bf16.msra.mxu1 %v7102_v12 }
 0xdb3   : > { %5308 = vmatprep.subr.bf16.mxu0 %v7107_v47  ;;  %5340 = vmatprep.subr.bf16.mxu1 %v7109_v38 }
 0xdb6   : > { %5310 = vmatpush1.bf16.msra.mxu0 %v7111_v33  ;;  %5342 = vmatpush1.bf16.msra.mxu1 %v7114_v59 }
 0xdb7   : > { %5312 = vmatprep.subr.bf16.mxu0 %v7119_v52  ;;  %5344 = vmatprep.subr.bf16.mxu1 %v7121_v54 }
 0xdba   : > { %5314 = vmatpush1.bf16.msra.mxu0 %v7123_v58  ;;  %5346 = vmatpush1.bf16.msra.mxu1 %v7126_v10 }
 0xdbb   : > { %5316 = vmatprep.subr.bf16.mxu0 %v7131_v36  ;;  %5348 = vmatprep.subr.bf16.mxu1 %v7133_v57 }
 0xdbe   : > { %5318 = vmatpush1.bf16.msra.mxu0 %v7135_v62  ;;  %5350 = vmatpush1.bf16.msra.mxu1 %v7138_v63 }
 0xdbf   : > { %5320 = vmatprep.subr.bf16.mxu0 %v7143_v19  ;;  %5352 = vmatprep.subr.bf16.mxu1 %v7145_v29 }
 0xdc2   : > { %5322 = vmatpush1.bf16.msra.mxu0 %v7147_v5  ;;  %5354 = vmatpush1.bf16.msra.mxu1 %v7150_v46 }
 0xdc3   : > { %5324 = vmatprep.subr.bf16.mxu0 %v7155_v14  ;;  %5356 = vmatprep.subr.bf16.mxu1 %v7157_v44 }
 0xdc6   : > { %5326 = vmatpush1.bf16.msra.mxu0 %v7159_v53  ;;  %5358 = vmatpush1.bf16.msra.mxu1 %v7162_v48 }
 0xdc7   : > { %5360 = vmatprep.subr.bf16.mxu0 %v7071_v1  ;;  %5392 = vmatprep.subr.bf16.mxu1 %v7073_v39 }
 0xe7c   : > { %v3623_v15 = vpop.f32.mrb[26].mxu0  ;;  %v3694_v7 = vpop.f32.mrb[26].mxu1 }
 0xe7d   : > { %v5465_v40 = vadd.f32 %v3623_v15, %v7226_v24  ;;  %v3625_v26 = vpop.f32.mrb[27].mxu0  ;;  %v3696_v56 = vpop.f32.mrb[27].mxu1  ;;  %v5481_v2 = vadd.f32 %v3694_v7, %v7235_v37 }
 0xe7e   : > { %v5466_v22 = vadd.f32 %v3625_v26, %v7230_v27  ;;  %v5482_v60 = vadd.f32 %v3696_v56, %v7241_v50 }
 0xe7f   : > { %v3703_v0 = vmul.f32 0.5, %v5465_v40 }
 0xe80   : > { %v3707_v35 = vmul.f32 0.5, %v5466_v22  ;;  %v3712_v1 = vmul.f32 0.5, %v5482_v60 }
 0xe81   : > { %5801 = vtanh.f32 %v3703_v0 }
 0xe82   : > { %5803 = vtanh.f32 %v3707_v35 }
 0xe83   : > { %5805 = vtanh.f32 %v5481_v2 }
 0xe84   : > { %5807 = vtanh.f32 %v3712_v1 }
 0xe8b   : > { %v5802_v28 = vpop.eup %5801 }
 0xe8c   : > { %v5804_v39 = vpop.eup %5803  ;;  %v3705_v41 = vadd.f32 1.0, %v5802_v28 }
 0xe8d   : > { %v3709_v34 = vadd.f32 1.0, %v5804_v39  ;;  %v5806_v51 = vpop.eup %5805 }
 0xe8e   : > { %v3706_v20 = vmul.f32 0.5, %v3705_v41  ;;  %v5808_v16 = vpop.eup %5807 }
 0xe8f   : > { %v3710_v55 = vmul.f32 0.5, %v3709_v34  ;;  %v3714_v32 = vadd.f32 1.0, %v5808_v16 }
 0xe90   : > { %v3717_v61 = vmul.f32 %v5806_v51, %v3706_v20 }
 0xe91   : > { %v3716_v23 = vmul.f32 %v3710_v55, %v7462_v25  ;;  %v3715_v15 = vmul.f32 0.5, %v3714_v32 }
 0xe93   : > { %v3718_v30 = vadd.f32 %v3717_v61, %v3716_v23 }
 0xe95   : > { %5809 = vtanh.f32 %v3718_v30  ;;  %v7515_v17 = vsel %vm1903_vm6, %v3718_v30, %v7462_v25 }
 0xe9f   : > { %v5810_v7 = vpop.eup %5809 }
 0xea0   : > { %v3720_v40 = vmul.f32 %v5810_v7, %v3715_v15 }
 0xea2   : > { %v7520_v26 = vsel %vm1903_vm6, %v3720_v40, %v7467_v43 }
 0xea3   : > { %4305 = vst [vmem:[%s6476_s16 + $0x28] sm:$0xff] %v7520_v26  ;;  %3794 = vmatmul.mubr.f32.vlgmr.msra.gmra.mrb[28].mxu0 %v7520_v26  ;;  %3865 = vmatmul.mubr.f32.vlgmr.msra.gmra.mrb[28].mxu1 %v7520_v26 }
 0xea4   : > { %5362 = vmatpush1.bf16.msra.mxu0 %v7075_v42  ;;  %5394 = vmatpush1.bf16.msra.mxu1 %v7078_v6 }
 0xea5   : > { %5364 = vmatprep.subr.bf16.mxu0 %v7083_v4  ;;  %5396 = vmatprep.subr.bf16.mxu1 %v7085_v18 }
 0xea6   : > { %3965 = vmatprep.mubr.f32.mxu0 %v7739_v11  ;;  %4036 = vmatprep.mubr.f32.mxu1 %v7739_v11 }
 0xea8   : > { %5366 = vmatpush1.bf16.msra.mxu0 %v7087_v21  ;;  %5398 = vmatpush1.bf16.msra.mxu1 %v7090_v31 }
 0xea9   : > { %5368 = vmatprep.subr.bf16.mxu0 %v7095_v49  ;;  %5400 = vmatprep.subr.bf16.mxu1 %v7097_v8 }
 0xeac   : > { %5370 = vmatpush1.bf16.msra.mxu0 %v7099_v13  ;;  %5402 = vmatpush1.bf16.msra.mxu1 %v7102_v12 }
 0xead   : > { %5372 = vmatprep.subr.bf16.mxu0 %v7107_v47  ;;  %5404 = vmatprep.subr.bf16.mxu1 %v7109_v38 }
 0xeb0   : > { %5374 = vmatpush1.bf16.msra.mxu0 %v7111_v33  ;;  %5406 = vmatpush1.bf16.msra.mxu1 %v7114_v59 }
 0xeb1   : > { %5376 = vmatprep.subr.bf16.mxu0 %v7119_v52  ;;  %5408 = vmatprep.subr.bf16.mxu1 %v7121_v54 }
 0xeb4   : > { %5378 = vmatpush1.bf16.msra.mxu0 %v7123_v58  ;;  %5410 = vmatpush1.bf16.msra.mxu1 %v7126_v10 }
 0xeb5   : > { %5380 = vmatprep.subr.bf16.mxu0 %v7131_v36  ;;  %5412 = vmatprep.subr.bf16.mxu1 %v7133_v57 }
 0xeb8   : > { %5382 = vmatpush1.bf16.msra.mxu0 %v7135_v62  ;;  %5414 = vmatpush1.bf16.msra.mxu1 %v7138_v63 }
 0xeb9   : > { %5384 = vmatprep.subr.bf16.mxu0 %v7143_v19  ;;  %5416 = vmatprep.subr.bf16.mxu1 %v7145_v29 }
 0xebc   : > { %5386 = vmatpush1.bf16.msra.mxu0 %v7147_v5  ;;  %5418 = vmatpush1.bf16.msra.mxu1 %v7150_v46 }
 0xebd   : > { %5388 = vmatprep.subr.bf16.mxu0 %v7155_v14  ;;  %5420 = vmatprep.subr.bf16.mxu1 %v7157_v44 }
 0xec0   : > { %5390 = vmatpush1.bf16.msra.mxu0 %v7159_v53  ;;  %5422 = vmatpush1.bf16.msra.mxu1 %v7162_v48 }
 0xf76   : > { %v3795_v9 = vpop.f32.mrb[28].mxu0  ;;  %v3866_v42 = vpop.f32.mrb[28].mxu1 }
 0xf77   : > { %v5467_v6 = vadd.f32 %v3795_v9, %v7226_v24  ;;  %v3797_v4 = vpop.f32.mrb[29].mxu0  ;;  %v3868_v18 = vpop.f32.mrb[29].mxu1  ;;  %v5483_v8 = vadd.f32 %v3866_v42, %v7235_v37 }
 0xf78   : > { %v5468_v21 = vadd.f32 %v3797_v4, %v7230_v27  ;;  %v5484_v13 = vadd.f32 %v3868_v18, %v7241_v50 }
 0xf79   : > { %v3875_v31 = vmul.f32 0.5, %v5467_v6 }
 0xf7a   : > { %v3879_v49 = vmul.f32 0.5, %v5468_v21  ;;  %v3884_v12 = vmul.f32 0.5, %v5484_v13 }
 0xf7b   : > { %5811 = vtanh.f32 %v3875_v31 }
 0xf7c   : > { %5813 = vtanh.f32 %v3879_v49 }
 0xf7d   : > { %5815 = vtanh.f32 %v5483_v8 }
 0xf7e   : > { %5817 = vtanh.f32 %v3884_v12 }
 0xf85   : > { %v5812_v47 = vpop.eup %5811 }
 0xf86   : > { %v5814_v38 = vpop.eup %5813  ;;  %v3877_v33 = vadd.f32 1.0, %v5812_v47 }
 0xf87   : > { %v3881_v59 = vadd.f32 1.0, %v5814_v38  ;;  %v5816_v54 = vpop.eup %5815 }
 0xf88   : > { %v3878_v52 = vmul.f32 0.5, %v3877_v33  ;;  %v5818_v63 = vpop.eup %5817 }
 0xf89   : > { %v3882_v58 = vmul.f32 0.5, %v3881_v59  ;;  %v3886_v19 = vadd.f32 1.0, %v5818_v63 }
 0xf8a   : > { %v3889_v10 = vmul.f32 %v5816_v54, %v3878_v52 }
 0xf8b   : > { %v3888_v36 = vmul.f32 %v3882_v58, %v7515_v17  ;;  %v3887_v29 = vmul.f32 0.5, %v3886_v19 }
 0xf8d   : > { %v3890_v57 = vadd.f32 %v3889_v10, %v3888_v36 }
 0xf8f   : > { %5819 = vtanh.f32 %v3890_v57  ;;  %v3894_v62 = vsel %vm2083_vm7, %v3890_v57, %v7515_v17 }
 0xf99   : > { %v5820_v5 = vpop.eup %5819 }
 0xf9a   : > { %v3892_v46 = vmul.f32 %v5820_v5, %v3887_v29 }
 0xf9c   : > { %v3893_v14 = vsel %vm2083_vm7, %v3892_v46, %v7520_v26 }
 0xf9d   : > { %4306 = vst [vmem:[%s6476_s16 + $0x30] sm:$0xff] %v3893_v14  ;;  %3966 = vmatmul.mubr.f32.vlgmr.msra.gmra.mrb[30].mxu0 %v3893_v14  ;;  %4037 = vmatmul.mubr.f32.vlgmr.msra.gmra.mrb[30].mxu1 %v3893_v14 }
0x1070   : > { %v3967_v44 = vpop.f32.mrb[30].mxu0  ;;  %v4038_v53 = vpop.f32.mrb[30].mxu1 }
0x1071   : > { %v5469_v48 = vadd.f32 %v3967_v44, %v7226_v24  ;;  %v3969_v11 = vpop.f32.mrb[31].mxu0  ;;  %v4040_v25 = vpop.f32.mrb[31].mxu1  ;;  %v5485_v0 = vadd.f32 %v4038_v53, %v7235_v37 }
0x1072   : > { %v5470_v43 = vadd.f32 %v3969_v11, %v7230_v27  ;;  %v5486_v3 = vadd.f32 %v4040_v25, %v7241_v50 }
0x1073   : > { %v4047_v56 = vmul.f32 0.5, %v5469_v48 }
0x1074   : > { %v4051_v22 = vmul.f32 0.5, %v5470_v43  ;;  %v4056_v35 = vmul.f32 0.5, %v5486_v3 }
0x1075   : > { %5821 = vtanh.f32 %v4047_v56 }
0x1076   : > { %5823 = vtanh.f32 %v4051_v22 }
0x1077   : > { %5825 = vtanh.f32 %v5485_v0 }
0x1078   : > { %5827 = vtanh.f32 %v4056_v35 }
0x107f   : > { %v5822_v2 = vpop.eup %5821 }
0x1080   : > { %v5824_v60 = vpop.eup %5823  ;;  %v4049_v1 = vadd.f32 1.0, %v5822_v2 }
0x1081   : > { %v4053_v28 = vadd.f32 1.0, %v5824_v60  ;;  %v5826_v39 = vpop.eup %5825 }
0x1082   : > { %v4050_v24 = vmul.f32 0.5, %v4049_v1  ;;  %v5828_v50 = vpop.eup %5827 }
0x1083   : > { %v4054_v27 = vmul.f32 0.5, %v4053_v28  ;;  %v4058_v51 = vadd.f32 1.0, %v5828_v50 }
0x1084   : > { %v4061_v41 = vmul.f32 %v5826_v39, %v4050_v24 }
0x1085   : > { %v4060_v34 = vmul.f32 %v4054_v27, %v3894_v62  ;;  %v4059_v55 = vmul.f32 0.5, %v4058_v51 }
0x1087   : > { %v4062_v20 = vadd.f32 %v4061_v41, %v4060_v34 }
0x1089   : > { %5829 = vtanh.f32 %v4062_v20  ;;  %v4066_v37 = vsel %vm2263_vm8, %v4062_v20, %v3894_v62 }
0x108a   : > { %4070 = vst [vmem:[#allocation5 + $0x8] sm:$0xff] %v4066_v37  ;;  %4074 = vst [vmem:[#allocation20 + $0x8] sm:$0xff] %v4066_v37 }
0x1093   : > { %v5830_v61 = vpop.eup %5829 }
0x1094   : > { %v4064_v23 = vmul.f32 %v5830_v61, %v4059_v55 }
0x1096   : > { %v4065_v30 = vsel %vm2263_vm8, %v4064_v23, %v3893_v14 }
0x1097   : > { %4307 = vst [vmem:[%s6476_s16 + $0x38] sm:$0xff] %v4065_v30  ;;  %4069 = vst [vmem:[#allocation4 + $0x8] sm:$0xff] %v4065_v30 }
0x1098   : > { %4072 = vst [vmem:[#allocation18 + $0x8] sm:$0xff] %v4065_v30 }
0x1099   : > { %6014 = shalt.err (!%p6011_p12)
}
0x109a   : > { %s6015_s16 = scalar_lea.hbm %s7701_s8, 256  ;;  %p7741_p13 = pmov %p7740_p11 }
0x109b   : > { %p6016_p1 = scmp.ne.s32.totalorder %s7701_s8, %s6015_s16  ;;  %p6021_p0 = scmp.lt.u32.totalorder %s6015_s16, %s7701_s8 }
0x109d   : > { %p6017_p2 = pnand %p6016_p1, %p7741_p13 }
0x109f   : > { %p6018_p6 = pneg %p6017_p2 }
0x10a1   : > { %p6023_p7 = pnand %p6021_p0, %p6018_p6 }
0x10a3   : > { %6026 = shalt.err (!%p6023_p7)
}
0x10a4   : > { %s6152_s29 = smov 128   ;;  %s6153_s18 = smov 8  }
0x10a5   : > { %p7742_p5 = pmov %p7740_p11  ;;  %s6027_s14 = scalar_lea.vmem %s7587_s28, 1024 }
0x10a6   : > { %p6028_p11 = scmp.ne.s32.totalorder %s7587_s28, %s6027_s14  ;;  %p7743_p9 = scmp.ne.s32.totalorder %s7721_s24, 0 }
0x10a7   : > { %5575 = dma.vmem_to_hbm [thread:$0]  (%p7742_p5), %s7578_s21, 256, %s7701_s8, [#allocation19], %s6152_s29, %s6152_s29, %s6153_s18  }
0x10a8   : > { %p6029_p4 = pnand %p6028_p11, %p7743_p9  ;;  %s6154_s20 = smov [#allocation17]  }
0x10a9   : > { %s6031_s27 = sshll.u32 %s6154_s20, 4  ;;  %s6032_s27 = int_to_ptr.vmem [resolvable:$false] %s6031_s27 }
0x10aa   : > { %p6030_p10 = pneg %p6029_p4  ;;  %s6033_s0 = scalar_lea.vmem %s6032_s27, 2048 }
0x10ab   : > { %p6034_p8 = scmp.lt.s32.totalorder %s7587_s28, %s6032_s27  ;;  %p6035_p3 = scmp.lt.s32.totalorder %s6033_s0, %s6027_s14 }
0x10ad   : > { %p6036_p12 = por %p6035_p3, %p6034_p8 }
0x10af   : > { %p6037_p1 = pnand %p6036_p12, %p6030_p10 }
0x10b1   : > { %6040 = shalt.err (!%p6037_p1)
}
0x10b2   : > { %s6041_s21 = scalar_lea.hbm %s7585_s23, 1024  ;;  %s6045_s20 = scalar_lea.hbm %s7700_s7, 2048 }
0x10b3   : > { %p6042_p13 = scmp.ne.s32.totalorder %s7585_s23, %s6041_s21  ;;  %p6046_p0 = scmp.lt.u32.totalorder %s7585_s23, %s7700_s7 }
0x10b4   : > { %p6047_p7 = scmp.lt.u32.totalorder %s6045_s20, %s6041_s21  ;;  %p6049_p11 = scmp.lt.u32.totalorder %s6041_s21, %s7585_s23 }
0x10b5   : > { %p6043_p2 = pnand %p6042_p13, %p7743_p9 }
0x10b6   : > { %p6048_p5 = por %p6047_p7, %p6046_p0 }
0x10b7   : > { %p6044_p6 = pneg %p6043_p2 }
0x10b8   : > { %p6050_p4 = por %p6049_p11, %p6048_p5 }
0x10ba   : > { %p6051_p10 = pnand %p6050_p4, %p6044_p6 }
0x10bc   : > { %6054 = shalt.err (!%p6051_p10)
}
0x10bd   : > { %s7744_s0 = scalar_lea.sflag [#allocation8], %s6454_s25  ;;  %s6055_s16 = scalar_lea.vmem %s7590_s26, 256 }
0x10be   : > { %5573 = dma.vmem_to_hbm [thread:$0]  (%p7743_p9), %s7587_s28, 1024, %s7585_s23, %s7744_s0, %s6152_s29, %s6152_s29, %s6153_s18  }
0x10bf   : > { %p6056_p8 = scmp.ne.s32.totalorder %s7590_s26, %s6055_s16  ;;  %p7745_p3 = scmp.eq.s32.totalorder %s6226_s15, 1 }
0x10c0   : > { %p6062_p13 = scmp.lt.s32.totalorder %s7590_s26, %s7590_s26  ;;  %p6063_p2 = scmp.lt.s32.totalorder %s6055_s16, %s6055_s16 }
0x10c1   : > { %p6057_p12 = pnand %p6056_p8, %p7745_p3 }
0x10c2   : > { %p6064_p6 = por %p6063_p2, %p6062_p13 }
0x10c3   : > { %p6058_p1 = pneg %p6057_p12 }
0x10c5   : > { %p6065_p0 = pnand %p6064_p6, %p6058_p1 }
0x10c7   : > { %6068 = shalt.err (!%p6065_p0)
}
0x10c8   : > { %s7746_s14 = sld [smem:[#allocation28_spill]]  ;;  %p7747_p7 = pmov %p7745_p3 }
0x10ce   : > { %s6069_s21 = scalar_lea.hbm %s7746_s14, 256 }
0x10cf   : > { %p6070_p9 = scmp.ne.s32.totalorder %s7746_s14, %s6069_s21  ;;  %p6075_p4 = scmp.lt.u32.totalorder %s6069_s21, %s7746_s14 }
0x10d1   : > { %p6071_p5 = pnand %p6070_p9, %p7747_p7 }
0x10d3   : > { %p6072_p11 = pneg %p6071_p5 }
0x10d5   : > { %p6077_p10 = pnand %p6075_p4, %p6072_p11 }
0x10d7   : > { %6080 = shalt.err (!%p6077_p10)
}
0x10d8   : > { %p7748_p8 = pmov %p7745_p3 }
0x10da   : > { %5577 = dma.vmem_to_hbm [thread:$0]  (%p7748_p8), %s7590_s26, 256, %s7746_s14, [#allocation19], %s6152_s29, %s6152_s29, %s6153_s18  }
0x10db   : > { %6114 = dma.done.wait (%p7745_p3), [#allocation19], 512   ;;  %p7749_p12 = pmov %p7745_p3 }
0x10dd   : > { %6116 = vsyncadd (%p7749_p12), [#allocation19], 4294966784 }
0x10de PF: > { %s4138_s0 = sand.u32 1, %s6123_s30   ;;  %p7750_p1 = scmp.ne.s32.totalorder %s7722_s13, 0 }
0x10df   : > { %p7751_p13 = scmp.ge.s32.totalorder %s6135_s12, 2  ;;  %s4139_s16 = scalar_lea.sflag [#allocation8], %s4138_s0 }
0x10e1   : > { %p5604_p2 = pnand %p7751_p13, %p7750_p1 }
0x10e3   : > { %6118 = dma.done.wait (!%p5604_p2), %s4139_s16, 1024  }
0x10e4   : > { %6120 = vsyncadd (!%p5604_p2), %s4139_s16, 4294966272  ;;  %p27_p6 = scmp.ge.s32.totalorder %s6376_s22, 4   ;;  %s7752_s30 = smov %s6127_s10 }
0x10e5   : > { %s7753_s10 = smov %s6131_s11  ;;  %s7754_s11 = smov %s6388_s19 }
0x10e6   : > { %s7755_s12 = smov %s6376_s22  ;;  %29 = sbr.rel (!%p27_p6) target bundleno = 12 (0xc), region = 161 }
0x10ed   :  { %4144 = vsyncpa [#allocation7], 1 }
0x10ee   :  { %4146 = vsyncpa [#allocation7 + $0x1], 1 }
0x10ef   :  { %4147 = vsyncpa [#allocation10], 1 }
0x10f0   :  { %4148 = vsyncpa [#allocation13], 1 }
0x10f1   :  { %4149 = vsyncpa [#allocation16], 1 }
0x10f2   :  { %4150 = vsyncpa [#allocation8], 1 }
0x10f3   :  { %4152 = vsyncpa [#allocation8 + $0x1], 1 }
0x10f4   :  { %4153 = vsyncpa [#allocation19], 1 }

</bundles_post_ra>
